<compile_context>
chip_gen: v5e
topology: v5e:2x2
jax: 0.10.0
libtpu: 0.0.40
codegen_flags: <defaults>
</compile_context>

<pallas_src>
import math
import functools

import jax
import jax.numpy as jnp
from jax import lax
from jax.experimental import pallas as pl
from jax.experimental.pallas import tpu as pltpu


# ----------------------------- configuration -------------------------------

CFG = dict(vocab_size=100, hidden=32, heads=4, layers=2, intermediate=128,
           max_pos=24, type_vocab=1, pad_id=1, num_classes=2)

MXU_DTYPE = jnp.bfloat16      # MXU input dtype (f32 accumulation).  Use
                              # jnp.float32 here for bit-exact golden checks.
LN_EPS = 1e-5                 # RoBERTa layer_norm_eps
MASK_NEG = -1e9               # additive attention-mask value


# --------------------------- in-kernel helpers ------------------------------

# XLA's float32 erf rational approximation (Cephes-style), so the exact-erf
# GELU matches jax.nn.gelu(approximate=False) numerics without relying on an
# erf primitive lowering inside Mosaic.
_ERF_ALPHA = (2.2905065861350646e-04, 3.4082910107109506e-03,
              5.0955695062380861e-02, 1.8520832239976145e-01,
              1.1283791435190840e+00)
_ERF_BETA = (-1.1791602954361697e-07, 2.3547966471313185e-05,
             1.0179625278914885e-03, 1.4070470171167667e-02,
             1.1098505178285362e-01, 4.9746925110067538e-01,
             1.0)


def _poly(x, coeffs):
    acc = coeffs[0]
    for c in coeffs[1:]:
        acc = acc * x + c
    return acc


def _erf_f32(x):
    x = jnp.clip(x, -4.0, 4.0)
    x2 = x * x
    return (x * _poly(x2, _ERF_ALPHA)) / _poly(x2, _ERF_BETA)


def _gelu_exact(x):
    # HF RoBERTa GELU: x * 0.5 * (1 + erf(x / sqrt(2)))
    return 0.5 * x * (1.0 + _erf_f32(x * (1.0 / math.sqrt(2.0))))


def _layernorm(x, g, b):
    mu = jnp.mean(x, axis=-1, keepdims=True)
    var = jnp.mean(jnp.square(x - mu), axis=-1, keepdims=True)
    return (x - mu) * lax.rsqrt(var + LN_EPS) * g + b


def _mm(a, w):
    """MXU matmul: bf16 (or f32) inputs, f32 accumulation."""
    return jnp.dot(a.astype(MXU_DTYPE), w.astype(MXU_DTYPE),
                   preferred_element_type=jnp.float32)


# ----------------------------- fused kernel --------------------------------

def _make_fused_kernel(cfg, batch, seq):
    H, nH = cfg["hidden"], cfg["heads"]
    hd = H // nH
    L = cfg["layers"]
    V, P = cfg["vocab_size"], cfg["max_pos"]
    tok = batch * seq
    scale = 1.0 / math.sqrt(hd)

    def kernel(ids_ref, pos_ref, mask_ref,
               wemb_ref, pemb_ref, temb_ref, eg_ref, eb_ref,
               wq_ref, bq_ref, wk_ref, bk_ref, wv_ref, bv_ref,
               wo_ref, bo_ref, l1g_ref, l1b_ref,
               wfi_ref, bfi_ref, wfo_ref, bfo_ref, l2g_ref, l2b_ref,
               wp_ref, bp_ref, wc_ref, bc_ref,
               out_ref):
        # ---- embeddings: one-hot gathers run on the MXU against VMEM tables ----
        ids = ids_ref[...]                                       # (tok, 1) int32
        pos = pos_ref[...]                                       # (tok, 1) int32
        w_oh = jnp.where(ids == lax.broadcasted_iota(jnp.int32, (tok, V), 1), 1.0, 0.0)
        p_oh = jnp.where(pos == lax.broadcasted_iota(jnp.int32, (tok, P), 1), 1.0, 0.0)
        emb = (jnp.dot(w_oh, wemb_ref[...], preferred_element_type=jnp.float32)
               + jnp.dot(p_oh, pemb_ref[...], preferred_element_type=jnp.float32)
               + temb_ref[...])                                  # token_type_ids == 0
        x = _layernorm(emb, eg_ref[...], eb_ref[...])            # (tok, H) float32

        mask2d = mask_ref[...]                                   # (tok, tok) additive

        for l in range(L):                                       # static unroll (L=2)
            # ---- self-attention: per head over the whole flattened token axis ----
            x_mx = x.astype(MXU_DTYPE)
            acc = jnp.zeros((tok, H), jnp.float32)
            for h in range(nH):
                w_idx = l * nH + h
                q = _mm(x_mx, wq_ref[w_idx]) + bq_ref[w_idx]     # (tok, hd)
                k = _mm(x_mx, wk_ref[w_idx]) + bk_ref[w_idx]
                v = _mm(x_mx, wv_ref[w_idx]) + bv_ref[w_idx]
                s = jnp.einsum("td,sd->ts",
                               q.astype(MXU_DTYPE), k.astype(MXU_DTYPE),
                               preferred_element_type=jnp.float32) * scale
                s = s + mask2d
                s = s - jnp.max(s, axis=-1, keepdims=True)       # stable softmax (f32)
                p = jnp.exp(s)
                p = p * pl.reciprocal(jnp.sum(p, axis=-1, keepdims=True), approx=True)
                ctx = _mm(p, v)                                  # (tok, hd)
                acc = acc + _mm(ctx, wo_ref[w_idx])              # output proj per head
            attn_out = acc + bo_ref[l]
            x = _layernorm(attn_out + x, l1g_ref[l], l1b_ref[l])  # residual + LN1

            # ---- feed-forward with fused exact-erf GELU ----
            hmid = _mm(x.astype(MXU_DTYPE), wfi_ref[l]) + bfi_ref[l]    # (tok, I)
            hmid = _gelu_exact(hmid)
            ffn = _mm(hmid, wfo_ref[l]) + bfo_ref[l]                    # (tok, H)
            x = _layernorm(ffn + x, l2g_ref[l], l2b_ref[l])             # residual + LN2

        # ---- pooler (first token per sequence, one-hot row select) + classifier ----
        col = lax.broadcasted_iota(jnp.int32, (batch, tok), 1)
        row = lax.broadcasted_iota(jnp.int32, (batch, tok), 0)
        sel = jnp.where(col == row * seq, 1.0, 0.0)                    # (batch, tok)
        cls = jnp.dot(sel, x, preferred_element_type=jnp.float32)      # (batch, H)
        pooled = jnp.tanh(_mm(cls, wp_ref[...]) + bp_ref[...])         # dense + tanh
        logits = _mm(pooled, wc_ref[...]) + bc_ref[...]                # (batch, classes)
        out_ref[...] = logits.astype(out_ref.dtype)

    return kernel


# ---------------------------- parameters / model ---------------------------

def init_params(key, cfg):
    H, I = cfg["hidden"], cfg["intermediate"]

    def nxt():
        nonlocal key
        key, sub = jax.random.split(key)
        return sub

    def dense(din, dout):
        w = jax.random.normal(nxt(), (din, dout), jnp.float32) * 0.02
        b = jnp.zeros((dout,), jnp.float32)
        return (w, b)

    p = {}
    p["word_emb"] = jax.random.normal(nxt(), (cfg["vocab_size"], H), jnp.float32) * 0.02
    p["pos_emb"] = jax.random.normal(nxt(), (cfg["max_pos"], H), jnp.float32) * 0.02
    p["type_emb"] = jax.random.normal(nxt(), (cfg["type_vocab"], H), jnp.float32) * 0.02
    p["emb_ln"] = (jnp.ones((H,), jnp.float32), jnp.zeros((H,), jnp.float32))
    layers = []
    for _ in range(cfg["layers"]):
        layers.append(dict(
            q=dense(H, H), k=dense(H, H), v=dense(H, H), o=dense(H, H),
            ln1=(jnp.ones((H,), jnp.float32), jnp.zeros((H,), jnp.float32)),
            ffn_in=dense(H, I), ffn_out=dense(I, H),
            ln2=(jnp.ones((H,), jnp.float32), jnp.zeros((H,), jnp.float32)),
        ))
    p["layers"] = layers
    p["pooler"] = dense(H, H)                       # BertPooler dense
    p["classifier"] = dense(H, cfg["num_classes"])  # nn.Linear(1024, 2) analogue
    return p


def pack_params(p, cfg):
    """Repack into the stacked, head-split layout the fused kernel indexes with
    static ints; matmul weights stored in MXU_DTYPE (biases / LN / tables f32)."""
    H, I, L = cfg["hidden"], cfg["intermediate"], cfg["layers"]
    nH = cfg["heads"]
    hd = H // nH
    C = cfg["num_classes"]
    lyr = p["layers"]

    def head_cols(w):   # (H_in, H_out) -> (nH, H_in, hd): per-head output columns
        return jnp.transpose(w.reshape(H, nH, hd), (1, 0, 2))

    def head_rows(w):   # (H_in, H_out) -> (nH, hd, H_out): per-head input rows
        return w.reshape(nH, hd, H)

    cat = lambda xs: jnp.concatenate(xs, axis=0)
    stk = lambda xs: jnp.stack(xs, axis=0)

    return dict(
        word_emb=p["word_emb"],
        pos_emb=p["pos_emb"],
        type_row=p["type_emb"][0:1, :],
        emb_g=p["emb_ln"][0].reshape(1, H), emb_b=p["emb_ln"][1].reshape(1, H),
        wq=cat([head_cols(l["q"][0]) for l in lyr]).astype(MXU_DTYPE),   # (L*nH,H,hd)
        bq=cat([l["q"][1].reshape(nH, 1, hd) for l in lyr]),
        wk=cat([head_cols(l["k"][0]) for l in lyr]).astype(MXU_DTYPE),
        bk=cat([l["k"][1].reshape(nH, 1, hd) for l in lyr]),
        wv=cat([head_cols(l["v"][0]) for l in lyr]).astype(MXU_DTYPE),
        bv=cat([l["v"][1].reshape(nH, 1, hd) for l in lyr]),
        wo=cat([head_rows(l["o"][0]) for l in lyr]).astype(MXU_DTYPE),   # (L*nH,hd,H)
        bo=stk([l["o"][1].reshape(1, H) for l in lyr]),
        ln1_g=stk([l["ln1"][0].reshape(1, H) for l in lyr]),
        ln1_b=stk([l["ln1"][1].reshape(1, H) for l in lyr]),
        wfi=stk([l["ffn_in"][0] for l in lyr]).astype(MXU_DTYPE),        # (L,H,I)
        bfi=stk([l["ffn_in"][1].reshape(1, I) for l in lyr]),
        wfo=stk([l["ffn_out"][0] for l in lyr]).astype(MXU_DTYPE),       # (L,I,H)
        bfo=stk([l["ffn_out"][1].reshape(1, H) for l in lyr]),
        ln2_g=stk([l["ln2"][0].reshape(1, H) for l in lyr]),
        ln2_b=stk([l["ln2"][1].reshape(1, H) for l in lyr]),
        wp=p["pooler"][0].astype(MXU_DTYPE), bp=p["pooler"][1].reshape(1, H),
        wc=p["classifier"][0].astype(MXU_DTYPE),
        bc=p["classifier"][1].reshape(1, C),
    )


def golden_sentence_bert_forward(packed, input_ids, attention_mask, cfg):
    B, S = input_ids.shape
    tok = B * S
    pad_id = cfg["pad_id"]

    # RoBERTa position ids: cumulative count of non-pad tokens, offset by pad_id.
    # TODO(synk): fold this tiny [B,S] int cumsum (and the mask build below)
    # into the kernel via scalar prefetch once B*S grows beyond toy sizes.
    not_pad = (input_ids != pad_id).astype(jnp.int32)
    position_ids = jnp.cumsum(not_pad, axis=1) * not_pad + pad_id

    # Block-diagonal additive mask over the flattened token axis: a query may
    # only attend to non-pad keys of its own sequence.  This folds the HF
    # extended mask and the batch structure into one [tok, tok] mask so each
    # head's attention is a single matmul pair over all tokens.
    batch_ids = jnp.arange(tok, dtype=jnp.int32) // S
    same_batch = batch_ids[:, None] == batch_ids[None, :]
    key_ok = (attention_mask.reshape(tok) != 0)[None, :]
    mask2d = jnp.where(same_batch & key_ok, 0.0, MASK_NEG).astype(jnp.float32)

    ids2 = input_ids.reshape(tok, 1).astype(jnp.int32)
    pos2 = position_ids.reshape(tok, 1).astype(jnp.int32)

    kernel = _make_fused_kernel(cfg, B, S)
    return pl.pallas_call(
        kernel,
        out_shape=jax.ShapeDtypeStruct((B, cfg["num_classes"]), jnp.float32),
        compiler_params=pltpu.CompilerParams(vmem_limit_bytes=32 * 1024 * 1024),
    )(ids2, pos2, mask2d,
      packed["word_emb"], packed["pos_emb"], packed["type_row"],
      packed["emb_g"], packed["emb_b"],
      packed["wq"], packed["bq"], packed["wk"], packed["bk"],
      packed["wv"], packed["bv"], packed["wo"], packed["bo"],
      packed["ln1_g"], packed["ln1_b"],
      packed["wfi"], packed["bfi"], packed["wfo"], packed["bfo"],
      packed["ln2_g"], packed["ln2_b"],
      packed["wp"], packed["bp"], packed["wc"], packed["bc"])


# ----------------------------------- main -----------------------------------

if __name__ == "__main__":
    cfg = CFG
    key = jax.random.PRNGKey(0)
    pkey, ikey = jax.random.split(key)
    params = init_params(pkey, cfg)
    packed = pack_params(params, cfg)

    B, S = 2, 8
    input_ids = jax.random.randint(ikey, (B, S), 2, cfg["vocab_size"]).astype(jnp.int32)
    masks = jnp.ones((B, S), jnp.int32).at[1, 6:].set(0)      # second example padded
    input_ids = jnp.where(masks == 1, input_ids, cfg["pad_id"])

    fwd = jax.jit(functools.partial(golden_sentence_bert_forward, cfg=cfg))
    logits = fwd(packed, input_ids, masks)
    jax.block_until_ready(logits)
    assert logits.shape == (B, cfg["num_classes"]) and logits.dtype == jnp.float32
    assert bool(jnp.all(jnp.isfinite(logits)))
    print("KERNEL_OK")
</pallas_src>

<mosaic_0001>
module attributes {stable_mosaic.version = 11 : i64} {
  func.func @kernel(%arg0: memref<16x1xi32, #tpu.memory_space<vmem>>, %arg1: memref<16x1xi32, #tpu.memory_space<vmem>>, %arg2: memref<16x16xf32, #tpu.memory_space<vmem>>, %arg3: memref<100x32xf32, #tpu.memory_space<vmem>>, %arg4: memref<24x32xf32, #tpu.memory_space<vmem>>, %arg5: memref<1x32xf32, #tpu.memory_space<vmem>>, %arg6: memref<1x32xf32, #tpu.memory_space<vmem>>, %arg7: memref<1x32xf32, #tpu.memory_space<vmem>>, %arg8: memref<8x32x8xbf16, #tpu.memory_space<vmem>>, %arg9: memref<8x1x8xf32, #tpu.memory_space<vmem>>, %arg10: memref<8x32x8xbf16, #tpu.memory_space<vmem>>, %arg11: memref<8x1x8xf32, #tpu.memory_space<vmem>>, %arg12: memref<8x32x8xbf16, #tpu.memory_space<vmem>>, %arg13: memref<8x1x8xf32, #tpu.memory_space<vmem>>, %arg14: memref<8x8x32xbf16, #tpu.memory_space<vmem>>, %arg15: memref<2x1x32xf32, #tpu.memory_space<vmem>>, %arg16: memref<2x1x32xf32, #tpu.memory_space<vmem>>, %arg17: memref<2x1x32xf32, #tpu.memory_space<vmem>>, %arg18: memref<2x32x128xbf16, #tpu.memory_space<vmem>>, %arg19: memref<2x1x128xf32, #tpu.memory_space<vmem>>, %arg20: memref<2x128x32xbf16, #tpu.memory_space<vmem>>, %arg21: memref<2x1x32xf32, #tpu.memory_space<vmem>>, %arg22: memref<2x1x32xf32, #tpu.memory_space<vmem>>, %arg23: memref<2x1x32xf32, #tpu.memory_space<vmem>>, %arg24: memref<32x32xbf16, #tpu.memory_space<vmem>>, %arg25: memref<1x32xf32, #tpu.memory_space<vmem>>, %arg26: memref<32x2xbf16, #tpu.memory_space<vmem>>, %arg27: memref<1x2xf32, #tpu.memory_space<vmem>>, %arg28: memref<2x2xf32, #tpu.memory_space<vmem>>) attributes {dimension_semantics = [], scalar_prefetch = 0 : i64, scratch_operands = 0 : i64, tpu.core_type = #tpu.core_type<tc>} {
    %c0 = arith.constant 0 : index
    %c0_0 = arith.constant 0 : index
    %0 = vector.load %arg0[%c0, %c0_0] : memref<16x1xi32, #tpu.memory_space<vmem>>, vector<16x1xi32>
    %c0_1 = arith.constant 0 : index
    %c0_2 = arith.constant 0 : index
    %1 = vector.load %arg1[%c0_1, %c0_2] : memref<16x1xi32, #tpu.memory_space<vmem>>, vector<16x1xi32>
    %2 = tpu.iota {dimensions = array<i32: 1>} : vector<16x100xi32>
    %3 = vector.broadcast %0 : vector<16x1xi32> to vector<16x100xi32>
    %4 = arith.cmpi eq, %3, %2 : vector<16x100xi32>
    %cst = arith.constant 1.000000e+00 : f32
    %cst_3 = arith.constant 0.000000e+00 : f32
    %5 = vector.broadcast %cst : f32 to vector<16x100xf32>
    %6 = vector.broadcast %cst_3 : f32 to vector<16x100xf32>
    %7 = arith.select %4, %5, %6 : vector<16x100xi1>, vector<16x100xf32>
    %8 = tpu.iota {dimensions = array<i32: 1>} : vector<16x24xi32>
    %9 = vector.broadcast %1 : vector<16x1xi32> to vector<16x24xi32>
    %10 = arith.cmpi eq, %9, %8 : vector<16x24xi32>
    %cst_4 = arith.constant 1.000000e+00 : f32
    %cst_5 = arith.constant 0.000000e+00 : f32
    %11 = vector.broadcast %cst_4 : f32 to vector<16x24xf32>
    %12 = vector.broadcast %cst_5 : f32 to vector<16x24xf32>
    %13 = arith.select %10, %11, %12 : vector<16x24xi1>, vector<16x24xf32>
    %c0_6 = arith.constant 0 : index
    %c0_7 = arith.constant 0 : index
    %14 = vector.load %arg3[%c0_6, %c0_7] : memref<100x32xf32, #tpu.memory_space<vmem>>, vector<100x32xf32>
    %cst_8 = arith.constant dense<0.000000e+00> : vector<16x32xf32>
    %15 = tpu.matmul %7, %14, %cst_8 {dimension_numbers = #tpu.dot_dimension_numbers<[1], [0], [0], [1], [0, 0, 1, 1], [], []>} : vector<16x100xf32>, vector<100x32xf32>, vector<16x32xf32> -> vector<16x32xf32>
    %c0_9 = arith.constant 0 : index
    %c0_10 = arith.constant 0 : index
    %16 = vector.load %arg4[%c0_9, %c0_10] : memref<24x32xf32, #tpu.memory_space<vmem>>, vector<24x32xf32>
    %cst_11 = arith.constant dense<0.000000e+00> : vector<16x32xf32>
    %17 = tpu.matmul %13, %16, %cst_11 {dimension_numbers = #tpu.dot_dimension_numbers<[1], [0], [0], [1], [0, 0, 1, 1], [], []>} : vector<16x24xf32>, vector<24x32xf32>, vector<16x32xf32> -> vector<16x32xf32>
    %18 = arith.addf %15, %17 : vector<16x32xf32>
    %c0_12 = arith.constant 0 : index
    %c0_13 = arith.constant 0 : index
    %19 = vector.load %arg5[%c0_12, %c0_13] : memref<1x32xf32, #tpu.memory_space<vmem>>, vector<1x32xf32>
    %20 = vector.broadcast %19 : vector<1x32xf32> to vector<16x32xf32>
    %21 = arith.addf %18, %20 : vector<16x32xf32>
    %c0_14 = arith.constant 0 : index
    %c0_15 = arith.constant 0 : index
    %22 = vector.load %arg6[%c0_14, %c0_15] : memref<1x32xf32, #tpu.memory_space<vmem>>, vector<1x32xf32>
    %c0_16 = arith.constant 0 : index
    %c0_17 = arith.constant 0 : index
    %23 = vector.load %arg7[%c0_16, %c0_17] : memref<1x32xf32, #tpu.memory_space<vmem>>, vector<1x32xf32>
    %cst_18 = arith.constant dense<0.000000e+00> : vector<16xf32>
    %24 = vector.multi_reduction <add>, %21, %cst_18 [1] : vector<16x32xf32> to vector<16xf32>
    %25 = vector.shape_cast %24 : vector<16xf32> to vector<16x1xf32>
    %cst_19 = arith.constant 3.200000e+01 : f32
    %26 = vector.broadcast %cst_19 : f32 to vector<16x1xf32>
    %27 = arith.divf %25, %26 : vector<16x1xf32>
    %28 = vector.broadcast %27 : vector<16x1xf32> to vector<16x32xf32>
    %29 = arith.subf %21, %28 : vector<16x32xf32>
    %30 = arith.mulf %29, %29 : vector<16x32xf32>
    %cst_20 = arith.constant dense<0.000000e+00> : vector<16xf32>
    %31 = vector.multi_reduction <add>, %30, %cst_20 [1] : vector<16x32xf32> to vector<16xf32>
    %32 = vector.shape_cast %31 : vector<16xf32> to vector<16x1xf32>
    %cst_21 = arith.constant 3.200000e+01 : f32
    %33 = vector.broadcast %cst_21 : f32 to vector<16x1xf32>
    %34 = arith.divf %32, %33 : vector<16x1xf32>
    %35 = vector.broadcast %27 : vector<16x1xf32> to vector<16x32xf32>
    %36 = arith.subf %21, %35 : vector<16x32xf32>
    %cst_22 = arith.constant 9.99999974E-6 : f32
    %37 = vector.broadcast %cst_22 : f32 to vector<16x1xf32>
    %38 = arith.addf %34, %37 : vector<16x1xf32>
    %39 = math.rsqrt %38 : vector<16x1xf32>
    %40 = vector.broadcast %39 : vector<16x1xf32> to vector<16x32xf32>
    %41 = arith.mulf %36, %40 : vector<16x32xf32>
    %42 = vector.broadcast %22 : vector<1x32xf32> to vector<16x32xf32>
    %43 = arith.mulf %41, %42 : vector<16x32xf32>
    %44 = vector.broadcast %23 : vector<1x32xf32> to vector<16x32xf32>
    %45 = arith.addf %43, %44 : vector<16x32xf32>
    %c0_23 = arith.constant 0 : index
    %c0_24 = arith.constant 0 : index
    %46 = vector.load %arg2[%c0_23, %c0_24] : memref<16x16xf32, #tpu.memory_space<vmem>>, vector<16x16xf32>
    %47 = arith.truncf %45 : vector<16x32xf32> to vector<16x32xbf16>
    %cst_25 = arith.constant 0.000000e+00 : f32
    %48 = vector.broadcast %cst_25 : f32 to vector<16x32xf32>
    %c0_26 = arith.constant 0 : index
    %c0_27 = arith.constant 0 : index
    %c0_28 = arith.constant 0 : index
    %49 = vector.load %arg8[%c0_26, %c0_27, %c0_28] : memref<8x32x8xbf16, #tpu.memory_space<vmem>>, vector<1x32x8xbf16>
    %50 = vector.shape_cast %49 : vector<1x32x8xbf16> to vector<32x8xbf16>
    %cst_29 = arith.constant dense<0.000000e+00> : vector<16x8xf32>
    %51 = tpu.matmul %47, %50, %cst_29 {dimension_numbers = #tpu.dot_dimension_numbers<[1], [0], [0], [1], [0, 0, 1, 1], [], []>} : vector<16x32xbf16>, vector<32x8xbf16>, vector<16x8xf32> -> vector<16x8xf32>
    %c0_30 = arith.constant 0 : index
    %c0_31 = arith.constant 0 : index
    %c0_32 = arith.constant 0 : index
    %52 = vector.load %arg9[%c0_30, %c0_31, %c0_32] : memref<8x1x8xf32, #tpu.memory_space<vmem>>, vector<1x1x8xf32>
    %53 = vector.shape_cast %52 : vector<1x1x8xf32> to vector<1x8xf32>
    %54 = vector.broadcast %53 : vector<1x8xf32> to vector<16x8xf32>
    %55 = arith.addf %51, %54 : vector<16x8xf32>
    %c0_33 = arith.constant 0 : index
    %c0_34 = arith.constant 0 : index
    %c0_35 = arith.constant 0 : index
    %56 = vector.load %arg10[%c0_33, %c0_34, %c0_35] : memref<8x32x8xbf16, #tpu.memory_space<vmem>>, vector<1x32x8xbf16>
    %57 = vector.shape_cast %56 : vector<1x32x8xbf16> to vector<32x8xbf16>
    %cst_36 = arith.constant dense<0.000000e+00> : vector<16x8xf32>
    %58 = tpu.matmul %47, %57, %cst_36 {dimension_numbers = #tpu.dot_dimension_numbers<[1], [0], [0], [1], [0, 0, 1, 1], [], []>} : vector<16x32xbf16>, vector<32x8xbf16>, vector<16x8xf32> -> vector<16x8xf32>
    %c0_37 = arith.constant 0 : index
    %c0_38 = arith.constant 0 : index
    %c0_39 = arith.constant 0 : index
    %59 = vector.load %arg11[%c0_37, %c0_38, %c0_39] : memref<8x1x8xf32, #tpu.memory_space<vmem>>, vector<1x1x8xf32>
    %60 = vector.shape_cast %59 : vector<1x1x8xf32> to vector<1x8xf32>
    %61 = vector.broadcast %60 : vector<1x8xf32> to vector<16x8xf32>
    %62 = arith.addf %58, %61 : vector<16x8xf32>
    %c0_40 = arith.constant 0 : index
    %c0_41 = arith.constant 0 : index
    %c0_42 = arith.constant 0 : index
    %63 = vector.load %arg12[%c0_40, %c0_41, %c0_42] : memref<8x32x8xbf16, #tpu.memory_space<vmem>>, vector<1x32x8xbf16>
    %64 = vector.shape_cast %63 : vector<1x32x8xbf16> to vector<32x8xbf16>
    %cst_43 = arith.constant dense<0.000000e+00> : vector<16x8xf32>
    %65 = tpu.matmul %47, %64, %cst_43 {dimension_numbers = #tpu.dot_dimension_numbers<[1], [0], [0], [1], [0, 0, 1, 1], [], []>} : vector<16x32xbf16>, vector<32x8xbf16>, vector<16x8xf32> -> vector<16x8xf32>
    %c0_44 = arith.constant 0 : index
    %c0_45 = arith.constant 0 : index
    %c0_46 = arith.constant 0 : index
    %66 = vector.load %arg13[%c0_44, %c0_45, %c0_46] : memref<8x1x8xf32, #tpu.memory_space<vmem>>, vector<1x1x8xf32>
    %67 = vector.shape_cast %66 : vector<1x1x8xf32> to vector<1x8xf32>
    %68 = vector.broadcast %67 : vector<1x8xf32> to vector<16x8xf32>
    %69 = arith.addf %65, %68 : vector<16x8xf32>
    %70 = arith.truncf %55 : vector<16x8xf32> to vector<16x8xbf16>
    %71 = arith.truncf %62 : vector<16x8xf32> to vector<16x8xbf16>
    "tpu.trace_start"() <{level = 10 : i32, message = "td,sd->ts"}> : () -> ()
    %cst_47 = arith.constant dense<0.000000e+00> : vector<16x16xf32>
    %72 = tpu.matmul %70, %71, %cst_47 {dimension_numbers = #tpu.dot_dimension_numbers<[1], [1], [0], [0], [0, 0, 1, 0], [], []>} : vector<16x8xbf16>, vector<16x8xbf16>, vector<16x16xf32> -> vector<16x16xf32>
    "tpu.trace_stop"() : () -> ()
    %cst_48 = arith.constant 0.353553385 : f32
    %73 = vector.broadcast %cst_48 : f32 to vector<16x16xf32>
    %74 = arith.mulf %72, %73 : vector<16x16xf32>
    %75 = arith.addf %74, %46 : vector<16x16xf32>
    %cst_49 = arith.constant dense<0xFF800000> : vector<16xf32>
    %76 = vector.multi_reduction <maximumf>, %75, %cst_49 [1] : vector<16x16xf32> to vector<16xf32>
    %77 = vector.shape_cast %76 : vector<16xf32> to vector<16x1xf32>
    %78 = vector.broadcast %77 : vector<16x1xf32> to vector<16x16xf32>
    %79 = arith.subf %75, %78 : vector<16x16xf32>
    %80 = math.exp %79 : vector<16x16xf32>
    %cst_50 = arith.constant dense<0.000000e+00> : vector<16xf32>
    %81 = vector.multi_reduction <add>, %80, %cst_50 [1] : vector<16x16xf32> to vector<16xf32>
    %82 = vector.shape_cast %81 : vector<16xf32> to vector<16x1xf32>
    %83 = tpu.reciprocal %82 {approx = true} : vector<16x1xf32> -> vector<16x1xf32>
    %84 = vector.broadcast %83 : vector<16x1xf32> to vector<16x16xf32>
    %85 = arith.mulf %80, %84 : vector<16x16xf32>
    %86 = arith.truncf %85 : vector<16x16xf32> to vector<16x16xbf16>
    %87 = arith.truncf %69 : vector<16x8xf32> to vector<16x8xbf16>
    %cst_51 = arith.constant dense<0.000000e+00> : vector<16x8xf32>
    %88 = tpu.matmul %86, %87, %cst_51 {dimension_numbers = #tpu.dot_dimension_numbers<[1], [0], [0], [1], [0, 0, 1, 1], [], []>} : vector<16x16xbf16>, vector<16x8xbf16>, vector<16x8xf32> -> vector<16x8xf32>
    %c0_52 = arith.constant 0 : index
    %c0_53 = arith.constant 0 : index
    %c0_54 = arith.constant 0 : index
    %89 = vector.load %arg14[%c0_52, %c0_53, %c0_54] : memref<8x8x32xbf16, #tpu.memory_space<vmem>>, vector<1x8x32xbf16>
    %90 = vector.shape_cast %89 : vector<1x8x32xbf16> to vector<8x32xbf16>
    %91 = arith.truncf %88 : vector<16x8xf32> to vector<16x8xbf16>
    %cst_55 = arith.constant dense<0.000000e+00> : vector<16x32xf32>
    %92 = tpu.matmul %91, %90, %cst_55 {dimension_numbers = #tpu.dot_dimension_numbers<[1], [0], [0], [1], [0, 0, 1, 1], [], []>} : vector<16x8xbf16>, vector<8x32xbf16>, vector<16x32xf32> -> vector<16x32xf32>
    %93 = arith.addf %48, %92 : vector<16x32xf32>
    %c1 = arith.constant 1 : index
    %c0_56 = arith.constant 0 : index
    %c0_57 = arith.constant 0 : index
    %94 = vector.load %arg8[%c1, %c0_56, %c0_57] : memref<8x32x8xbf16, #tpu.memory_space<vmem>>, vector<1x32x8xbf16>
    %95 = vector.shape_cast %94 : vector<1x32x8xbf16> to vector<32x8xbf16>
    %cst_58 = arith.constant dense<0.000000e+00> : vector<16x8xf32>
    %96 = tpu.matmul %47, %95, %cst_58 {dimension_numbers = #tpu.dot_dimension_numbers<[1], [0], [0], [1], [0, 0, 1, 1], [], []>} : vector<16x32xbf16>, vector<32x8xbf16>, vector<16x8xf32> -> vector<16x8xf32>
    %c1_59 = arith.constant 1 : index
    %c0_60 = arith.constant 0 : index
    %c0_61 = arith.constant 0 : index
    %97 = vector.load %arg9[%c1_59, %c0_60, %c0_61] : memref<8x1x8xf32, #tpu.memory_space<vmem>>, vector<1x1x8xf32>
    %98 = vector.shape_cast %97 : vector<1x1x8xf32> to vector<1x8xf32>
    %99 = vector.broadcast %98 : vector<1x8xf32> to vector<16x8xf32>
    %100 = arith.addf %96, %99 : vector<16x8xf32>
    %c1_62 = arith.constant 1 : index
    %c0_63 = arith.constant 0 : index
    %c0_64 = arith.constant 0 : index
    %101 = vector.load %arg10[%c1_62, %c0_63, %c0_64] : memref<8x32x8xbf16, #tpu.memory_space<vmem>>, vector<1x32x8xbf16>
    %102 = vector.shape_cast %101 : vector<1x32x8xbf16> to vector<32x8xbf16>
    %cst_65 = arith.constant dense<0.000000e+00> : vector<16x8xf32>
    %103 = tpu.matmul %47, %102, %cst_65 {dimension_numbers = #tpu.dot_dimension_numbers<[1], [0], [0], [1], [0, 0, 1, 1], [], []>} : vector<16x32xbf16>, vector<32x8xbf16>, vector<16x8xf32> -> vector<16x8xf32>
    %c1_66 = arith.constant 1 : index
    %c0_67 = arith.constant 0 : index
    %c0_68 = arith.constant 0 : index
    %104 = vector.load %arg11[%c1_66, %c0_67, %c0_68] : memref<8x1x8xf32, #tpu.memory_space<vmem>>, vector<1x1x8xf32>
    %105 = vector.shape_cast %104 : vector<1x1x8xf32> to vector<1x8xf32>
    %106 = vector.broadcast %105 : vector<1x8xf32> to vector<16x8xf32>
    %107 = arith.addf %103, %106 : vector<16x8xf32>
    %c1_69 = arith.constant 1 : index
    %c0_70 = arith.constant 0 : index
    %c0_71 = arith.constant 0 : index
    %108 = vector.load %arg12[%c1_69, %c0_70, %c0_71] : memref<8x32x8xbf16, #tpu.memory_space<vmem>>, vector<1x32x8xbf16>
    %109 = vector.shape_cast %108 : vector<1x32x8xbf16> to vector<32x8xbf16>
    %cst_72 = arith.constant dense<0.000000e+00> : vector<16x8xf32>
    %110 = tpu.matmul %47, %109, %cst_72 {dimension_numbers = #tpu.dot_dimension_numbers<[1], [0], [0], [1], [0, 0, 1, 1], [], []>} : vector<16x32xbf16>, vector<32x8xbf16>, vector<16x8xf32> -> vector<16x8xf32>
    %c1_73 = arith.constant 1 : index
    %c0_74 = arith.constant 0 : index
    %c0_75 = arith.constant 0 : index
    %111 = vector.load %arg13[%c1_73, %c0_74, %c0_75] : memref<8x1x8xf32, #tpu.memory_space<vmem>>, vector<1x1x8xf32>
    %112 = vector.shape_cast %111 : vector<1x1x8xf32> to vector<1x8xf32>
    %113 = vector.broadcast %112 : vector<1x8xf32> to vector<16x8xf32>
    %114 = arith.addf %110, %113 : vector<16x8xf32>
    %115 = arith.truncf %100 : vector<16x8xf32> to vector<16x8xbf16>
    %116 = arith.truncf %107 : vector<16x8xf32> to vector<16x8xbf16>
    "tpu.trace_start"() <{level = 10 : i32, message = "td,sd->ts"}> : () -> ()
    %cst_76 = arith.constant dense<0.000000e+00> : vector<16x16xf32>
    %117 = tpu.matmul %115, %116, %cst_76 {dimension_numbers = #tpu.dot_dimension_numbers<[1], [1], [0], [0], [0, 0, 1, 0], [], []>} : vector<16x8xbf16>, vector<16x8xbf16>, vector<16x16xf32> -> vector<16x16xf32>
    "tpu.trace_stop"() : () -> ()
    %cst_77 = arith.constant 0.353553385 : f32
    %118 = vector.broadcast %cst_77 : f32 to vector<16x16xf32>
    %119 = arith.mulf %117, %118 : vector<16x16xf32>
    %120 = arith.addf %119, %46 : vector<16x16xf32>
    %cst_78 = arith.constant dense<0xFF800000> : vector<16xf32>
    %121 = vector.multi_reduction <maximumf>, %120, %cst_78 [1] : vector<16x16xf32> to vector<16xf32>
    %122 = vector.shape_cast %121 : vector<16xf32> to vector<16x1xf32>
    %123 = vector.broadcast %122 : vector<16x1xf32> to vector<16x16xf32>
    %124 = arith.subf %120, %123 : vector<16x16xf32>
    %125 = math.exp %124 : vector<16x16xf32>
    %cst_79 = arith.constant dense<0.000000e+00> : vector<16xf32>
    %126 = vector.multi_reduction <add>, %125, %cst_79 [1] : vector<16x16xf32> to vector<16xf32>
    %127 = vector.shape_cast %126 : vector<16xf32> to vector<16x1xf32>
    %128 = tpu.reciprocal %127 {approx = true} : vector<16x1xf32> -> vector<16x1xf32>
    %129 = vector.broadcast %128 : vector<16x1xf32> to vector<16x16xf32>
    %130 = arith.mulf %125, %129 : vector<16x16xf32>
    %131 = arith.truncf %130 : vector<16x16xf32> to vector<16x16xbf16>
    %132 = arith.truncf %114 : vector<16x8xf32> to vector<16x8xbf16>
    %cst_80 = arith.constant dense<0.000000e+00> : vector<16x8xf32>
    %133 = tpu.matmul %131, %132, %cst_80 {dimension_numbers = #tpu.dot_dimension_numbers<[1], [0], [0], [1], [0, 0, 1, 1], [], []>} : vector<16x16xbf16>, vector<16x8xbf16>, vector<16x8xf32> -> vector<16x8xf32>
    %c1_81 = arith.constant 1 : index
    %c0_82 = arith.constant 0 : index
    %c0_83 = arith.constant 0 : index
    %134 = vector.load %arg14[%c1_81, %c0_82, %c0_83] : memref<8x8x32xbf16, #tpu.memory_space<vmem>>, vector<1x8x32xbf16>
    %135 = vector.shape_cast %134 : vector<1x8x32xbf16> to vector<8x32xbf16>
    %136 = arith.truncf %133 : vector<16x8xf32> to vector<16x8xbf16>
    %cst_84 = arith.constant dense<0.000000e+00> : vector<16x32xf32>
    %137 = tpu.matmul %136, %135, %cst_84 {dimension_numbers = #tpu.dot_dimension_numbers<[1], [0], [0], [1], [0, 0, 1, 1], [], []>} : vector<16x8xbf16>, vector<8x32xbf16>, vector<16x32xf32> -> vector<16x32xf32>
    %138 = arith.addf %93, %137 : vector<16x32xf32>
    %c2 = arith.constant 2 : index
    %c0_85 = arith.constant 0 : index
    %c0_86 = arith.constant 0 : index
    %139 = vector.load %arg8[%c2, %c0_85, %c0_86] : memref<8x32x8xbf16, #tpu.memory_space<vmem>>, vector<1x32x8xbf16>
    %140 = vector.shape_cast %139 : vector<1x32x8xbf16> to vector<32x8xbf16>
    %cst_87 = arith.constant dense<0.000000e+00> : vector<16x8xf32>
    %141 = tpu.matmul %47, %140, %cst_87 {dimension_numbers = #tpu.dot_dimension_numbers<[1], [0], [0], [1], [0, 0, 1, 1], [], []>} : vector<16x32xbf16>, vector<32x8xbf16>, vector<16x8xf32> -> vector<16x8xf32>
    %c2_88 = arith.constant 2 : index
    %c0_89 = arith.constant 0 : index
    %c0_90 = arith.constant 0 : index
    %142 = vector.load %arg9[%c2_88, %c0_89, %c0_90] : memref<8x1x8xf32, #tpu.memory_space<vmem>>, vector<1x1x8xf32>
    %143 = vector.shape_cast %142 : vector<1x1x8xf32> to vector<1x8xf32>
    %144 = vector.broadcast %143 : vector<1x8xf32> to vector<16x8xf32>
    %145 = arith.addf %141, %144 : vector<16x8xf32>
    %c2_91 = arith.constant 2 : index
    %c0_92 = arith.constant 0 : index
    %c0_93 = arith.constant 0 : index
    %146 = vector.load %arg10[%c2_91, %c0_92, %c0_93] : memref<8x32x8xbf16, #tpu.memory_space<vmem>>, vector<1x32x8xbf16>
    %147 = vector.shape_cast %146 : vector<1x32x8xbf16> to vector<32x8xbf16>
    %cst_94 = arith.constant dense<0.000000e+00> : vector<16x8xf32>
    %148 = tpu.matmul %47, %147, %cst_94 {dimension_numbers = #tpu.dot_dimension_numbers<[1], [0], [0], [1], [0, 0, 1, 1], [], []>} : vector<16x32xbf16>, vector<32x8xbf16>, vector<16x8xf32> -> vector<16x8xf32>
    %c2_95 = arith.constant 2 : index
    %c0_96 = arith.constant 0 : index
    %c0_97 = arith.constant 0 : index
    %149 = vector.load %arg11[%c2_95, %c0_96, %c0_97] : memref<8x1x8xf32, #tpu.memory_space<vmem>>, vector<1x1x8xf32>
    %150 = vector.shape_cast %149 : vector<1x1x8xf32> to vector<1x8xf32>
    %151 = vector.broadcast %150 : vector<1x8xf32> to vector<16x8xf32>
    %152 = arith.addf %148, %151 : vector<16x8xf32>
    %c2_98 = arith.constant 2 : index
    %c0_99 = arith.constant 0 : index
    %c0_100 = arith.constant 0 : index
    %153 = vector.load %arg12[%c2_98, %c0_99, %c0_100] : memref<8x32x8xbf16, #tpu.memory_space<vmem>>, vector<1x32x8xbf16>
    %154 = vector.shape_cast %153 : vector<1x32x8xbf16> to vector<32x8xbf16>
    %cst_101 = arith.constant dense<0.000000e+00> : vector<16x8xf32>
    %155 = tpu.matmul %47, %154, %cst_101 {dimension_numbers = #tpu.dot_dimension_numbers<[1], [0], [0], [1], [0, 0, 1, 1], [], []>} : vector<16x32xbf16>, vector<32x8xbf16>, vector<16x8xf32> -> vector<16x8xf32>
    %c2_102 = arith.constant 2 : index
    %c0_103 = arith.constant 0 : index
    %c0_104 = arith.constant 0 : index
    %156 = vector.load %arg13[%c2_102, %c0_103, %c0_104] : memref<8x1x8xf32, #tpu.memory_space<vmem>>, vector<1x1x8xf32>
    %157 = vector.shape_cast %156 : vector<1x1x8xf32> to vector<1x8xf32>
    %158 = vector.broadcast %157 : vector<1x8xf32> to vector<16x8xf32>
    %159 = arith.addf %155, %158 : vector<16x8xf32>
    %160 = arith.truncf %145 : vector<16x8xf32> to vector<16x8xbf16>
    %161 = arith.truncf %152 : vector<16x8xf32> to vector<16x8xbf16>
    "tpu.trace_start"() <{level = 10 : i32, message = "td,sd->ts"}> : () -> ()
    %cst_105 = arith.constant dense<0.000000e+00> : vector<16x16xf32>
    %162 = tpu.matmul %160, %161, %cst_105 {dimension_numbers = #tpu.dot_dimension_numbers<[1], [1], [0], [0], [0, 0, 1, 0], [], []>} : vector<16x8xbf16>, vector<16x8xbf16>, vector<16x16xf32> -> vector<16x16xf32>
    "tpu.trace_stop"() : () -> ()
    %cst_106 = arith.constant 0.353553385 : f32
    %163 = vector.broadcast %cst_106 : f32 to vector<16x16xf32>
    %164 = arith.mulf %162, %163 : vector<16x16xf32>
    %165 = arith.addf %164, %46 : vector<16x16xf32>
    %cst_107 = arith.constant dense<0xFF800000> : vector<16xf32>
    %166 = vector.multi_reduction <maximumf>, %165, %cst_107 [1] : vector<16x16xf32> to vector<16xf32>
    %167 = vector.shape_cast %166 : vector<16xf32> to vector<16x1xf32>
    %168 = vector.broadcast %167 : vector<16x1xf32> to vector<16x16xf32>
    %169 = arith.subf %165, %168 : vector<16x16xf32>
    %170 = math.exp %169 : vector<16x16xf32>
    %cst_108 = arith.constant dense<0.000000e+00> : vector<16xf32>
    %171 = vector.multi_reduction <add>, %170, %cst_108 [1] : vector<16x16xf32> to vector<16xf32>
    %172 = vector.shape_cast %171 : vector<16xf32> to vector<16x1xf32>
    %173 = tpu.reciprocal %172 {approx = true} : vector<16x1xf32> -> vector<16x1xf32>
    %174 = vector.broadcast %173 : vector<16x1xf32> to vector<16x16xf32>
    %175 = arith.mulf %170, %174 : vector<16x16xf32>
    %176 = arith.truncf %175 : vector<16x16xf32> to vector<16x16xbf16>
    %177 = arith.truncf %159 : vector<16x8xf32> to vector<16x8xbf16>
    %cst_109 = arith.constant dense<0.000000e+00> : vector<16x8xf32>
    %178 = tpu.matmul %176, %177, %cst_109 {dimension_numbers = #tpu.dot_dimension_numbers<[1], [0], [0], [1], [0, 0, 1, 1], [], []>} : vector<16x16xbf16>, vector<16x8xbf16>, vector<16x8xf32> -> vector<16x8xf32>
    %c2_110 = arith.constant 2 : index
    %c0_111 = arith.constant 0 : index
    %c0_112 = arith.constant 0 : index
    %179 = vector.load %arg14[%c2_110, %c0_111, %c0_112] : memref<8x8x32xbf16, #tpu.memory_space<vmem>>, vector<1x8x32xbf16>
    %180 = vector.shape_cast %179 : vector<1x8x32xbf16> to vector<8x32xbf16>
    %181 = arith.truncf %178 : vector<16x8xf32> to vector<16x8xbf16>
    %cst_113 = arith.constant dense<0.000000e+00> : vector<16x32xf32>
    %182 = tpu.matmul %181, %180, %cst_113 {dimension_numbers = #tpu.dot_dimension_numbers<[1], [0], [0], [1], [0, 0, 1, 1], [], []>} : vector<16x8xbf16>, vector<8x32xbf16>, vector<16x32xf32> -> vector<16x32xf32>
    %183 = arith.addf %138, %182 : vector<16x32xf32>
    %c3 = arith.constant 3 : index
    %c0_114 = arith.constant 0 : index
    %c0_115 = arith.constant 0 : index
    %184 = vector.load %arg8[%c3, %c0_114, %c0_115] : memref<8x32x8xbf16, #tpu.memory_space<vmem>>, vector<1x32x8xbf16>
    %185 = vector.shape_cast %184 : vector<1x32x8xbf16> to vector<32x8xbf16>
    %cst_116 = arith.constant dense<0.000000e+00> : vector<16x8xf32>
    %186 = tpu.matmul %47, %185, %cst_116 {dimension_numbers = #tpu.dot_dimension_numbers<[1], [0], [0], [1], [0, 0, 1, 1], [], []>} : vector<16x32xbf16>, vector<32x8xbf16>, vector<16x8xf32> -> vector<16x8xf32>
    %c3_117 = arith.constant 3 : index
    %c0_118 = arith.constant 0 : index
    %c0_119 = arith.constant 0 : index
    %187 = vector.load %arg9[%c3_117, %c0_118, %c0_119] : memref<8x1x8xf32, #tpu.memory_space<vmem>>, vector<1x1x8xf32>
    %188 = vector.shape_cast %187 : vector<1x1x8xf32> to vector<1x8xf32>
    %189 = vector.broadcast %188 : vector<1x8xf32> to vector<16x8xf32>
    %190 = arith.addf %186, %189 : vector<16x8xf32>
    %c3_120 = arith.constant 3 : index
    %c0_121 = arith.constant 0 : index
    %c0_122 = arith.constant 0 : index
    %191 = vector.load %arg10[%c3_120, %c0_121, %c0_122] : memref<8x32x8xbf16, #tpu.memory_space<vmem>>, vector<1x32x8xbf16>
    %192 = vector.shape_cast %191 : vector<1x32x8xbf16> to vector<32x8xbf16>
    %cst_123 = arith.constant dense<0.000000e+00> : vector<16x8xf32>
    %193 = tpu.matmul %47, %192, %cst_123 {dimension_numbers = #tpu.dot_dimension_numbers<[1], [0], [0], [1], [0, 0, 1, 1], [], []>} : vector<16x32xbf16>, vector<32x8xbf16>, vector<16x8xf32> -> vector<16x8xf32>
    %c3_124 = arith.constant 3 : index
    %c0_125 = arith.constant 0 : index
    %c0_126 = arith.constant 0 : index
    %194 = vector.load %arg11[%c3_124, %c0_125, %c0_126] : memref<8x1x8xf32, #tpu.memory_space<vmem>>, vector<1x1x8xf32>
    %195 = vector.shape_cast %194 : vector<1x1x8xf32> to vector<1x8xf32>
    %196 = vector.broadcast %195 : vector<1x8xf32> to vector<16x8xf32>
    %197 = arith.addf %193, %196 : vector<16x8xf32>
    %c3_127 = arith.constant 3 : index
    %c0_128 = arith.constant 0 : index
    %c0_129 = arith.constant 0 : index
    %198 = vector.load %arg12[%c3_127, %c0_128, %c0_129] : memref<8x32x8xbf16, #tpu.memory_space<vmem>>, vector<1x32x8xbf16>
    %199 = vector.shape_cast %198 : vector<1x32x8xbf16> to vector<32x8xbf16>
    %cst_130 = arith.constant dense<0.000000e+00> : vector<16x8xf32>
    %200 = tpu.matmul %47, %199, %cst_130 {dimension_numbers = #tpu.dot_dimension_numbers<[1], [0], [0], [1], [0, 0, 1, 1], [], []>} : vector<16x32xbf16>, vector<32x8xbf16>, vector<16x8xf32> -> vector<16x8xf32>
    %c3_131 = arith.constant 3 : index
    %c0_132 = arith.constant 0 : index
    %c0_133 = arith.constant 0 : index
    %201 = vector.load %arg13[%c3_131, %c0_132, %c0_133] : memref<8x1x8xf32, #tpu.memory_space<vmem>>, vector<1x1x8xf32>
    %202 = vector.shape_cast %201 : vector<1x1x8xf32> to vector<1x8xf32>
    %203 = vector.broadcast %202 : vector<1x8xf32> to vector<16x8xf32>
    %204 = arith.addf %200, %203 : vector<16x8xf32>
    %205 = arith.truncf %190 : vector<16x8xf32> to vector<16x8xbf16>
    %206 = arith.truncf %197 : vector<16x8xf32> to vector<16x8xbf16>
    "tpu.trace_start"() <{level = 10 : i32, message = "td,sd->ts"}> : () -> ()
    %cst_134 = arith.constant dense<0.000000e+00> : vector<16x16xf32>
    %207 = tpu.matmul %205, %206, %cst_134 {dimension_numbers = #tpu.dot_dimension_numbers<[1], [1], [0], [0], [0, 0, 1, 0], [], []>} : vector<16x8xbf16>, vector<16x8xbf16>, vector<16x16xf32> -> vector<16x16xf32>
    "tpu.trace_stop"() : () -> ()
    %cst_135 = arith.constant 0.353553385 : f32
    %208 = vector.broadcast %cst_135 : f32 to vector<16x16xf32>
    %209 = arith.mulf %207, %208 : vector<16x16xf32>
    %210 = arith.addf %209, %46 : vector<16x16xf32>
    %cst_136 = arith.constant dense<0xFF800000> : vector<16xf32>
    %211 = vector.multi_reduction <maximumf>, %210, %cst_136 [1] : vector<16x16xf32> to vector<16xf32>
    %212 = vector.shape_cast %211 : vector<16xf32> to vector<16x1xf32>
    %213 = vector.broadcast %212 : vector<16x1xf32> to vector<16x16xf32>
    %214 = arith.subf %210, %213 : vector<16x16xf32>
    %215 = math.exp %214 : vector<16x16xf32>
    %cst_137 = arith.constant dense<0.000000e+00> : vector<16xf32>
    %216 = vector.multi_reduction <add>, %215, %cst_137 [1] : vector<16x16xf32> to vector<16xf32>
    %217 = vector.shape_cast %216 : vector<16xf32> to vector<16x1xf32>
    %218 = tpu.reciprocal %217 {approx = true} : vector<16x1xf32> -> vector<16x1xf32>
    %219 = vector.broadcast %218 : vector<16x1xf32> to vector<16x16xf32>
    %220 = arith.mulf %215, %219 : vector<16x16xf32>
    %221 = arith.truncf %220 : vector<16x16xf32> to vector<16x16xbf16>
    %222 = arith.truncf %204 : vector<16x8xf32> to vector<16x8xbf16>
    %cst_138 = arith.constant dense<0.000000e+00> : vector<16x8xf32>
    %223 = tpu.matmul %221, %222, %cst_138 {dimension_numbers = #tpu.dot_dimension_numbers<[1], [0], [0], [1], [0, 0, 1, 1], [], []>} : vector<16x16xbf16>, vector<16x8xbf16>, vector<16x8xf32> -> vector<16x8xf32>
    %c3_139 = arith.constant 3 : index
    %c0_140 = arith.constant 0 : index
    %c0_141 = arith.constant 0 : index
    %224 = vector.load %arg14[%c3_139, %c0_140, %c0_141] : memref<8x8x32xbf16, #tpu.memory_space<vmem>>, vector<1x8x32xbf16>
    %225 = vector.shape_cast %224 : vector<1x8x32xbf16> to vector<8x32xbf16>
    %226 = arith.truncf %223 : vector<16x8xf32> to vector<16x8xbf16>
    %cst_142 = arith.constant dense<0.000000e+00> : vector<16x32xf32>
    %227 = tpu.matmul %226, %225, %cst_142 {dimension_numbers = #tpu.dot_dimension_numbers<[1], [0], [0], [1], [0, 0, 1, 1], [], []>} : vector<16x8xbf16>, vector<8x32xbf16>, vector<16x32xf32> -> vector<16x32xf32>
    %228 = arith.addf %183, %227 : vector<16x32xf32>
    %c0_143 = arith.constant 0 : index
    %c0_144 = arith.constant 0 : index
    %c0_145 = arith.constant 0 : index
    %229 = vector.load %arg15[%c0_143, %c0_144, %c0_145] : memref<2x1x32xf32, #tpu.memory_space<vmem>>, vector<1x1x32xf32>
    %230 = vector.shape_cast %229 : vector<1x1x32xf32> to vector<1x32xf32>
    %231 = vector.broadcast %230 : vector<1x32xf32> to vector<16x32xf32>
    %232 = arith.addf %228, %231 : vector<16x32xf32>
    %233 = arith.addf %232, %45 : vector<16x32xf32>
    %c0_146 = arith.constant 0 : index
    %c0_147 = arith.constant 0 : index
    %c0_148 = arith.constant 0 : index
    %234 = vector.load %arg16[%c0_146, %c0_147, %c0_148] : memref<2x1x32xf32, #tpu.memory_space<vmem>>, vector<1x1x32xf32>
    %235 = vector.shape_cast %234 : vector<1x1x32xf32> to vector<1x32xf32>
    %c0_149 = arith.constant 0 : index
    %c0_150 = arith.constant 0 : index
    %c0_151 = arith.constant 0 : index
    %236 = vector.load %arg17[%c0_149, %c0_150, %c0_151] : memref<2x1x32xf32, #tpu.memory_space<vmem>>, vector<1x1x32xf32>
    %237 = vector.shape_cast %236 : vector<1x1x32xf32> to vector<1x32xf32>
    %cst_152 = arith.constant dense<0.000000e+00> : vector<16xf32>
    %238 = vector.multi_reduction <add>, %233, %cst_152 [1] : vector<16x32xf32> to vector<16xf32>
    %239 = vector.shape_cast %238 : vector<16xf32> to vector<16x1xf32>
    %cst_153 = arith.constant 3.200000e+01 : f32
    %240 = vector.broadcast %cst_153 : f32 to vector<16x1xf32>
    %241 = arith.divf %239, %240 : vector<16x1xf32>
    %242 = vector.broadcast %241 : vector<16x1xf32> to vector<16x32xf32>
    %243 = arith.subf %233, %242 : vector<16x32xf32>
    %244 = arith.mulf %243, %243 : vector<16x32xf32>
    %cst_154 = arith.constant dense<0.000000e+00> : vector<16xf32>
    %245 = vector.multi_reduction <add>, %244, %cst_154 [1] : vector<16x32xf32> to vector<16xf32>
    %246 = vector.shape_cast %245 : vector<16xf32> to vector<16x1xf32>
    %cst_155 = arith.constant 3.200000e+01 : f32
    %247 = vector.broadcast %cst_155 : f32 to vector<16x1xf32>
    %248 = arith.divf %246, %247 : vector<16x1xf32>
    %249 = vector.broadcast %241 : vector<16x1xf32> to vector<16x32xf32>
    %250 = arith.subf %233, %249 : vector<16x32xf32>
    %cst_156 = arith.constant 9.99999974E-6 : f32
    %251 = vector.broadcast %cst_156 : f32 to vector<16x1xf32>
    %252 = arith.addf %248, %251 : vector<16x1xf32>
    %253 = math.rsqrt %252 : vector<16x1xf32>
    %254 = vector.broadcast %253 : vector<16x1xf32> to vector<16x32xf32>
    %255 = arith.mulf %250, %254 : vector<16x32xf32>
    %256 = vector.broadcast %235 : vector<1x32xf32> to vector<16x32xf32>
    %257 = arith.mulf %255, %256 : vector<16x32xf32>
    %258 = vector.broadcast %237 : vector<1x32xf32> to vector<16x32xf32>
    %259 = arith.addf %257, %258 : vector<16x32xf32>
    %260 = arith.truncf %259 : vector<16x32xf32> to vector<16x32xbf16>
    %c0_157 = arith.constant 0 : index
    %c0_158 = arith.constant 0 : index
    %c0_159 = arith.constant 0 : index
    %261 = vector.load %arg18[%c0_157, %c0_158, %c0_159] : memref<2x32x128xbf16, #tpu.memory_space<vmem>>, vector<1x32x128xbf16>
    %262 = vector.shape_cast %261 : vector<1x32x128xbf16> to vector<32x128xbf16>
    %cst_160 = arith.constant dense<0.000000e+00> : vector<16x128xf32>
    %263 = tpu.matmul %260, %262, %cst_160 {dimension_numbers = #tpu.dot_dimension_numbers<[1], [0], [0], [1], [0, 0, 1, 1], [], []>} : vector<16x32xbf16>, vector<32x128xbf16>, vector<16x128xf32> -> vector<16x128xf32>
    %c0_161 = arith.constant 0 : index
    %c0_162 = arith.constant 0 : index
    %c0_163 = arith.constant 0 : index
    %264 = vector.load %arg19[%c0_161, %c0_162, %c0_163] : memref<2x1x128xf32, #tpu.memory_space<vmem>>, vector<1x1x128xf32>
    %265 = vector.shape_cast %264 : vector<1x1x128xf32> to vector<1x128xf32>
    %266 = vector.broadcast %265 : vector<1x128xf32> to vector<16x128xf32>
    %267 = arith.addf %263, %266 : vector<16x128xf32>
    %cst_164 = arith.constant 5.000000e-01 : f32
    %268 = vector.broadcast %cst_164 : f32 to vector<16x128xf32>
    %269 = arith.mulf %268, %267 : vector<16x128xf32>
    %cst_165 = arith.constant 0.707106769 : f32
    %270 = vector.broadcast %cst_165 : f32 to vector<16x128xf32>
    %271 = arith.mulf %267, %270 : vector<16x128xf32>
    %cst_166 = arith.constant -4.000000e+00 : f32
    %cst_167 = arith.constant 4.000000e+00 : f32
    %272 = vector.broadcast %cst_166 : f32 to vector<16x128xf32>
    %273 = arith.maximumf %272, %271 : vector<16x128xf32>
    %274 = vector.broadcast %cst_167 : f32 to vector<16x128xf32>
    %275 = arith.minimumf %274, %273 : vector<16x128xf32>
    %276 = arith.mulf %275, %275 : vector<16x128xf32>
    %cst_168 = arith.constant 2.29050653E-4 : f32
    %277 = vector.broadcast %cst_168 : f32 to vector<16x128xf32>
    %278 = arith.mulf %277, %276 : vector<16x128xf32>
    %cst_169 = arith.constant 0.00340829091 : f32
    %279 = vector.broadcast %cst_169 : f32 to vector<16x128xf32>
    %280 = arith.addf %278, %279 : vector<16x128xf32>
    %281 = arith.mulf %280, %276 : vector<16x128xf32>
    %cst_170 = arith.constant 0.0509556942 : f32
    %282 = vector.broadcast %cst_170 : f32 to vector<16x128xf32>
    %283 = arith.addf %281, %282 : vector<16x128xf32>
    %284 = arith.mulf %283, %276 : vector<16x128xf32>
    %cst_171 = arith.constant 0.185208321 : f32
    %285 = vector.broadcast %cst_171 : f32 to vector<16x128xf32>
    %286 = arith.addf %284, %285 : vector<16x128xf32>
    %287 = arith.mulf %286, %276 : vector<16x128xf32>
    %cst_172 = arith.constant 1.12837911 : f32
    %288 = vector.broadcast %cst_172 : f32 to vector<16x128xf32>
    %289 = arith.addf %287, %288 : vector<16x128xf32>
    %290 = arith.mulf %275, %289 : vector<16x128xf32>
    %cst_173 = arith.constant -1.17916031E-7 : f32
    %291 = vector.broadcast %cst_173 : f32 to vector<16x128xf32>
    %292 = arith.mulf %291, %276 : vector<16x128xf32>
    %cst_174 = arith.constant 2.35479656E-5 : f32
    %293 = vector.broadcast %cst_174 : f32 to vector<16x128xf32>
    %294 = arith.addf %292, %293 : vector<16x128xf32>
    %295 = arith.mulf %294, %276 : vector<16x128xf32>
    %cst_175 = arith.constant 0.00101796258 : f32
    %296 = vector.broadcast %cst_175 : f32 to vector<16x128xf32>
    %297 = arith.addf %295, %296 : vector<16x128xf32>
    %298 = arith.mulf %297, %276 : vector<16x128xf32>
    %cst_176 = arith.constant 0.0140704699 : f32
    %299 = vector.broadcast %cst_176 : f32 to vector<16x128xf32>
    %300 = arith.addf %298, %299 : vector<16x128xf32>
    %301 = arith.mulf %300, %276 : vector<16x128xf32>
    %cst_177 = arith.constant 0.110985048 : f32
    %302 = vector.broadcast %cst_177 : f32 to vector<16x128xf32>
    %303 = arith.addf %301, %302 : vector<16x128xf32>
    %304 = arith.mulf %303, %276 : vector<16x128xf32>
    %cst_178 = arith.constant 0.497469246 : f32
    %305 = vector.broadcast %cst_178 : f32 to vector<16x128xf32>
    %306 = arith.addf %304, %305 : vector<16x128xf32>
    %307 = arith.mulf %306, %276 : vector<16x128xf32>
    %cst_179 = arith.constant 1.000000e+00 : f32
    %308 = vector.broadcast %cst_179 : f32 to vector<16x128xf32>
    %309 = arith.addf %307, %308 : vector<16x128xf32>
    %310 = arith.divf %290, %309 : vector<16x128xf32>
    %cst_180 = arith.constant 1.000000e+00 : f32
    %311 = vector.broadcast %cst_180 : f32 to vector<16x128xf32>
    %312 = arith.addf %311, %310 : vector<16x128xf32>
    %313 = arith.mulf %269, %312 : vector<16x128xf32>
    %c0_181 = arith.constant 0 : index
    %c0_182 = arith.constant 0 : index
    %c0_183 = arith.constant 0 : index
    %314 = vector.load %arg20[%c0_181, %c0_182, %c0_183] : memref<2x128x32xbf16, #tpu.memory_space<vmem>>, vector<1x128x32xbf16>
    %315 = vector.shape_cast %314 : vector<1x128x32xbf16> to vector<128x32xbf16>
    %316 = arith.truncf %313 : vector<16x128xf32> to vector<16x128xbf16>
    %cst_184 = arith.constant dense<0.000000e+00> : vector<16x32xf32>
    %317 = tpu.matmul %316, %315, %cst_184 {dimension_numbers = #tpu.dot_dimension_numbers<[1], [0], [0], [1], [0, 0, 1, 1], [], []>} : vector<16x128xbf16>, vector<128x32xbf16>, vector<16x32xf32> -> vector<16x32xf32>
    %c0_185 = arith.constant 0 : index
    %c0_186 = arith.constant 0 : index
    %c0_187 = arith.constant 0 : index
    %318 = vector.load %arg21[%c0_185, %c0_186, %c0_187] : memref<2x1x32xf32, #tpu.memory_space<vmem>>, vector<1x1x32xf32>
    %319 = vector.shape_cast %318 : vector<1x1x32xf32> to vector<1x32xf32>
    %320 = vector.broadcast %319 : vector<1x32xf32> to vector<16x32xf32>
    %321 = arith.addf %317, %320 : vector<16x32xf32>
    %322 = arith.addf %321, %259 : vector<16x32xf32>
    %c0_188 = arith.constant 0 : index
    %c0_189 = arith.constant 0 : index
    %c0_190 = arith.constant 0 : index
    %323 = vector.load %arg22[%c0_188, %c0_189, %c0_190] : memref<2x1x32xf32, #tpu.memory_space<vmem>>, vector<1x1x32xf32>
    %324 = vector.shape_cast %323 : vector<1x1x32xf32> to vector<1x32xf32>
    %c0_191 = arith.constant 0 : index
    %c0_192 = arith.constant 0 : index
    %c0_193 = arith.constant 0 : index
    %325 = vector.load %arg23[%c0_191, %c0_192, %c0_193] : memref<2x1x32xf32, #tpu.memory_space<vmem>>, vector<1x1x32xf32>
    %326 = vector.shape_cast %325 : vector<1x1x32xf32> to vector<1x32xf32>
    %cst_194 = arith.constant dense<0.000000e+00> : vector<16xf32>
    %327 = vector.multi_reduction <add>, %322, %cst_194 [1] : vector<16x32xf32> to vector<16xf32>
    %328 = vector.shape_cast %327 : vector<16xf32> to vector<16x1xf32>
    %cst_195 = arith.constant 3.200000e+01 : f32
    %329 = vector.broadcast %cst_195 : f32 to vector<16x1xf32>
    %330 = arith.divf %328, %329 : vector<16x1xf32>
    %331 = vector.broadcast %330 : vector<16x1xf32> to vector<16x32xf32>
    %332 = arith.subf %322, %331 : vector<16x32xf32>
    %333 = arith.mulf %332, %332 : vector<16x32xf32>
    %cst_196 = arith.constant dense<0.000000e+00> : vector<16xf32>
    %334 = vector.multi_reduction <add>, %333, %cst_196 [1] : vector<16x32xf32> to vector<16xf32>
    %335 = vector.shape_cast %334 : vector<16xf32> to vector<16x1xf32>
    %cst_197 = arith.constant 3.200000e+01 : f32
    %336 = vector.broadcast %cst_197 : f32 to vector<16x1xf32>
    %337 = arith.divf %335, %336 : vector<16x1xf32>
    %338 = vector.broadcast %330 : vector<16x1xf32> to vector<16x32xf32>
    %339 = arith.subf %322, %338 : vector<16x32xf32>
    %cst_198 = arith.constant 9.99999974E-6 : f32
    %340 = vector.broadcast %cst_198 : f32 to vector<16x1xf32>
    %341 = arith.addf %337, %340 : vector<16x1xf32>
    %342 = math.rsqrt %341 : vector<16x1xf32>
    %343 = vector.broadcast %342 : vector<16x1xf32> to vector<16x32xf32>
    %344 = arith.mulf %339, %343 : vector<16x32xf32>
    %345 = vector.broadcast %324 : vector<1x32xf32> to vector<16x32xf32>
    %346 = arith.mulf %344, %345 : vector<16x32xf32>
    %347 = vector.broadcast %326 : vector<1x32xf32> to vector<16x32xf32>
    %348 = arith.addf %346, %347 : vector<16x32xf32>
    %349 = arith.truncf %348 : vector<16x32xf32> to vector<16x32xbf16>
    %cst_199 = arith.constant 0.000000e+00 : f32
    %350 = vector.broadcast %cst_199 : f32 to vector<16x32xf32>
    %c4 = arith.constant 4 : index
    %c0_200 = arith.constant 0 : index
    %c0_201 = arith.constant 0 : index
    %351 = vector.load %arg8[%c4, %c0_200, %c0_201] : memref<8x32x8xbf16, #tpu.memory_space<vmem>>, vector<1x32x8xbf16>
    %352 = vector.shape_cast %351 : vector<1x32x8xbf16> to vector<32x8xbf16>
    %cst_202 = arith.constant dense<0.000000e+00> : vector<16x8xf32>
    %353 = tpu.matmul %349, %352, %cst_202 {dimension_numbers = #tpu.dot_dimension_numbers<[1], [0], [0], [1], [0, 0, 1, 1], [], []>} : vector<16x32xbf16>, vector<32x8xbf16>, vector<16x8xf32> -> vector<16x8xf32>
    %c4_203 = arith.constant 4 : index
    %c0_204 = arith.constant 0 : index
    %c0_205 = arith.constant 0 : index
    %354 = vector.load %arg9[%c4_203, %c0_204, %c0_205] : memref<8x1x8xf32, #tpu.memory_space<vmem>>, vector<1x1x8xf32>
    %355 = vector.shape_cast %354 : vector<1x1x8xf32> to vector<1x8xf32>
    %356 = vector.broadcast %355 : vector<1x8xf32> to vector<16x8xf32>
    %357 = arith.addf %353, %356 : vector<16x8xf32>
    %c4_206 = arith.constant 4 : index
    %c0_207 = arith.constant 0 : index
    %c0_208 = arith.constant 0 : index
    %358 = vector.load %arg10[%c4_206, %c0_207, %c0_208] : memref<8x32x8xbf16, #tpu.memory_space<vmem>>, vector<1x32x8xbf16>
    %359 = vector.shape_cast %358 : vector<1x32x8xbf16> to vector<32x8xbf16>
    %cst_209 = arith.constant dense<0.000000e+00> : vector<16x8xf32>
    %360 = tpu.matmul %349, %359, %cst_209 {dimension_numbers = #tpu.dot_dimension_numbers<[1], [0], [0], [1], [0, 0, 1, 1], [], []>} : vector<16x32xbf16>, vector<32x8xbf16>, vector<16x8xf32> -> vector<16x8xf32>
    %c4_210 = arith.constant 4 : index
    %c0_211 = arith.constant 0 : index
    %c0_212 = arith.constant 0 : index
    %361 = vector.load %arg11[%c4_210, %c0_211, %c0_212] : memref<8x1x8xf32, #tpu.memory_space<vmem>>, vector<1x1x8xf32>
    %362 = vector.shape_cast %361 : vector<1x1x8xf32> to vector<1x8xf32>
    %363 = vector.broadcast %362 : vector<1x8xf32> to vector<16x8xf32>
    %364 = arith.addf %360, %363 : vector<16x8xf32>
    %c4_213 = arith.constant 4 : index
    %c0_214 = arith.constant 0 : index
    %c0_215 = arith.constant 0 : index
    %365 = vector.load %arg12[%c4_213, %c0_214, %c0_215] : memref<8x32x8xbf16, #tpu.memory_space<vmem>>, vector<1x32x8xbf16>
    %366 = vector.shape_cast %365 : vector<1x32x8xbf16> to vector<32x8xbf16>
    %cst_216 = arith.constant dense<0.000000e+00> : vector<16x8xf32>
    %367 = tpu.matmul %349, %366, %cst_216 {dimension_numbers = #tpu.dot_dimension_numbers<[1], [0], [0], [1], [0, 0, 1, 1], [], []>} : vector<16x32xbf16>, vector<32x8xbf16>, vector<16x8xf32> -> vector<16x8xf32>
    %c4_217 = arith.constant 4 : index
    %c0_218 = arith.constant 0 : index
    %c0_219 = arith.constant 0 : index
    %368 = vector.load %arg13[%c4_217, %c0_218, %c0_219] : memref<8x1x8xf32, #tpu.memory_space<vmem>>, vector<1x1x8xf32>
    %369 = vector.shape_cast %368 : vector<1x1x8xf32> to vector<1x8xf32>
    %370 = vector.broadcast %369 : vector<1x8xf32> to vector<16x8xf32>
    %371 = arith.addf %367, %370 : vector<16x8xf32>
    %372 = arith.truncf %357 : vector<16x8xf32> to vector<16x8xbf16>
    %373 = arith.truncf %364 : vector<16x8xf32> to vector<16x8xbf16>
    "tpu.trace_start"() <{level = 10 : i32, message = "td,sd->ts"}> : () -> ()
    %cst_220 = arith.constant dense<0.000000e+00> : vector<16x16xf32>
    %374 = tpu.matmul %372, %373, %cst_220 {dimension_numbers = #tpu.dot_dimension_numbers<[1], [1], [0], [0], [0, 0, 1, 0], [], []>} : vector<16x8xbf16>, vector<16x8xbf16>, vector<16x16xf32> -> vector<16x16xf32>
    "tpu.trace_stop"() : () -> ()
    %cst_221 = arith.constant 0.353553385 : f32
    %375 = vector.broadcast %cst_221 : f32 to vector<16x16xf32>
    %376 = arith.mulf %374, %375 : vector<16x16xf32>
    %377 = arith.addf %376, %46 : vector<16x16xf32>
    %cst_222 = arith.constant dense<0xFF800000> : vector<16xf32>
    %378 = vector.multi_reduction <maximumf>, %377, %cst_222 [1] : vector<16x16xf32> to vector<16xf32>
    %379 = vector.shape_cast %378 : vector<16xf32> to vector<16x1xf32>
    %380 = vector.broadcast %379 : vector<16x1xf32> to vector<16x16xf32>
    %381 = arith.subf %377, %380 : vector<16x16xf32>
    %382 = math.exp %381 : vector<16x16xf32>
    %cst_223 = arith.constant dense<0.000000e+00> : vector<16xf32>
    %383 = vector.multi_reduction <add>, %382, %cst_223 [1] : vector<16x16xf32> to vector<16xf32>
    %384 = vector.shape_cast %383 : vector<16xf32> to vector<16x1xf32>
    %385 = tpu.reciprocal %384 {approx = true} : vector<16x1xf32> -> vector<16x1xf32>
    %386 = vector.broadcast %385 : vector<16x1xf32> to vector<16x16xf32>
    %387 = arith.mulf %382, %386 : vector<16x16xf32>
    %388 = arith.truncf %387 : vector<16x16xf32> to vector<16x16xbf16>
    %389 = arith.truncf %371 : vector<16x8xf32> to vector<16x8xbf16>
    %cst_224 = arith.constant dense<0.000000e+00> : vector<16x8xf32>
    %390 = tpu.matmul %388, %389, %cst_224 {dimension_numbers = #tpu.dot_dimension_numbers<[1], [0], [0], [1], [0, 0, 1, 1], [], []>} : vector<16x16xbf16>, vector<16x8xbf16>, vector<16x8xf32> -> vector<16x8xf32>
    %c4_225 = arith.constant 4 : index
    %c0_226 = arith.constant 0 : index
    %c0_227 = arith.constant 0 : index
    %391 = vector.load %arg14[%c4_225, %c0_226, %c0_227] : memref<8x8x32xbf16, #tpu.memory_space<vmem>>, vector<1x8x32xbf16>
    %392 = vector.shape_cast %391 : vector<1x8x32xbf16> to vector<8x32xbf16>
    %393 = arith.truncf %390 : vector<16x8xf32> to vector<16x8xbf16>
    %cst_228 = arith.constant dense<0.000000e+00> : vector<16x32xf32>
    %394 = tpu.matmul %393, %392, %cst_228 {dimension_numbers = #tpu.dot_dimension_numbers<[1], [0], [0], [1], [0, 0, 1, 1], [], []>} : vector<16x8xbf16>, vector<8x32xbf16>, vector<16x32xf32> -> vector<16x32xf32>
    %395 = arith.addf %350, %394 : vector<16x32xf32>
    %c5 = arith.constant 5 : index
    %c0_229 = arith.constant 0 : index
    %c0_230 = arith.constant 0 : index
    %396 = vector.load %arg8[%c5, %c0_229, %c0_230] : memref<8x32x8xbf16, #tpu.memory_space<vmem>>, vector<1x32x8xbf16>
    %397 = vector.shape_cast %396 : vector<1x32x8xbf16> to vector<32x8xbf16>
    %cst_231 = arith.constant dense<0.000000e+00> : vector<16x8xf32>
    %398 = tpu.matmul %349, %397, %cst_231 {dimension_numbers = #tpu.dot_dimension_numbers<[1], [0], [0], [1], [0, 0, 1, 1], [], []>} : vector<16x32xbf16>, vector<32x8xbf16>, vector<16x8xf32> -> vector<16x8xf32>
    %c5_232 = arith.constant 5 : index
    %c0_233 = arith.constant 0 : index
    %c0_234 = arith.constant 0 : index
    %399 = vector.load %arg9[%c5_232, %c0_233, %c0_234] : memref<8x1x8xf32, #tpu.memory_space<vmem>>, vector<1x1x8xf32>
    %400 = vector.shape_cast %399 : vector<1x1x8xf32> to vector<1x8xf32>
    %401 = vector.broadcast %400 : vector<1x8xf32> to vector<16x8xf32>
    %402 = arith.addf %398, %401 : vector<16x8xf32>
    %c5_235 = arith.constant 5 : index
    %c0_236 = arith.constant 0 : index
    %c0_237 = arith.constant 0 : index
    %403 = vector.load %arg10[%c5_235, %c0_236, %c0_237] : memref<8x32x8xbf16, #tpu.memory_space<vmem>>, vector<1x32x8xbf16>
    %404 = vector.shape_cast %403 : vector<1x32x8xbf16> to vector<32x8xbf16>
    %cst_238 = arith.constant dense<0.000000e+00> : vector<16x8xf32>
    %405 = tpu.matmul %349, %404, %cst_238 {dimension_numbers = #tpu.dot_dimension_numbers<[1], [0], [0], [1], [0, 0, 1, 1], [], []>} : vector<16x32xbf16>, vector<32x8xbf16>, vector<16x8xf32> -> vector<16x8xf32>
    %c5_239 = arith.constant 5 : index
    %c0_240 = arith.constant 0 : index
    %c0_241 = arith.constant 0 : index
    %406 = vector.load %arg11[%c5_239, %c0_240, %c0_241] : memref<8x1x8xf32, #tpu.memory_space<vmem>>, vector<1x1x8xf32>
    %407 = vector.shape_cast %406 : vector<1x1x8xf32> to vector<1x8xf32>
    %408 = vector.broadcast %407 : vector<1x8xf32> to vector<16x8xf32>
    %409 = arith.addf %405, %408 : vector<16x8xf32>
    %c5_242 = arith.constant 5 : index
    %c0_243 = arith.constant 0 : index
    %c0_244 = arith.constant 0 : index
    %410 = vector.load %arg12[%c5_242, %c0_243, %c0_244] : memref<8x32x8xbf16, #tpu.memory_space<vmem>>, vector<1x32x8xbf16>
    %411 = vector.shape_cast %410 : vector<1x32x8xbf16> to vector<32x8xbf16>
    %cst_245 = arith.constant dense<0.000000e+00> : vector<16x8xf32>
    %412 = tpu.matmul %349, %411, %cst_245 {dimension_numbers = #tpu.dot_dimension_numbers<[1], [0], [0], [1], [0, 0, 1, 1], [], []>} : vector<16x32xbf16>, vector<32x8xbf16>, vector<16x8xf32> -> vector<16x8xf32>
    %c5_246 = arith.constant 5 : index
    %c0_247 = arith.constant 0 : index
    %c0_248 = arith.constant 0 : index
    %413 = vector.load %arg13[%c5_246, %c0_247, %c0_248] : memref<8x1x8xf32, #tpu.memory_space<vmem>>, vector<1x1x8xf32>
    %414 = vector.shape_cast %413 : vector<1x1x8xf32> to vector<1x8xf32>
    %415 = vector.broadcast %414 : vector<1x8xf32> to vector<16x8xf32>
    %416 = arith.addf %412, %415 : vector<16x8xf32>
    %417 = arith.truncf %402 : vector<16x8xf32> to vector<16x8xbf16>
    %418 = arith.truncf %409 : vector<16x8xf32> to vector<16x8xbf16>
    "tpu.trace_start"() <{level = 10 : i32, message = "td,sd->ts"}> : () -> ()
    %cst_249 = arith.constant dense<0.000000e+00> : vector<16x16xf32>
    %419 = tpu.matmul %417, %418, %cst_249 {dimension_numbers = #tpu.dot_dimension_numbers<[1], [1], [0], [0], [0, 0, 1, 0], [], []>} : vector<16x8xbf16>, vector<16x8xbf16>, vector<16x16xf32> -> vector<16x16xf32>
    "tpu.trace_stop"() : () -> ()
    %cst_250 = arith.constant 0.353553385 : f32
    %420 = vector.broadcast %cst_250 : f32 to vector<16x16xf32>
    %421 = arith.mulf %419, %420 : vector<16x16xf32>
    %422 = arith.addf %421, %46 : vector<16x16xf32>
    %cst_251 = arith.constant dense<0xFF800000> : vector<16xf32>
    %423 = vector.multi_reduction <maximumf>, %422, %cst_251 [1] : vector<16x16xf32> to vector<16xf32>
    %424 = vector.shape_cast %423 : vector<16xf32> to vector<16x1xf32>
    %425 = vector.broadcast %424 : vector<16x1xf32> to vector<16x16xf32>
    %426 = arith.subf %422, %425 : vector<16x16xf32>
    %427 = math.exp %426 : vector<16x16xf32>
    %cst_252 = arith.constant dense<0.000000e+00> : vector<16xf32>
    %428 = vector.multi_reduction <add>, %427, %cst_252 [1] : vector<16x16xf32> to vector<16xf32>
    %429 = vector.shape_cast %428 : vector<16xf32> to vector<16x1xf32>
    %430 = tpu.reciprocal %429 {approx = true} : vector<16x1xf32> -> vector<16x1xf32>
    %431 = vector.broadcast %430 : vector<16x1xf32> to vector<16x16xf32>
    %432 = arith.mulf %427, %431 : vector<16x16xf32>
    %433 = arith.truncf %432 : vector<16x16xf32> to vector<16x16xbf16>
    %434 = arith.truncf %416 : vector<16x8xf32> to vector<16x8xbf16>
    %cst_253 = arith.constant dense<0.000000e+00> : vector<16x8xf32>
    %435 = tpu.matmul %433, %434, %cst_253 {dimension_numbers = #tpu.dot_dimension_numbers<[1], [0], [0], [1], [0, 0, 1, 1], [], []>} : vector<16x16xbf16>, vector<16x8xbf16>, vector<16x8xf32> -> vector<16x8xf32>
    %c5_254 = arith.constant 5 : index
    %c0_255 = arith.constant 0 : index
    %c0_256 = arith.constant 0 : index
    %436 = vector.load %arg14[%c5_254, %c0_255, %c0_256] : memref<8x8x32xbf16, #tpu.memory_space<vmem>>, vector<1x8x32xbf16>
    %437 = vector.shape_cast %436 : vector<1x8x32xbf16> to vector<8x32xbf16>
    %438 = arith.truncf %435 : vector<16x8xf32> to vector<16x8xbf16>
    %cst_257 = arith.constant dense<0.000000e+00> : vector<16x32xf32>
    %439 = tpu.matmul %438, %437, %cst_257 {dimension_numbers = #tpu.dot_dimension_numbers<[1], [0], [0], [1], [0, 0, 1, 1], [], []>} : vector<16x8xbf16>, vector<8x32xbf16>, vector<16x32xf32> -> vector<16x32xf32>
    %440 = arith.addf %395, %439 : vector<16x32xf32>
    %c6 = arith.constant 6 : index
    %c0_258 = arith.constant 0 : index
    %c0_259 = arith.constant 0 : index
    %441 = vector.load %arg8[%c6, %c0_258, %c0_259] : memref<8x32x8xbf16, #tpu.memory_space<vmem>>, vector<1x32x8xbf16>
    %442 = vector.shape_cast %441 : vector<1x32x8xbf16> to vector<32x8xbf16>
    %cst_260 = arith.constant dense<0.000000e+00> : vector<16x8xf32>
    %443 = tpu.matmul %349, %442, %cst_260 {dimension_numbers = #tpu.dot_dimension_numbers<[1], [0], [0], [1], [0, 0, 1, 1], [], []>} : vector<16x32xbf16>, vector<32x8xbf16>, vector<16x8xf32> -> vector<16x8xf32>
    %c6_261 = arith.constant 6 : index
    %c0_262 = arith.constant 0 : index
    %c0_263 = arith.constant 0 : index
    %444 = vector.load %arg9[%c6_261, %c0_262, %c0_263] : memref<8x1x8xf32, #tpu.memory_space<vmem>>, vector<1x1x8xf32>
    %445 = vector.shape_cast %444 : vector<1x1x8xf32> to vector<1x8xf32>
    %446 = vector.broadcast %445 : vector<1x8xf32> to vector<16x8xf32>
    %447 = arith.addf %443, %446 : vector<16x8xf32>
    %c6_264 = arith.constant 6 : index
    %c0_265 = arith.constant 0 : index
    %c0_266 = arith.constant 0 : index
    %448 = vector.load %arg10[%c6_264, %c0_265, %c0_266] : memref<8x32x8xbf16, #tpu.memory_space<vmem>>, vector<1x32x8xbf16>
    %449 = vector.shape_cast %448 : vector<1x32x8xbf16> to vector<32x8xbf16>
    %cst_267 = arith.constant dense<0.000000e+00> : vector<16x8xf32>
    %450 = tpu.matmul %349, %449, %cst_267 {dimension_numbers = #tpu.dot_dimension_numbers<[1], [0], [0], [1], [0, 0, 1, 1], [], []>} : vector<16x32xbf16>, vector<32x8xbf16>, vector<16x8xf32> -> vector<16x8xf32>
    %c6_268 = arith.constant 6 : index
    %c0_269 = arith.constant 0 : index
    %c0_270 = arith.constant 0 : index
    %451 = vector.load %arg11[%c6_268, %c0_269, %c0_270] : memref<8x1x8xf32, #tpu.memory_space<vmem>>, vector<1x1x8xf32>
    %452 = vector.shape_cast %451 : vector<1x1x8xf32> to vector<1x8xf32>
    %453 = vector.broadcast %452 : vector<1x8xf32> to vector<16x8xf32>
    %454 = arith.addf %450, %453 : vector<16x8xf32>
    %c6_271 = arith.constant 6 : index
    %c0_272 = arith.constant 0 : index
    %c0_273 = arith.constant 0 : index
    %455 = vector.load %arg12[%c6_271, %c0_272, %c0_273] : memref<8x32x8xbf16, #tpu.memory_space<vmem>>, vector<1x32x8xbf16>
    %456 = vector.shape_cast %455 : vector<1x32x8xbf16> to vector<32x8xbf16>
    %cst_274 = arith.constant dense<0.000000e+00> : vector<16x8xf32>
    %457 = tpu.matmul %349, %456, %cst_274 {dimension_numbers = #tpu.dot_dimension_numbers<[1], [0], [0], [1], [0, 0, 1, 1], [], []>} : vector<16x32xbf16>, vector<32x8xbf16>, vector<16x8xf32> -> vector<16x8xf32>
    %c6_275 = arith.constant 6 : index
    %c0_276 = arith.constant 0 : index
    %c0_277 = arith.constant 0 : index
    %458 = vector.load %arg13[%c6_275, %c0_276, %c0_277] : memref<8x1x8xf32, #tpu.memory_space<vmem>>, vector<1x1x8xf32>
    %459 = vector.shape_cast %458 : vector<1x1x8xf32> to vector<1x8xf32>
    %460 = vector.broadcast %459 : vector<1x8xf32> to vector<16x8xf32>
    %461 = arith.addf %457, %460 : vector<16x8xf32>
    %462 = arith.truncf %447 : vector<16x8xf32> to vector<16x8xbf16>
    %463 = arith.truncf %454 : vector<16x8xf32> to vector<16x8xbf16>
    "tpu.trace_start"() <{level = 10 : i32, message = "td,sd->ts"}> : () -> ()
    %cst_278 = arith.constant dense<0.000000e+00> : vector<16x16xf32>
    %464 = tpu.matmul %462, %463, %cst_278 {dimension_numbers = #tpu.dot_dimension_numbers<[1], [1], [0], [0], [0, 0, 1, 0], [], []>} : vector<16x8xbf16>, vector<16x8xbf16>, vector<16x16xf32> -> vector<16x16xf32>
    "tpu.trace_stop"() : () -> ()
    %cst_279 = arith.constant 0.353553385 : f32
    %465 = vector.broadcast %cst_279 : f32 to vector<16x16xf32>
    %466 = arith.mulf %464, %465 : vector<16x16xf32>
    %467 = arith.addf %466, %46 : vector<16x16xf32>
    %cst_280 = arith.constant dense<0xFF800000> : vector<16xf32>
    %468 = vector.multi_reduction <maximumf>, %467, %cst_280 [1] : vector<16x16xf32> to vector<16xf32>
    %469 = vector.shape_cast %468 : vector<16xf32> to vector<16x1xf32>
    %470 = vector.broadcast %469 : vector<16x1xf32> to vector<16x16xf32>
    %471 = arith.subf %467, %470 : vector<16x16xf32>
    %472 = math.exp %471 : vector<16x16xf32>
    %cst_281 = arith.constant dense<0.000000e+00> : vector<16xf32>
    %473 = vector.multi_reduction <add>, %472, %cst_281 [1] : vector<16x16xf32> to vector<16xf32>
    %474 = vector.shape_cast %473 : vector<16xf32> to vector<16x1xf32>
    %475 = tpu.reciprocal %474 {approx = true} : vector<16x1xf32> -> vector<16x1xf32>
    %476 = vector.broadcast %475 : vector<16x1xf32> to vector<16x16xf32>
    %477 = arith.mulf %472, %476 : vector<16x16xf32>
    %478 = arith.truncf %477 : vector<16x16xf32> to vector<16x16xbf16>
    %479 = arith.truncf %461 : vector<16x8xf32> to vector<16x8xbf16>
    %cst_282 = arith.constant dense<0.000000e+00> : vector<16x8xf32>
    %480 = tpu.matmul %478, %479, %cst_282 {dimension_numbers = #tpu.dot_dimension_numbers<[1], [0], [0], [1], [0, 0, 1, 1], [], []>} : vector<16x16xbf16>, vector<16x8xbf16>, vector<16x8xf32> -> vector<16x8xf32>
    %c6_283 = arith.constant 6 : index
    %c0_284 = arith.constant 0 : index
    %c0_285 = arith.constant 0 : index
    %481 = vector.load %arg14[%c6_283, %c0_284, %c0_285] : memref<8x8x32xbf16, #tpu.memory_space<vmem>>, vector<1x8x32xbf16>
    %482 = vector.shape_cast %481 : vector<1x8x32xbf16> to vector<8x32xbf16>
    %483 = arith.truncf %480 : vector<16x8xf32> to vector<16x8xbf16>
    %cst_286 = arith.constant dense<0.000000e+00> : vector<16x32xf32>
    %484 = tpu.matmul %483, %482, %cst_286 {dimension_numbers = #tpu.dot_dimension_numbers<[1], [0], [0], [1], [0, 0, 1, 1], [], []>} : vector<16x8xbf16>, vector<8x32xbf16>, vector<16x32xf32> -> vector<16x32xf32>
    %485 = arith.addf %440, %484 : vector<16x32xf32>
    %c7 = arith.constant 7 : index
    %c0_287 = arith.constant 0 : index
    %c0_288 = arith.constant 0 : index
    %486 = vector.load %arg8[%c7, %c0_287, %c0_288] : memref<8x32x8xbf16, #tpu.memory_space<vmem>>, vector<1x32x8xbf16>
    %487 = vector.shape_cast %486 : vector<1x32x8xbf16> to vector<32x8xbf16>
    %cst_289 = arith.constant dense<0.000000e+00> : vector<16x8xf32>
    %488 = tpu.matmul %349, %487, %cst_289 {dimension_numbers = #tpu.dot_dimension_numbers<[1], [0], [0], [1], [0, 0, 1, 1], [], []>} : vector<16x32xbf16>, vector<32x8xbf16>, vector<16x8xf32> -> vector<16x8xf32>
    %c7_290 = arith.constant 7 : index
    %c0_291 = arith.constant 0 : index
    %c0_292 = arith.constant 0 : index
    %489 = vector.load %arg9[%c7_290, %c0_291, %c0_292] : memref<8x1x8xf32, #tpu.memory_space<vmem>>, vector<1x1x8xf32>
    %490 = vector.shape_cast %489 : vector<1x1x8xf32> to vector<1x8xf32>
    %491 = vector.broadcast %490 : vector<1x8xf32> to vector<16x8xf32>
    %492 = arith.addf %488, %491 : vector<16x8xf32>
    %c7_293 = arith.constant 7 : index
    %c0_294 = arith.constant 0 : index
    %c0_295 = arith.constant 0 : index
    %493 = vector.load %arg10[%c7_293, %c0_294, %c0_295] : memref<8x32x8xbf16, #tpu.memory_space<vmem>>, vector<1x32x8xbf16>
    %494 = vector.shape_cast %493 : vector<1x32x8xbf16> to vector<32x8xbf16>
    %cst_296 = arith.constant dense<0.000000e+00> : vector<16x8xf32>
    %495 = tpu.matmul %349, %494, %cst_296 {dimension_numbers = #tpu.dot_dimension_numbers<[1], [0], [0], [1], [0, 0, 1, 1], [], []>} : vector<16x32xbf16>, vector<32x8xbf16>, vector<16x8xf32> -> vector<16x8xf32>
    %c7_297 = arith.constant 7 : index
    %c0_298 = arith.constant 0 : index
    %c0_299 = arith.constant 0 : index
    %496 = vector.load %arg11[%c7_297, %c0_298, %c0_299] : memref<8x1x8xf32, #tpu.memory_space<vmem>>, vector<1x1x8xf32>
    %497 = vector.shape_cast %496 : vector<1x1x8xf32> to vector<1x8xf32>
    %498 = vector.broadcast %497 : vector<1x8xf32> to vector<16x8xf32>
    %499 = arith.addf %495, %498 : vector<16x8xf32>
    %c7_300 = arith.constant 7 : index
    %c0_301 = arith.constant 0 : index
    %c0_302 = arith.constant 0 : index
    %500 = vector.load %arg12[%c7_300, %c0_301, %c0_302] : memref<8x32x8xbf16, #tpu.memory_space<vmem>>, vector<1x32x8xbf16>
    %501 = vector.shape_cast %500 : vector<1x32x8xbf16> to vector<32x8xbf16>
    %cst_303 = arith.constant dense<0.000000e+00> : vector<16x8xf32>
    %502 = tpu.matmul %349, %501, %cst_303 {dimension_numbers = #tpu.dot_dimension_numbers<[1], [0], [0], [1], [0, 0, 1, 1], [], []>} : vector<16x32xbf16>, vector<32x8xbf16>, vector<16x8xf32> -> vector<16x8xf32>
    %c7_304 = arith.constant 7 : index
    %c0_305 = arith.constant 0 : index
    %c0_306 = arith.constant 0 : index
    %503 = vector.load %arg13[%c7_304, %c0_305, %c0_306] : memref<8x1x8xf32, #tpu.memory_space<vmem>>, vector<1x1x8xf32>
    %504 = vector.shape_cast %503 : vector<1x1x8xf32> to vector<1x8xf32>
    %505 = vector.broadcast %504 : vector<1x8xf32> to vector<16x8xf32>
    %506 = arith.addf %502, %505 : vector<16x8xf32>
    %507 = arith.truncf %492 : vector<16x8xf32> to vector<16x8xbf16>
    %508 = arith.truncf %499 : vector<16x8xf32> to vector<16x8xbf16>
    "tpu.trace_start"() <{level = 10 : i32, message = "td,sd->ts"}> : () -> ()
    %cst_307 = arith.constant dense<0.000000e+00> : vector<16x16xf32>
    %509 = tpu.matmul %507, %508, %cst_307 {dimension_numbers = #tpu.dot_dimension_numbers<[1], [1], [0], [0], [0, 0, 1, 0], [], []>} : vector<16x8xbf16>, vector<16x8xbf16>, vector<16x16xf32> -> vector<16x16xf32>
    "tpu.trace_stop"() : () -> ()
    %cst_308 = arith.constant 0.353553385 : f32
    %510 = vector.broadcast %cst_308 : f32 to vector<16x16xf32>
    %511 = arith.mulf %509, %510 : vector<16x16xf32>
    %512 = arith.addf %511, %46 : vector<16x16xf32>
    %cst_309 = arith.constant dense<0xFF800000> : vector<16xf32>
    %513 = vector.multi_reduction <maximumf>, %512, %cst_309 [1] : vector<16x16xf32> to vector<16xf32>
    %514 = vector.shape_cast %513 : vector<16xf32> to vector<16x1xf32>
    %515 = vector.broadcast %514 : vector<16x1xf32> to vector<16x16xf32>
    %516 = arith.subf %512, %515 : vector<16x16xf32>
    %517 = math.exp %516 : vector<16x16xf32>
    %cst_310 = arith.constant dense<0.000000e+00> : vector<16xf32>
    %518 = vector.multi_reduction <add>, %517, %cst_310 [1] : vector<16x16xf32> to vector<16xf32>
    %519 = vector.shape_cast %518 : vector<16xf32> to vector<16x1xf32>
    %520 = tpu.reciprocal %519 {approx = true} : vector<16x1xf32> -> vector<16x1xf32>
    %521 = vector.broadcast %520 : vector<16x1xf32> to vector<16x16xf32>
    %522 = arith.mulf %517, %521 : vector<16x16xf32>
    %523 = arith.truncf %522 : vector<16x16xf32> to vector<16x16xbf16>
    %524 = arith.truncf %506 : vector<16x8xf32> to vector<16x8xbf16>
    %cst_311 = arith.constant dense<0.000000e+00> : vector<16x8xf32>
    %525 = tpu.matmul %523, %524, %cst_311 {dimension_numbers = #tpu.dot_dimension_numbers<[1], [0], [0], [1], [0, 0, 1, 1], [], []>} : vector<16x16xbf16>, vector<16x8xbf16>, vector<16x8xf32> -> vector<16x8xf32>
    %c7_312 = arith.constant 7 : index
    %c0_313 = arith.constant 0 : index
    %c0_314 = arith.constant 0 : index
    %526 = vector.load %arg14[%c7_312, %c0_313, %c0_314] : memref<8x8x32xbf16, #tpu.memory_space<vmem>>, vector<1x8x32xbf16>
    %527 = vector.shape_cast %526 : vector<1x8x32xbf16> to vector<8x32xbf16>
    %528 = arith.truncf %525 : vector<16x8xf32> to vector<16x8xbf16>
    %cst_315 = arith.constant dense<0.000000e+00> : vector<16x32xf32>
    %529 = tpu.matmul %528, %527, %cst_315 {dimension_numbers = #tpu.dot_dimension_numbers<[1], [0], [0], [1], [0, 0, 1, 1], [], []>} : vector<16x8xbf16>, vector<8x32xbf16>, vector<16x32xf32> -> vector<16x32xf32>
    %530 = arith.addf %485, %529 : vector<16x32xf32>
    %c1_316 = arith.constant 1 : index
    %c0_317 = arith.constant 0 : index
    %c0_318 = arith.constant 0 : index
    %531 = vector.load %arg15[%c1_316, %c0_317, %c0_318] : memref<2x1x32xf32, #tpu.memory_space<vmem>>, vector<1x1x32xf32>
    %532 = vector.shape_cast %531 : vector<1x1x32xf32> to vector<1x32xf32>
    %533 = vector.broadcast %532 : vector<1x32xf32> to vector<16x32xf32>
    %534 = arith.addf %530, %533 : vector<16x32xf32>
    %535 = arith.addf %534, %348 : vector<16x32xf32>
    %c1_319 = arith.constant 1 : index
    %c0_320 = arith.constant 0 : index
    %c0_321 = arith.constant 0 : index
    %536 = vector.load %arg16[%c1_319, %c0_320, %c0_321] : memref<2x1x32xf32, #tpu.memory_space<vmem>>, vector<1x1x32xf32>
    %537 = vector.shape_cast %536 : vector<1x1x32xf32> to vector<1x32xf32>
    %c1_322 = arith.constant 1 : index
    %c0_323 = arith.constant 0 : index
    %c0_324 = arith.constant 0 : index
    %538 = vector.load %arg17[%c1_322, %c0_323, %c0_324] : memref<2x1x32xf32, #tpu.memory_space<vmem>>, vector<1x1x32xf32>
    %539 = vector.shape_cast %538 : vector<1x1x32xf32> to vector<1x32xf32>
    %cst_325 = arith.constant dense<0.000000e+00> : vector<16xf32>
    %540 = vector.multi_reduction <add>, %535, %cst_325 [1] : vector<16x32xf32> to vector<16xf32>
    %541 = vector.shape_cast %540 : vector<16xf32> to vector<16x1xf32>
    %cst_326 = arith.constant 3.200000e+01 : f32
    %542 = vector.broadcast %cst_326 : f32 to vector<16x1xf32>
    %543 = arith.divf %541, %542 : vector<16x1xf32>
    %544 = vector.broadcast %543 : vector<16x1xf32> to vector<16x32xf32>
    %545 = arith.subf %535, %544 : vector<16x32xf32>
    %546 = arith.mulf %545, %545 : vector<16x32xf32>
    %cst_327 = arith.constant dense<0.000000e+00> : vector<16xf32>
    %547 = vector.multi_reduction <add>, %546, %cst_327 [1] : vector<16x32xf32> to vector<16xf32>
    %548 = vector.shape_cast %547 : vector<16xf32> to vector<16x1xf32>
    %cst_328 = arith.constant 3.200000e+01 : f32
    %549 = vector.broadcast %cst_328 : f32 to vector<16x1xf32>
    %550 = arith.divf %548, %549 : vector<16x1xf32>
    %551 = vector.broadcast %543 : vector<16x1xf32> to vector<16x32xf32>
    %552 = arith.subf %535, %551 : vector<16x32xf32>
    %cst_329 = arith.constant 9.99999974E-6 : f32
    %553 = vector.broadcast %cst_329 : f32 to vector<16x1xf32>
    %554 = arith.addf %550, %553 : vector<16x1xf32>
    %555 = math.rsqrt %554 : vector<16x1xf32>
    %556 = vector.broadcast %555 : vector<16x1xf32> to vector<16x32xf32>
    %557 = arith.mulf %552, %556 : vector<16x32xf32>
    %558 = vector.broadcast %537 : vector<1x32xf32> to vector<16x32xf32>
    %559 = arith.mulf %557, %558 : vector<16x32xf32>
    %560 = vector.broadcast %539 : vector<1x32xf32> to vector<16x32xf32>
    %561 = arith.addf %559, %560 : vector<16x32xf32>
    %562 = arith.truncf %561 : vector<16x32xf32> to vector<16x32xbf16>
    %c1_330 = arith.constant 1 : index
    %c0_331 = arith.constant 0 : index
    %c0_332 = arith.constant 0 : index
    %563 = vector.load %arg18[%c1_330, %c0_331, %c0_332] : memref<2x32x128xbf16, #tpu.memory_space<vmem>>, vector<1x32x128xbf16>
    %564 = vector.shape_cast %563 : vector<1x32x128xbf16> to vector<32x128xbf16>
    %cst_333 = arith.constant dense<0.000000e+00> : vector<16x128xf32>
    %565 = tpu.matmul %562, %564, %cst_333 {dimension_numbers = #tpu.dot_dimension_numbers<[1], [0], [0], [1], [0, 0, 1, 1], [], []>} : vector<16x32xbf16>, vector<32x128xbf16>, vector<16x128xf32> -> vector<16x128xf32>
    %c1_334 = arith.constant 1 : index
    %c0_335 = arith.constant 0 : index
    %c0_336 = arith.constant 0 : index
    %566 = vector.load %arg19[%c1_334, %c0_335, %c0_336] : memref<2x1x128xf32, #tpu.memory_space<vmem>>, vector<1x1x128xf32>
    %567 = vector.shape_cast %566 : vector<1x1x128xf32> to vector<1x128xf32>
    %568 = vector.broadcast %567 : vector<1x128xf32> to vector<16x128xf32>
    %569 = arith.addf %565, %568 : vector<16x128xf32>
    %cst_337 = arith.constant 5.000000e-01 : f32
    %570 = vector.broadcast %cst_337 : f32 to vector<16x128xf32>
    %571 = arith.mulf %570, %569 : vector<16x128xf32>
    %cst_338 = arith.constant 0.707106769 : f32
    %572 = vector.broadcast %cst_338 : f32 to vector<16x128xf32>
    %573 = arith.mulf %569, %572 : vector<16x128xf32>
    %cst_339 = arith.constant -4.000000e+00 : f32
    %cst_340 = arith.constant 4.000000e+00 : f32
    %574 = vector.broadcast %cst_339 : f32 to vector<16x128xf32>
    %575 = arith.maximumf %574, %573 : vector<16x128xf32>
    %576 = vector.broadcast %cst_340 : f32 to vector<16x128xf32>
    %577 = arith.minimumf %576, %575 : vector<16x128xf32>
    %578 = arith.mulf %577, %577 : vector<16x128xf32>
    %cst_341 = arith.constant 2.29050653E-4 : f32
    %579 = vector.broadcast %cst_341 : f32 to vector<16x128xf32>
    %580 = arith.mulf %579, %578 : vector<16x128xf32>
    %cst_342 = arith.constant 0.00340829091 : f32
    %581 = vector.broadcast %cst_342 : f32 to vector<16x128xf32>
    %582 = arith.addf %580, %581 : vector<16x128xf32>
    %583 = arith.mulf %582, %578 : vector<16x128xf32>
    %cst_343 = arith.constant 0.0509556942 : f32
    %584 = vector.broadcast %cst_343 : f32 to vector<16x128xf32>
    %585 = arith.addf %583, %584 : vector<16x128xf32>
    %586 = arith.mulf %585, %578 : vector<16x128xf32>
    %cst_344 = arith.constant 0.185208321 : f32
    %587 = vector.broadcast %cst_344 : f32 to vector<16x128xf32>
    %588 = arith.addf %586, %587 : vector<16x128xf32>
    %589 = arith.mulf %588, %578 : vector<16x128xf32>
    %cst_345 = arith.constant 1.12837911 : f32
    %590 = vector.broadcast %cst_345 : f32 to vector<16x128xf32>
    %591 = arith.addf %589, %590 : vector<16x128xf32>
    %592 = arith.mulf %577, %591 : vector<16x128xf32>
    %cst_346 = arith.constant -1.17916031E-7 : f32
    %593 = vector.broadcast %cst_346 : f32 to vector<16x128xf32>
    %594 = arith.mulf %593, %578 : vector<16x128xf32>
    %cst_347 = arith.constant 2.35479656E-5 : f32
    %595 = vector.broadcast %cst_347 : f32 to vector<16x128xf32>
    %596 = arith.addf %594, %595 : vector<16x128xf32>
    %597 = arith.mulf %596, %578 : vector<16x128xf32>
    %cst_348 = arith.constant 0.00101796258 : f32
    %598 = vector.broadcast %cst_348 : f32 to vector<16x128xf32>
    %599 = arith.addf %597, %598 : vector<16x128xf32>
    %600 = arith.mulf %599, %578 : vector<16x128xf32>
    %cst_349 = arith.constant 0.0140704699 : f32
    %601 = vector.broadcast %cst_349 : f32 to vector<16x128xf32>
    %602 = arith.addf %600, %601 : vector<16x128xf32>
    %603 = arith.mulf %602, %578 : vector<16x128xf32>
    %cst_350 = arith.constant 0.110985048 : f32
    %604 = vector.broadcast %cst_350 : f32 to vector<16x128xf32>
    %605 = arith.addf %603, %604 : vector<16x128xf32>
    %606 = arith.mulf %605, %578 : vector<16x128xf32>
    %cst_351 = arith.constant 0.497469246 : f32
    %607 = vector.broadcast %cst_351 : f32 to vector<16x128xf32>
    %608 = arith.addf %606, %607 : vector<16x128xf32>
    %609 = arith.mulf %608, %578 : vector<16x128xf32>
    %cst_352 = arith.constant 1.000000e+00 : f32
    %610 = vector.broadcast %cst_352 : f32 to vector<16x128xf32>
    %611 = arith.addf %609, %610 : vector<16x128xf32>
    %612 = arith.divf %592, %611 : vector<16x128xf32>
    %cst_353 = arith.constant 1.000000e+00 : f32
    %613 = vector.broadcast %cst_353 : f32 to vector<16x128xf32>
    %614 = arith.addf %613, %612 : vector<16x128xf32>
    %615 = arith.mulf %571, %614 : vector<16x128xf32>
    %c1_354 = arith.constant 1 : index
    %c0_355 = arith.constant 0 : index
    %c0_356 = arith.constant 0 : index
    %616 = vector.load %arg20[%c1_354, %c0_355, %c0_356] : memref<2x128x32xbf16, #tpu.memory_space<vmem>>, vector<1x128x32xbf16>
    %617 = vector.shape_cast %616 : vector<1x128x32xbf16> to vector<128x32xbf16>
    %618 = arith.truncf %615 : vector<16x128xf32> to vector<16x128xbf16>
    %cst_357 = arith.constant dense<0.000000e+00> : vector<16x32xf32>
    %619 = tpu.matmul %618, %617, %cst_357 {dimension_numbers = #tpu.dot_dimension_numbers<[1], [0], [0], [1], [0, 0, 1, 1], [], []>} : vector<16x128xbf16>, vector<128x32xbf16>, vector<16x32xf32> -> vector<16x32xf32>
    %c1_358 = arith.constant 1 : index
    %c0_359 = arith.constant 0 : index
    %c0_360 = arith.constant 0 : index
    %620 = vector.load %arg21[%c1_358, %c0_359, %c0_360] : memref<2x1x32xf32, #tpu.memory_space<vmem>>, vector<1x1x32xf32>
    %621 = vector.shape_cast %620 : vector<1x1x32xf32> to vector<1x32xf32>
    %622 = vector.broadcast %621 : vector<1x32xf32> to vector<16x32xf32>
    %623 = arith.addf %619, %622 : vector<16x32xf32>
    %624 = arith.addf %623, %561 : vector<16x32xf32>
    %c1_361 = arith.constant 1 : index
    %c0_362 = arith.constant 0 : index
    %c0_363 = arith.constant 0 : index
    %625 = vector.load %arg22[%c1_361, %c0_362, %c0_363] : memref<2x1x32xf32, #tpu.memory_space<vmem>>, vector<1x1x32xf32>
    %626 = vector.shape_cast %625 : vector<1x1x32xf32> to vector<1x32xf32>
    %c1_364 = arith.constant 1 : index
    %c0_365 = arith.constant 0 : index
    %c0_366 = arith.constant 0 : index
    %627 = vector.load %arg23[%c1_364, %c0_365, %c0_366] : memref<2x1x32xf32, #tpu.memory_space<vmem>>, vector<1x1x32xf32>
    %628 = vector.shape_cast %627 : vector<1x1x32xf32> to vector<1x32xf32>
    %cst_367 = arith.constant dense<0.000000e+00> : vector<16xf32>
    %629 = vector.multi_reduction <add>, %624, %cst_367 [1] : vector<16x32xf32> to vector<16xf32>
    %630 = vector.shape_cast %629 : vector<16xf32> to vector<16x1xf32>
    %cst_368 = arith.constant 3.200000e+01 : f32
    %631 = vector.broadcast %cst_368 : f32 to vector<16x1xf32>
    %632 = arith.divf %630, %631 : vector<16x1xf32>
    %633 = vector.broadcast %632 : vector<16x1xf32> to vector<16x32xf32>
    %634 = arith.subf %624, %633 : vector<16x32xf32>
    %635 = arith.mulf %634, %634 : vector<16x32xf32>
    %cst_369 = arith.constant dense<0.000000e+00> : vector<16xf32>
    %636 = vector.multi_reduction <add>, %635, %cst_369 [1] : vector<16x32xf32> to vector<16xf32>
    %637 = vector.shape_cast %636 : vector<16xf32> to vector<16x1xf32>
    %cst_370 = arith.constant 3.200000e+01 : f32
    %638 = vector.broadcast %cst_370 : f32 to vector<16x1xf32>
    %639 = arith.divf %637, %638 : vector<16x1xf32>
    %640 = vector.broadcast %632 : vector<16x1xf32> to vector<16x32xf32>
    %641 = arith.subf %624, %640 : vector<16x32xf32>
    %cst_371 = arith.constant 9.99999974E-6 : f32
    %642 = vector.broadcast %cst_371 : f32 to vector<16x1xf32>
    %643 = arith.addf %639, %642 : vector<16x1xf32>
    %644 = math.rsqrt %643 : vector<16x1xf32>
    %645 = vector.broadcast %644 : vector<16x1xf32> to vector<16x32xf32>
    %646 = arith.mulf %641, %645 : vector<16x32xf32>
    %647 = vector.broadcast %626 : vector<1x32xf32> to vector<16x32xf32>
    %648 = arith.mulf %646, %647 : vector<16x32xf32>
    %649 = vector.broadcast %628 : vector<1x32xf32> to vector<16x32xf32>
    %650 = arith.addf %648, %649 : vector<16x32xf32>
    %651 = tpu.iota {dimensions = array<i32: 1>} : vector<2x16xi32>
    %652 = tpu.iota {dimensions = array<i32: 0>} : vector<2x16xi32>
    %c8_i32 = arith.constant 8 : i32
    %653 = vector.broadcast %c8_i32 : i32 to vector<2x16xi32>
    %654 = arith.muli %652, %653 : vector<2x16xi32>
    %655 = arith.cmpi eq, %651, %654 : vector<2x16xi32>
    %cst_372 = arith.constant 1.000000e+00 : f32
    %cst_373 = arith.constant 0.000000e+00 : f32
    %656 = vector.broadcast %cst_372 : f32 to vector<2x16xf32>
    %657 = vector.broadcast %cst_373 : f32 to vector<2x16xf32>
    %658 = arith.select %655, %656, %657 : vector<2x16xi1>, vector<2x16xf32>
    %cst_374 = arith.constant dense<0.000000e+00> : vector<2x32xf32>
    %659 = tpu.matmul %658, %650, %cst_374 {dimension_numbers = #tpu.dot_dimension_numbers<[1], [0], [0], [1], [0, 0, 1, 1], [], []>} : vector<2x16xf32>, vector<16x32xf32>, vector<2x32xf32> -> vector<2x32xf32>
    %c0_375 = arith.constant 0 : index
    %c0_376 = arith.constant 0 : index
    %660 = vector.load %arg24[%c0_375, %c0_376] : memref<32x32xbf16, #tpu.memory_space<vmem>>, vector<32x32xbf16>
    %661 = arith.truncf %659 : vector<2x32xf32> to vector<2x32xbf16>
    %cst_377 = arith.constant dense<0.000000e+00> : vector<2x32xf32>
    %662 = tpu.matmul %661, %660, %cst_377 {dimension_numbers = #tpu.dot_dimension_numbers<[1], [0], [0], [1], [0, 0, 1, 1], [], []>} : vector<2x32xbf16>, vector<32x32xbf16>, vector<2x32xf32> -> vector<2x32xf32>
    %c0_378 = arith.constant 0 : index
    %c0_379 = arith.constant 0 : index
    %663 = vector.load %arg25[%c0_378, %c0_379] : memref<1x32xf32, #tpu.memory_space<vmem>>, vector<1x32xf32>
    %664 = vector.broadcast %663 : vector<1x32xf32> to vector<2x32xf32>
    %665 = arith.addf %662, %664 : vector<2x32xf32>
    %666 = math.tanh %665 : vector<2x32xf32>
    %c0_380 = arith.constant 0 : index
    %c0_381 = arith.constant 0 : index
    %667 = vector.load %arg26[%c0_380, %c0_381] : memref<32x2xbf16, #tpu.memory_space<vmem>>, vector<32x2xbf16>
    %668 = arith.truncf %666 : vector<2x32xf32> to vector<2x32xbf16>
    %cst_382 = arith.constant dense<0.000000e+00> : vector<2x2xf32>
    %669 = tpu.matmul %668, %667, %cst_382 {dimension_numbers = #tpu.dot_dimension_numbers<[1], [0], [0], [1], [0, 0, 1, 1], [], []>} : vector<2x32xbf16>, vector<32x2xbf16>, vector<2x2xf32> -> vector<2x2xf32>
    %c0_383 = arith.constant 0 : index
    %c0_384 = arith.constant 0 : index
    %670 = vector.load %arg27[%c0_383, %c0_384] : memref<1x2xf32, #tpu.memory_space<vmem>>, vector<1x2xf32>
    %671 = vector.broadcast %670 : vector<1x2xf32> to vector<2x2xf32>
    %672 = arith.addf %669, %671 : vector<2x2xf32>
    %c0_385 = arith.constant 0 : index
    %c0_386 = arith.constant 0 : index
    %673 = vector.load %arg28[%c0_385, %c0_386] : memref<2x2xf32, #tpu.memory_space<vmem>>, vector<2x2xf32>
    tpu.vector_store %arg28[%c0_385, %c0_386], %672 {strides = array<i32>} : memref<2x2xf32, #tpu.memory_space<vmem>>, vector<2x2xf32>,
    return
  }
}

</mosaic_0001>

<bundles_post_ra>
// kernel: golden_sentence_bert_forward.1
= control target key start
LH: loop header
LB: loop body
LE: loop exit
PB: predicated region body
PF: predicated region fallthrough
CT: control target
= control target key end

     0   :  { %s4275_s0 = inlined_call_operand.vmem [shape: s32[16,1], index: 0, kind: input, shape index: {}]   ;;  %s4276_s1 = inlined_call_operand.vmem [shape: s32[16,1], index: 1, kind: input, shape index: {}]   ;;  %s4277_s2 = inlined_call_operand.vmem [shape: f32[16,16], index: 2, kind: input, shape index: {}]   ;;  %s4278_s3 = inlined_call_operand.vmem [shape: f32[100,32], index: 3, kind: input, shape index: {}]   ;;  %s4279_s4 = inlined_call_operand.vmem [shape: f32[24,32], index: 4, kind: input, shape index: {}]   ;;  %s4280_s5 = inlined_call_operand.vmem [shape: f32[1,32], index: 5, kind: input, shape index: {}]   ;;  %s4281_s6 = inlined_call_operand.vmem [shape: f32[1,32], index: 6, kind: input, shape index: {}]   ;;  %s4282_s7 = inlined_call_operand.vmem [shape: f32[1,32], index: 7, kind: input, shape index: {}]   ;;  %s4283_s8 = inlined_call_operand.vmem [shape: bf16[8,32,8], index: 8, kind: input, shape index: {}]   ;;  %s4284_s9 = inlined_call_operand.vmem [shape: f32[8,1,8], index: 9, kind: input, shape index: {}]   ;;  %s4285_s10 = inlined_call_operand.vmem [shape: bf16[8,32,8], index: 10, kind: input, shape index: {}]   ;;  %s4286_s11 = inlined_call_operand.vmem [shape: f32[8,1,8], index: 11, kind: input, shape index: {}]   ;;  %s4287_s12 = inlined_call_operand.vmem [shape: bf16[8,32,8], index: 12, kind: input, shape index: {}]   ;;  %s4288_s13 = inlined_call_operand.vmem [shape: f32[8,1,8], index: 13, kind: input, shape index: {}]   ;;  %s4289_s14 = inlined_call_operand.vmem [shape: bf16[8,8,32], index: 14, kind: input, shape index: {}]   ;;  %s4290_s15 = inlined_call_operand.vmem [shape: f32[2,1,32], index: 15, kind: input, shape index: {}]   ;;  %s4291_s16 = inlined_call_operand.vmem [shape: f32[2,1,32], index: 16, kind: input, shape index: {}]   ;;  %s4292_s17 = inlined_call_operand.vmem [shape: f32[2,1,32], index: 17, kind: input, shape index: {}]   ;;  %s4293_s18 = inlined_call_operand.vmem [shape: bf16[2,32,128], index: 18, kind: input, shape index: {}]   ;;  %s4294_s19 = inlined_call_operand.vmem [shape: f32[2,1,128], index: 19, kind: input, shape index: {}]   ;;  %s4295_s20 = inlined_call_operand.vmem [shape: bf16[2,128,32], index: 20, kind: input, shape index: {}]   ;;  %s4296_s21 = inlined_call_operand.vmem [shape: f32[2,1,32], index: 21, kind: input, shape index: {}]   ;;  %s4297_s22 = inlined_call_operand.vmem [shape: f32[2,1,32], index: 22, kind: input, shape index: {}]   ;;  %s4298_s23 = inlined_call_operand.vmem [shape: f32[2,1,32], index: 23, kind: input, shape index: {}]   ;;  %s4299_s24 = inlined_call_operand.vmem [shape: bf16[32,32], index: 24, kind: input, shape index: {}]   ;;  %s4300_s25 = inlined_call_operand.vmem [shape: f32[1,32], index: 25, kind: input, shape index: {}]   ;;  %s4301_s26 = inlined_call_operand.vmem [shape: bf16[32,2], index: 26, kind: input, shape index: {}]   ;;  %s4302_s27 = inlined_call_operand.vmem [shape: f32[1,2], index: 27, kind: input, shape index: {}]   ;;  %s4303_s28 = inlined_call_operand.hbm [shape: f32[2,2], index: 28, kind: output, shape index: {}]  }
   0x1   :  { %4314 = sst [smem:[#allocation5_spill]] %s4275_s0 }
   0x2   :  { %4315 = sst [smem:[#allocation6_spill]] %s4276_s1 }
   0x3   :  { %4316 = sst [smem:[#allocation7_spill]] %s4277_s2 }
   0x4   :  { %4317 = sst [smem:[#allocation8_spill]] %s4278_s3 }
   0x5   :  { %4318 = sst [smem:[#allocation9_spill]] %s4279_s4 }
   0x6   :  { %4319 = sst [smem:[#allocation10_spill]] %s4280_s5 }
   0x7   :  { %4320 = sst [smem:[#allocation11_spill]] %s4281_s6 }
   0x8   :  { %4321 = sst [smem:[#allocation12_spill]] %s4282_s7 }
   0x9   :  { %4322 = sst [smem:[#allocation13_spill]] %s4283_s8 }
   0xa   :  { %4323 = sst [smem:[#allocation14_spill]] %s4284_s9 }
   0xb   :  { %4324 = sst [smem:[#allocation15_spill]] %s4285_s10 }
   0xc   :  { %4325 = sst [smem:[#allocation16_spill]] %s4286_s11 }
   0xd   :  { %4326 = sst [smem:[#allocation17_spill]] %s4287_s12 }
   0xe   :  { %s4327_s9 = sld [smem:[#allocation5_spill]]  ;;  %vm170_vm0 = vcmask 1043456   ;;  %v3386_v2 = vmov 0  }
   0xf   :  { %3218 = vset.pattern.permute.xlu1 %v3386_v2  ;;  %3217 = vset.pattern.permute.xlu0 %v3386_v2  ;;  %s4328_s0 = sld [smem:[#allocation8_spill]] }
  0x10   :  { %s4329_s4 = sld [smem:[#allocation6_spill]] }
  0x14   :  { %v92_v0 = vld [vmem:[%s4327_s9 + $0x8] sm:$0xff]  ;;  %v91_v1 = vld [vmem:[%s4327_s9] sm:$0xff] }
  0x15   :  { %v129_v3 = vld [vmem:[%s4328_s0 + $0x60] sm:$0xf]  ;;  %101 = vperm.xlu1 %3218, %v92_v0   ;;  %98 = vperm.xlu0 %3217, %v91_v1   ;;  %v128_v4 = vld [vmem:[%s4328_s0 + $0x58] sm:$0xff]  ;;  %v127_v5 = vld [vmem:[%s4328_s0 + $0x50] sm:$0xff] }
  0x16   :  { %2654 = vmatpush.msk.msra.mxu1 %vm170_vm0, %v129_v3  ;;  %v94_v6 = vld [vmem:[%s4329_s4 + $0x8] sm:$0xff]  ;;  %v93_v7 = vld [vmem:[%s4329_s4] sm:$0xff]  ;;  %v124_v10 = vld [vmem:[%s4328_s0 + $0x38] sm:$0xff] }
  0x17   :  { %v126_v8 = vld [vmem:[%s4328_s0 + $0x48] sm:$0xff]  ;;  %v125_v9 = vld [vmem:[%s4328_s0 + $0x40] sm:$0xff]  ;;  %v123_v11 = vld [vmem:[%s4328_s0 + $0x30] sm:$0xff] }
  0x18   :  { %178 = vmatpush.msra.mxu1 %v128_v4  ;;  %v122_v12 = vld [vmem:[%s4328_s0 + $0x28] sm:$0xff]  ;;  %v121_v13 = vld [vmem:[%s4328_s0 + $0x20] sm:$0xff]  ;;  %v120_v14 = vld [vmem:[%s4328_s0 + $0x18] sm:$0xff] }
  0x1a   :  { %179 = vmatpush.msra.mxu1 %v127_v5 }
  0x1c   :  { %180 = vmatpush.msra.mxu1 %v126_v8 }
  0x1d   :  { %111 = vperm.xlu1 %3218, %v94_v6   ;;  %108 = vperm.xlu0 %3217, %v93_v7  }
  0x1e   :  { %181 = vmatpush.msra.mxu1 %v125_v9 }
  0x20   :  { %182 = vmatpush.msra.mxu1 %v124_v10 }
  0x22   :  { %183 = vmatpush.msra.mxu1 %v123_v11 }
  0x24   :  { %184 = vmatpush.msra.mxu1 %v122_v12 }
  0x26   :  { %185 = vmatpush.msra.mxu1 %v121_v13 }
  0x27   :  { %33 = vsyncpa [#allocation3], 0  ;;  %v119_v15 = vld [vmem:[%s4328_s0 + $0x10] sm:$0xff]  ;;  %v118_v16 = vld [vmem:[%s4328_s0 + $0x8] sm:$0xff]  ;;  %s4330_s7 = sld [smem:[#allocation9_spill]]  ;;  %v95_v21 = vlaneseq  ;;  %vm163_vm1 = vcmask 818176  }
  0x28   :  { %186 = vmatpush.msra.mxu1 %v120_v14  ;;  %v117_v17 = vld [vmem:[%s4328_s0] sm:$0xff]  ;;  %v3387_v25 = vmov 0.0   ;;  %vm133_vm4 = vcmask 195584   ;;  %s4331_s9 = sld [smem:[#allocation10_spill]]  ;;  %vm205_vm7 = vcmask 261120   ;;  %v3388_v43 = vmov 32.0  }
  0x29   :  { %v3597_v22 = vand.u32 127, %v95_v21  ;;  %3262 = vrcp.f32 %v3388_v43  ;;  %s4332_s6 = sld [smem:[#allocation13_spill]]  ;;  %vm377_vm15 = vcmask 64512   ;;  %s3389_s3 = smov [#allocation2]  }
  0x2a   :  { %187 = vmatpush.msra.mxu1 %v119_v15  ;;  %s4333_s29 = sld [smem:[#allocation15_spill]] }
  0x2b   :  { %s4334_s12 = sld [smem:[#allocation17_spill]] }
  0x2c   :  { %188 = vmatpush.msra.mxu1 %v118_v16  ;;  %s4335_s1 = sld [smem:[#allocation11_spill]] }
  0x2d   :  { %v132_v18 = vld [vmem:[%s4330_s7 + $0x10] sm:$0xff]  ;;  %v131_v19 = vld [vmem:[%s4330_s7 + $0x8] sm:$0xff]  ;;  %v130_v20 = vld [vmem:[%s4330_s7] sm:$0xff]  ;;  %s4336_s0 = sld [smem:[#allocation12_spill]] }
  0x2e   :  { %189 = vmatpush.msra.mxu1 %v117_v17  ;;  %153 = vmatpush.msra.mxu0 %v132_v18  ;;  %v3219_v33 = vld [vmem:[%s4331_s9] ss:$0 sm:$0xff]  ;;  %s4337_s10 = sld [smem:[#allocation16_spill]] }
  0x2f   :  { %v3263_v44 = vpop.eup %3262  ;;  %v3142_v60 = vld [vmem:[%s4332_s6 + $0x8] sm:$0xff]  ;;  %v3141_v1 = vld [vmem:[%s4332_s6] sm:$0xff]  ;;  %v3148_v6 = vld [vmem:[%s4332_s6 + $0x18] sm:$0xff]  ;;  %s4338_s4 = sld [smem:[#allocation14_spill]] }
  0x30   :  { %154 = vmatpush.msra.mxu0 %v131_v19  ;;  %v213_v45 = vmul.f32 32.0, %v3263_v44  ;;  %vm217_vm8 = vweird.f32 %v3263_v44  ;;  %v3144_v61 = vld [vmem:[%s4333_s29 + $0x8] sm:$0xff]  ;;  %299 = vmatpush.bf16.msra.mxu2 %v3142_v60  ;;  %v3143_v2 = vld [vmem:[%s4333_s29] sm:$0xff]  ;;  %v3147_v8 = vld [vmem:[%s4332_s6 + $0x10] sm:$0xff]  ;;  %s4339_s30 = sld [smem:[#allocation7_spill]] }
  0x31   :  { %v3146_v62 = vld [vmem:[%s4334_s12 + $0x8] sm:$0xff]  ;;  %333 = vmatpush.bf16.msra.mxu3 %v3144_v61  ;;  %v3145_v3 = vld [vmem:[%s4334_s12] sm:$0xff] }
  0x32   :  { %155 = vmatpush.msra.mxu0 %v130_v20  ;;  %v214_v46 = vsub.f32 1.0, %v213_v45 }
  0x34   :  { %v215_v47 = vmul.f32 %v3263_v44, %v214_v46  ;;  %367 = vmatpush.bf16.msrb.mxu0 %v3146_v62  ;;  %300 = vmatpush.bf16.msra.mxu2 %v3141_v1  ;;  %v3224_v43 = vld [vmem:[%s4337_s10] ss:$0 sm:$0xff] }
  0x35   :  { %334 = vmatpush.bf16.msra.mxu3 %v3143_v2 }
  0x36   :  { %v216_v48 = vadd.f32 %v3263_v44, %v215_v47 }
  0x38   :  { %v3612_v49 = vsel %vm217_vm8, %v3263_v44, %v216_v48  ;;  %368 = vmatpush.bf16.msrb.mxu0 %v3145_v3 }
  0x87   :  { %v99_v23 = vpop.permute.xlu0 %98  ;;  %v102_v24 = vpop.permute.xlu1 %101 }
  0x88   :  { %vm103_vm2 = vcmp.eq.s32.totalorder %v99_v23, %v3597_v22  ;;  %vm104_vm3 = vcmp.eq.s32.totalorder %v102_v24, %v3597_v22  ;;  %v3220_v24 = vld [vmem:[%s4335_s1] ss:$0 sm:$0xff] }
  0x89   :  { %v105_v26 = vsel %vm103_vm2, 1.0, %v3387_v25  ;;  %v106_v27 = vsel %vm104_vm3, 1.0, %v3387_v25 }
  0x8a   :  { %2655 = vmatmul.msk.f32.vlgmr.msra.gmra.mxu1 %vm163_vm1, %v105_v26 }
  0x8f   :  { %v109_v28 = vpop.permute.xlu0 %108  ;;  %v112_v30 = vpop.permute.xlu1 %111 }
  0x90   :  { %vm113_vm5 = vcmp.eq.s32.totalorder %v109_v28, %v3597_v22  ;;  %vm114_vm6 = vcmp.eq.s32.totalorder %v112_v30, %v3597_v22 }
  0x91   :  { %v115_v29 = vsel %vm113_vm5, 1.0, %v3387_v25  ;;  %v116_v31 = vsel %vm114_vm6, 1.0, %v3387_v25 }
  0x92   :  { %2652 = vmatmul.msk.f32.vlgmr.msra.gmra.mxu0 %vm133_vm4, %v115_v29  ;;  %2656 = vmatmul.msk.f32.gmra.mxu1 %vm163_vm1, %v106_v27  ;;  %v3221_v29 = vld [vmem:[%s4336_s0] ss:$0 sm:$0xff]  ;;  %vm402_vm1 = vcmask 130048  }
  0x93   :  { %474 = vmatpush.bf16.msra.mxu0 %v3148_v6  ;;  %v3226_v6 = vld [vmem:[%s4337_s10 + $0x1] ss:$0 sm:$0xff] }
  0x97   :  { %475 = vmatpush.bf16.msra.mxu0 %v3147_v8 }
  0x9a   :  { %2653 = vmatmul.msk.f32.gmra.mxu0 %vm133_vm4, %v116_v31 }
 0x107   :  { %v191_v32 = vpop.f32.mrf.mxu1 }
 0x10f   :  { %v157_v34 = vpop.f32.mrf.mxu0  ;;  %v194_v38 = vpop.f32.mrf.mxu1 }
 0x110   :  { %v192_v35 = vadd.f32 %v191_v32, %v157_v34 }
 0x112   :  { %v201_v36 = vadd.f32 %v3219_v33, %v192_v35 }
 0x114   :  { %v206_v37 = vsel %vm205_vm7, %v201_v36, 0.0 }
 0x115   :  { %207 = vadd.xlane.f32.xlu2 %v206_v37  ;;  %v3222_v37 = vld [vmem:[%s4288_s13] ss:$0 sm:$0xff] }
 0x117   :  { %v160_v39 = vpop.f32.mrf.mxu0 }
 0x118   :  { %v195_v40 = vadd.f32 %v194_v38, %v160_v39 }
 0x11a   :  { %v202_v41 = vadd.f32 %v3219_v33, %v195_v40 }
 0x11c   :  { %v209_v42 = vsel %vm205_vm7, %v202_v41, 0.0 }
 0x11d   :  { %210 = vadd.xlane.f32.xlu2 %v209_v42 }
 0x188   :  { %v208_v50 = vpop.xlane.xlu2 %207 }
 0x189   :  { %v219_v51 = vmul.f32 %v3612_v49, %v208_v50  ;;  %v3150_v50 = vld [vmem:[%s4333_s29 + $0x18] sm:$0xff] }
 0x18b   :  { %v221_v52 = vsub.f32 %v201_v36, %v219_v51 }
 0x18d   :  { %v223_v53 = vmul.f32 %v221_v52, %v221_v52 }
 0x18f   :  { %v225_v54 = vsel %vm205_vm7, %v223_v53, 0.0 }
 0x190   :  { %226 = vadd.xlane.f32.xlu0 %v225_v54  ;;  %v211_v55 = vpop.xlane.xlu2 %210 }
 0x191   :  { %v220_v56 = vmul.f32 %v3612_v49, %v211_v55  ;;  %v3149_v55 = vld [vmem:[%s4333_s29 + $0x10] sm:$0xff] }
 0x193   :  { %v222_v57 = vsub.f32 %v202_v41, %v220_v56 }
 0x195   :  { %v224_v58 = vmul.f32 %v222_v57, %v222_v57 }
 0x197   :  { %v228_v59 = vsel %vm205_vm7, %v224_v58, 0.0 }
 0x198   :  { %229 = vadd.xlane.f32.xlu1 %v228_v59  ;;  %v3688_v59 = vld [vmem:[%s4339_s30] sm:$0xff] }
 0x203   :  { %v227_v63 = vpop.xlane.xlu0 %226 }
 0x204   :  { %v231_v0 = vmul.f32 %v227_v63, %v3612_v49 }
 0x206   :  { %v233_v4 = vadd.f32 1e-05, %v231_v0  ;;  %v3695_v0 = vld [vmem:[%s4339_s30 + $0x8] sm:$0xff] }
 0x208   :  { %3264 = vrsqrt.f32 %v233_v4  ;;  %vm241_vm10 = vweird.f32 %v233_v4 }
 0x20b   :  { %v230_v5 = vpop.xlane.xlu1 %229 }
 0x20c   :  { %v232_v7 = vmul.f32 %v230_v5, %v3612_v49 }
 0x20e   :  { %v3265_v9 = vpop.eup %3264  ;;  %v234_v10 = vadd.f32 1e-05, %v232_v7 }
 0x20f   :  { %v236_v11 = vmul.f32 %v3265_v9, %v233_v4  ;;  %vm242_vm9 = vweird.f32 %v3265_v9 }
 0x210   :  { %3266 = vrsqrt.f32 %v234_v10  ;;  %vm243_vm11 = vmor %vm241_vm10, %vm242_vm9  ;;  %vm251_vm13 = vweird.f32 %v234_v10 }
 0x211   :  { %v237_v12 = vmul.f32 %v3265_v9, %v236_v11  ;;  %v3154_v11 = vld [vmem:[%s4332_s6 + $0x28] sm:$0xff] }
 0x213   :  { %v238_v13 = vmul.f32 0.5, %v237_v12 }
 0x215   :  { %v239_v14 = vsub.f32 1.5, %v238_v13  ;;  %v3225_v13 = vld [vmem:[%s4338_s4 + $0x1] ss:$0 sm:$0xff] }
 0x216   :  { %v3267_v15 = vpop.eup %3266 }
 0x217   :  { %v240_v16 = vmul.f32 %v3265_v9, %v239_v14  ;;  %v246_v17 = vmul.f32 %v3267_v15, %v234_v10  ;;  %vm252_vm12 = vweird.f32 %v3267_v15 }
 0x218   :  { %vm253_vm14 = vmor %vm251_vm13, %vm252_vm12 }
 0x219   :  { %v247_v18 = vmul.f32 %v3267_v15, %v246_v17  ;;  %v244_v19 = vsel %vm243_vm11, %v3265_v9, %v240_v16  ;;  %v3153_v16 = vld [vmem:[%s4332_s6 + $0x20] sm:$0xff] }
 0x21a   :  { %v255_v26 = vmul.f32 %v244_v19, %v221_v52  ;;  %v3223_v52 = vld [vmem:[%s4338_s4] ss:$0 sm:$0xff] }
 0x21b   :  { %v248_v20 = vmul.f32 0.5, %v247_v18 }
 0x21c   :  { %v260_v30 = vmul.f32 %v3220_v24, %v255_v26 }
 0x21d   :  { %v249_v23 = vsub.f32 1.5, %v248_v20 }
 0x21e   :  { %v3650_v33 = vadd.f32 %v3221_v29, %v260_v30 }
 0x21f   :  { %v250_v27 = vmul.f32 %v3267_v15, %v249_v23 }
 0x221   :  { %v254_v28 = vsel %vm253_vm14, %v3267_v15, %v250_v27 }
 0x222   :  { %v256_v31 = vmul.f32 %v254_v28, %v222_v57 }
 0x224   :  { %v261_v32 = vmul.f32 %v3220_v24, %v256_v31 }
 0x226   :  { %v3652_v34 = vadd.f32 %v3221_v29, %v261_v32 }
 0x228   :  { %v3656_v35 = vpack.c.bf16 %v3652_v34, %v3650_v33 }
 0x22a   :  { %2665 = vmatmul.msk.bf16.vlgmr.msra.gmra.mxu2 %vm205_vm7, %v3656_v35  ;;  %2674 = vmatmul.msk.bf16.vlgmr.msra.gmra.mxu3 %vm205_vm7, %v3656_v35 }
 0x22b   :  { %2683 = vmatmul.msk.bf16.vlgmr.msrb.gmra.mxu0 %vm205_vm7, %v3656_v35 }
 0x23b   :  { %2699 = vmatmul.msk.bf16.vlgmr.msra.gmra.mxu0 %vm205_vm7, %v3656_v35 }
 0x2a8   :  { %v370_v36 = vpop.f32.mrf.mxu0 }
 0x2a9   :  { %v371_v41 = vadd.f32 %v3222_v37, %v370_v36 }
 0x2ad   :  { %v336_v38 = vpop.f32.mrf.mxu3  ;;  %v302_v39 = vpop.f32.mrf.mxu2 }
 0x2ae   :  { %v337_v46 = vadd.f32 %v3224_v43, %v336_v38  ;;  %v303_v56 = vadd.f32 %v3223_v52, %v302_v39 }
 0x2b0   :  { %v372_v40 = vpop.f32.mrf.mxu0 }
 0x2b1   :  { %v373_v42 = vadd.f32 %v3222_v37, %v372_v40 }
 0x2b3   :  { %v426_v44 = vpack.c.bf16 %v373_v42, %v371_v41 }
 0x2b5   :  { %437 = vmatpush.bf16.msrb.mxu3 %v426_v44  ;;  %v338_v45 = vpop.f32.mrf.mxu3  ;;  %v304_v51 = vpop.f32.mrf.mxu2  ;;  %v3151_v44 = vld [vmem:[%s4334_s12 + $0x10] sm:$0xff] }
 0x2b6   :  { %v339_v47 = vadd.f32 %v3224_v43, %v338_v45  ;;  %v305_v54 = vadd.f32 %v3223_v52, %v304_v51  ;;  %v3152_v43 = vld [vmem:[%s4334_s12 + $0x18] sm:$0xff] }
 0x2b8   :  { %v376_v48 = vpack.c.bf16 %v339_v47, %v337_v46  ;;  %v375_v57 = vpack.c.bf16 %v305_v54, %v303_v56  ;;  %v477_v5 = vpop.f32.mrf.mxu0 }
 0x2b9   :  { %v478_v17 = vadd.f32 %v3225_v13, %v477_v5  ;;  %546 = vmatpush.bf16.msra.mxu3 %v3152_v43  ;;  %v3162_v43 = vld [vmem:[%s4333_s29 + $0x38] sm:$0xff] }
 0x2ba   :  { %v382_v53 = vsel %vm377_vm15, %v376_v48, 0 }
 0x2bb   :  { %391 = vmatpush.bf16.xpose.msrb.mxu2 %v382_v53 }
 0x2bd   :  { %547 = vmatpush.bf16.msra.mxu3 %v3151_v44 }
 0x2c0   :  { %v479_v12 = vpop.f32.mrf.mxu0 }
 0x2c1   :  { %v480_v15 = vadd.f32 %v3225_v13, %v479_v12 }
 0x2c2   :  { %2684 = vmatmul.msk.bf16.vlgmr.msrb.gmra.mxu2 %vm377_vm15, %v375_v57 }
 0x2c3   :  { %510 = vmatpush.bf16.msra.mxu2 %v3150_v50  ;;  %v554_v18 = vpack.c.bf16 %v480_v15, %v478_v17  ;;  %v3156_v15 = vld [vmem:[%s4333_s29 + $0x28] sm:$0xff] }
 0x2c7   :  { %511 = vmatpush.bf16.msra.mxu2 %v3149_v55 }
 0x2d2   :  { %2713 = vmatmul.msk.bf16.vlgmr.msra.gmra.mxu2 %vm205_vm7, %v3656_v35 }
 0x345   :  { %v393_v58 = vpop.f32.mrf.mxu2 }
 0x346   :  { %v398_v60 = vmul.f32 0.35355338, %v393_v58 }
 0x348   :  { %v400_v61 = vadd.f32 %v398_v60, %v3688_v59 }
 0x34a   :  { %v403_v62 = vsel %vm402_vm1, %v400_v61, -inf }
 0x34b   :  { %404 = vmax.xlane.f32.xlu2 %v403_v62 }
 0x34d   :  { %v395_v63 = vpop.f32.mrf.mxu2 }
 0x34e   :  { %v399_v1 = vmul.f32 0.35355338, %v395_v63 }
 0x350   :  { %v401_v2 = vadd.f32 %v399_v1, %v3695_v0  ;;  %v444_v1 = vld [vmem:[%s4289_s14] sm:$0xf] }
 0x352   :  { %v406_v3 = vsel %vm402_vm1, %v401_v2, -inf }
 0x353   :  { %407 = vmax.xlane.f32.xlu2 %v406_v3 }
 0x355   :  { %v513_v4 = vpop.f32.mrf.mxu2 }
 0x356   :  { %v514_v8 = vadd.f32 %v3226_v6, %v513_v4 }
 0x35d   :  { %v515_v7 = vpop.f32.mrf.mxu2 }
 0x35e   :  { %v516_v9 = vadd.f32 %v3226_v6, %v515_v7 }
 0x360   :  { %v555_v10 = vpack.c.bf16 %v516_v9, %v514_v8  ;;  %v3228_v9 = vld [vmem:[%s4288_s13 + $0x1] ss:$0 sm:$0xff] }
 0x362   :  { %v560_v14 = vsel %vm377_vm15, %v555_v10, 0 }
 0x363   :  { %569 = vmatpush.bf16.xpose.msrb.mxu1 %v560_v14 }
 0x36a   :  { %2728 = vmatmul.msk.bf16.vlgmr.msrb.gmra.mxu1 %vm377_vm15, %v554_v18 }
 0x36b   :  { %692 = vmatpush.bf16.msra.mxu1 %v3154_v11 }
 0x36f   :  { %693 = vmatpush.bf16.msra.mxu1 %v3153_v16 }
 0x37a   :  { %2746 = vmatmul.msk.bf16.vlgmr.msra.gmra.mxu1 %vm205_vm7, %v3656_v35 }
 0x3be   :  { %v405_v19 = vpop.xlane.xlu2 %404 }
 0x3bf   :  { %v409_v20 = vsub.f32 %v400_v61, %v405_v19 }
 0x3c1   :  { %v411_v23 = vmul.f32 1.442695, %v409_v20  ;;  %v3155_v20 = vld [vmem:[%s4333_s29 + $0x20] sm:$0xff] }
 0x3c3   :  { %3268 = vpow2.f32 %v411_v23  ;;  %v2730_v23 = vld [vmem:[%s4289_s14 + $0x4] sm:$0xf] }
 0x3c6   :  { %v408_v24 = vpop.xlane.xlu2 %407 }
 0x3c7   :  { %v410_v26 = vsub.f32 %v401_v2, %v408_v24  ;;  %v648_v2 = vsel %vm170_vm0, %v444_v1, 0  ;;  %v628_v24 = vsel %vm170_vm0, %v2730_v23, 0 }
 0x3c8   :  { %637 = vmatpush.bf16.msrb.mxu2 %v628_v24 }
 0x3c9   :  { %v3269_v27 = vpop.eup %3268  ;;  %v413_v28 = vmul.f32 1.442695, %v410_v26  ;;  %v3158_v26 = vld [vmem:[%s4334_s12 + $0x28] sm:$0xff] }
 0x3ca   :  { %v415_v29 = vsel %vm402_vm1, %v3269_v27, 0.0 }
 0x3cb   :  { %3270 = vpow2.f32 %v413_v28  ;;  %416 = vadd.xlane.f32.xlu2 %v415_v29 }
 0x3cc   :  { %764 = vmatpush.bf16.msra.mxu2 %v3158_v26 }
 0x3d1   :  { %v3271_v30 = vpop.eup %3270 }
 0x3d2   :  { %v418_v31 = vsel %vm402_vm1, %v3271_v30, 0.0 }
 0x3d3   :  { %419 = vadd.xlane.f32.xlu2 %v418_v31 }
 0x3e7   :  { %v571_v32 = vpop.f32.mrf.mxu1 }
 0x3e8   :  { %v576_v36 = vmul.f32 0.35355338, %v571_v32  ;;  %v3159_v32 = vld [vmem:[%s4332_s6 + $0x30] sm:$0xff] }
 0x3ea   :  { %v578_v37 = vadd.f32 %v576_v36, %v3688_v59 }
 0x3ec   :  { %v580_v38 = vsel %vm402_vm1, %v578_v37, -inf }
 0x3ed   :  { %581 = vmax.xlane.f32.xlu2 %v580_v38  ;;  %v3229_v38 = vld [vmem:[%s4337_s10 + $0x2] ss:$0 sm:$0xff] }
 0x3ef   :  { %v573_v39 = vpop.f32.mrf.mxu1 }
 0x3f0   :  { %v577_v40 = vmul.f32 0.35355338, %v573_v39 }
 0x3f2   :  { %v579_v41 = vadd.f32 %v577_v40, %v3695_v0 }
 0x3f4   :  { %v583_v42 = vsel %vm402_vm1, %v579_v41, -inf }
 0x3f5   :  { %584 = vmax.xlane.f32.xlu2 %v583_v42 }
 0x43e   :  { %v417_v45 = vpop.xlane.xlu2 %416 }
 0x43f   :  { %3272 = vrcp.f32 %v417_v45  ;;  %v3227_v45 = vld [vmem:[%s4338_s4 + $0x2] ss:$0 sm:$0xff] }
 0x445   :  { %v3273_v47 = vpop.eup %3272 }
 0x446   :  { %v420_v46 = vpop.xlane.xlu2 %419  ;;  %v423_v50 = vmul.f32 %v3273_v47, %v3269_v27  ;;  %v3157_v27 = vld [vmem:[%s4334_s12 + $0x20] sm:$0xff] }
 0x447   :  { %3274 = vrcp.f32 %v420_v46  ;;  %765 = vmatpush.bf16.msra.mxu2 %v3157_v27 }
 0x44d   :  { %v3275_v48 = vpop.eup %3274 }
 0x44e   :  { %v424_v51 = vmul.f32 %v3275_v48, %v3271_v30  ;;  %v3160_v30 = vld [vmem:[%s4332_s6 + $0x38] sm:$0xff]  ;;  %v3161_v48 = vld [vmem:[%s4333_s29 + $0x30] sm:$0xff] }
 0x450   :  { %v425_v52 = vpack.c.bf16 %v424_v51, %v423_v50 }
 0x452   :  { %2685 = vmatmul.msk.bf16.vlgmr.msrb.gmra.mxu3 %vm402_vm1, %v425_v52 }
 0x453   :  { %657 = vmatpush.bf16.msrb.mxu3 %v648_v2 }
 0x460   :  { %v582_v53 = vpop.xlane.xlu2 %581 }
 0x461   :  { %v586_v54 = vsub.f32 %v578_v37, %v582_v53  ;;  %v695_v37 = vpop.f32.mrf.mxu1 }
 0x462   :  { %2727 = vmatmul.msk.bf16.vlgmr.msra.gmra.mxu3 %vm205_vm7, %v3656_v35  ;;  %v696_v50 = vadd.f32 %v3227_v45, %v695_v37 }
 0x463   :  { %v588_v55 = vmul.f32 1.442695, %v586_v54 }
 0x465   :  { %3276 = vpow2.f32 %v588_v55 }
 0x468   :  { %v585_v56 = vpop.xlane.xlu2 %584 }
 0x469   :  { %v587_v57 = vsub.f32 %v579_v41, %v585_v56  ;;  %v697_v44 = vpop.f32.mrf.mxu1 }
 0x46a   :  { %v698_v47 = vadd.f32 %v3227_v45, %v697_v44 }
 0x46b   :  { %v3277_v58 = vpop.eup %3276  ;;  %v590_v60 = vmul.f32 1.442695, %v587_v57 }
 0x46c   :  { %v592_v61 = vsel %vm402_vm1, %v3277_v58, 0.0  ;;  %v772_v51 = vpack.c.bf16 %v698_v47, %v696_v50  ;;  %v3231_v50 = vld [vmem:[%s4338_s4 + $0x3] ss:$0 sm:$0xff] }
 0x46d   :  { %3278 = vpow2.f32 %v590_v60  ;;  %593 = vadd.xlane.f32.xlu0 %v592_v61  ;;  %v2777_v60 = vld [vmem:[%s4289_s14 + $0x8] sm:$0xf] }
 0x46e   :  { %v846_v61 = vsel %vm170_vm0, %v2777_v60, 0 }
 0x473   :  { %v3279_v62 = vpop.eup %3278 }
 0x474   :  { %v595_v63 = vsel %vm402_vm1, %v3279_v62, 0.0 }
 0x475   :  { %596 = vadd.xlane.f32.xlu1 %v595_v63 }
 0x4d5   :  { %v439_v3 = vpop.f32.mrf.mxu3 }
 0x4dd   :  { %v441_v4 = vpop.f32.mrf.mxu3 }
 0x4de   :  { %v445_v5 = vpack.c.bf16 %v441_v4, %v439_v3 }
 0x4e0   :  { %2732 = vmatmul.msk.bf16.vlgmr.msrb.gmra.mxu3 %vm377_vm15, %v445_v5  ;;  %v594_v6 = vpop.xlane.xlu0 %593 }
 0x4e1   :  { %3280 = vrcp.f32 %v594_v6 }
 0x4e5   :  { %v549_v7 = vpop.f32.mrf.mxu3 }
 0x4e6   :  { %v550_v12 = vadd.f32 %v3228_v9, %v549_v7 }
 0x4e7   :  { %v3281_v10 = vpop.eup %3280 }
 0x4e8   :  { %v597_v8 = vpop.xlane.xlu1 %596  ;;  %v600_v16 = vmul.f32 %v3281_v10, %v3277_v58  ;;  %v3230_v58 = vld [vmem:[%s4288_s13 + $0x2] ss:$0 sm:$0xff] }
 0x4e9   :  { %3282 = vrcp.f32 %v597_v8 }
 0x4ed   :  { %v551_v11 = vpop.f32.mrf.mxu3 }
 0x4ee   :  { %v552_v13 = vadd.f32 %v3228_v9, %v551_v11 }
 0x4ef   :  { %v3283_v14 = vpop.eup %3282 }
 0x4f0   :  { %v601_v17 = vmul.f32 %v3283_v14, %v3279_v62  ;;  %v603_v18 = vpack.c.bf16 %v552_v13, %v550_v12  ;;  %v3232_v12 = vld [vmem:[%s4337_s10 + $0x3] ss:$0 sm:$0xff] }
 0x4f2   :  { %v602_v19 = vpack.c.bf16 %v601_v17, %v600_v16  ;;  %614 = vmatpush.bf16.msrb.mxu0 %v603_v18 }
 0x4f5   :  { %2729 = vmatmul.msk.bf16.vlgmr.msrb.gmra.mxu0 %vm402_vm1, %v602_v19 }
 0x4f6   :  { %728 = vmatpush.bf16.msra.mxu0 %v3156_v15 }
 0x4fa   :  { %729 = vmatpush.bf16.msra.mxu0 %v3155_v20 }
 0x4fe   :  { %855 = vmatpush.bf16.msrb.mxu0 %v846_v61 }
 0x505   :  { %2760 = vmatmul.msk.bf16.vlgmr.msra.gmra.mxu0 %vm205_vm7, %v3656_v35 }
 0x563   :  { %v3786_v52 = vpop.f32.mrf.mxu3 }
 0x56b   :  { %v661_v54 = vpop.f32.mrf.mxu3 }
 0x572   :  { %v616_v28 = vpop.f32.mrf.mxu0 }
 0x57a   :  { %v618_v29 = vpop.f32.mrf.mxu0 }
 0x57b   :  { %v623_v31 = vpack.c.bf16 %v618_v29, %v616_v28 }
 0x57d   :  { %2731 = vmatmul.msk.bf16.vlgmr.msrb.gmra.mxu2 %vm377_vm15, %v623_v31  ;;  %v3164_v31 = vld [vmem:[%s4334_s12 + $0x38] sm:$0xff] }
 0x57e   :  { %892 = vmatpush.bf16.msrb.mxu2 %v3160_v30 }
 0x582   :  { %v731_v36 = vpop.f32.mrf.mxu0  ;;  %893 = vmatpush.bf16.msrb.mxu2 %v3159_v32  ;;  %v3163_v32 = vld [vmem:[%s4334_s12 + $0x30] sm:$0xff] }
 0x583   :  { %v732_v40 = vadd.f32 %v3229_v38, %v731_v36 }
 0x58a   :  { %v733_v39 = vpop.f32.mrf.mxu0 }
 0x58b   :  { %v734_v41 = vadd.f32 %v3229_v38, %v733_v39 }
 0x58d   :  { %v773_v42 = vpack.c.bf16 %v734_v41, %v732_v40  ;;  %2774 = vmatmul.msk.bf16.vlgmr.msra.gmra.mxu2 %vm205_vm7, %v3656_v35 }
 0x58f   :  { %v778_v46 = vsel %vm377_vm15, %v773_v42, 0 }
 0x590   :  { %787 = vmatpush.bf16.xpose.msra.mxu3 %v778_v46 }
 0x597   :  { %2775 = vmatmul.msk.bf16.vlgmr.msra.gmra.mxu3 %vm377_vm15, %v772_v51 }
 0x598   :  { %928 = vmatpush.bf16.msrb.mxu3 %v3162_v43 }
 0x59c   :  { %929 = vmatpush.bf16.msrb.mxu3 %v3161_v48 }
 0x59d   :  { %2792 = vmatmul.msk.bf16.vlgmr.msrb.gmra.mxu2 %vm205_vm7, %v3656_v35 }
 0x5a7   :  { %2806 = vmatmul.msk.bf16.vlgmr.msrb.gmra.mxu3 %vm205_vm7, %v3656_v35 }
 0x600   :  { %v3788_v53 = vpop.f32.mrf.mxu2 }
 0x608   :  { %v641_v55 = vpop.f32.mrf.mxu2 }
 0x609   :  { %v3790_v56 = vadd.f32 %v661_v54, %v641_v55  ;;  %v3233_v54 = vld [vmem:[%s4288_s13 + $0x3] ss:$0 sm:$0xff] }
 0x610   :  { %v767_v57 = vpop.f32.mrf.mxu2 }
 0x611   :  { %v768_v63 = vadd.f32 %v3230_v58, %v767_v57 }
 0x618   :  { %v769_v62 = vpop.f32.mrf.mxu2 }
 0x619   :  { %v770_v1 = vadd.f32 %v3230_v58, %v769_v62  ;;  %v660_v62 = vadd.f32 %v3786_v52, %v3788_v53 }
 0x61a   :  { %v789_v2 = vpop.f32.mrf.mxu3 }
 0x61b   :  { %v821_v3 = vpack.c.bf16 %v770_v1, %v768_v63  ;;  %v794_v4 = vmul.f32 0.35355338, %v789_v2 }
 0x61d   :  { %832 = vmatpush.bf16.msrb.mxu1 %v821_v3  ;;  %v796_v5 = vadd.f32 %v794_v4, %v3688_v59 }
 0x61f   :  { %v798_v6 = vsel %vm402_vm1, %v796_v5, -inf }
 0x620   :  { %799 = vmax.xlane.f32.xlu2 %v798_v6  ;;  %v895_v44 = vpop.f32.mrf.mxu2 }
 0x621   :  { %964 = vmatpush.bf16.msra.mxu1 %v3164_v31  ;;  %v896_v55 = vadd.f32 %v3231_v50, %v895_v44 }
 0x622   :  { %v791_v7 = vpop.f32.mrf.mxu3 }
 0x623   :  { %v795_v8 = vmul.f32 0.35355338, %v791_v7 }
 0x625   :  { %v797_v9 = vadd.f32 %v795_v8, %v3695_v0  ;;  %965 = vmatpush.bf16.msra.mxu1 %v3163_v32  ;;  %v3234_v32 = vld [vmem:[%s4290_s15] ss:$0 sm:$0xff] }
 0x627   :  { %v801_v10 = vsel %vm402_vm1, %v797_v9, -inf }
 0x628   :  { %802 = vmax.xlane.f32.xlu0 %v801_v10  ;;  %v897_v48 = vpop.f32.mrf.mxu2 }
 0x629   :  { %v898_v51 = vadd.f32 %v3231_v50, %v897_v48 }
 0x62a   :  { %v931_v11 = vpop.f32.mrf.mxu3 }
 0x62b   :  { %v932_v14 = vadd.f32 %v3232_v12, %v931_v11 }
 0x632   :  { %v933_v13 = vpop.f32.mrf.mxu3 }
 0x633   :  { %v934_v15 = vadd.f32 %v3232_v12, %v933_v13 }
 0x635   :  { %v973_v16 = vpack.c.bf16 %v934_v15, %v932_v14 }
 0x637   :  { %v978_v17 = vsel %vm377_vm15, %v973_v16, 0 }
 0x638   :  { %987 = vmatpush.bf16.xpose.msra.mxu0 %v978_v17 }
 0x693   :  { %v800_v18 = vpop.xlane.xlu2 %799 }
 0x694   :  { %v804_v19 = vsub.f32 %v796_v5, %v800_v18 }
 0x696   :  { %v806_v20 = vmul.f32 1.442695, %v804_v19 }
 0x698   :  { %3284 = vpow2.f32 %v806_v20 }
 0x69b   :  { %v803_v23 = vpop.xlane.xlu0 %802 }
 0x69c   :  { %v805_v24 = vsub.f32 %v797_v9, %v803_v23 }
 0x69e   :  { %v3285_v26 = vpop.eup %3284  ;;  %v808_v27 = vmul.f32 1.442695, %v805_v24 }
 0x69f   :  { %v810_v28 = vsel %vm402_vm1, %v3285_v26, 0.0 }
 0x6a0   :  { %3286 = vpow2.f32 %v808_v27  ;;  %811 = vadd.xlane.f32.xlu1 %v810_v28  ;;  %v2823_v27 = vld [vmem:[%s4289_s14 + $0xc] sm:$0xf] }
 0x6a1   :  { %v1046_v28 = vsel %vm170_vm0, %v2823_v27, 0 }
 0x6a2   :  { %1055 = vmatpush.bf16.msra.mxu3 %v1046_v28  ;;  %v3174_v28 = vld [vmem:[%s4295_s20 + $0x38] sm:$0xff] }
 0x6a6   :  { %v3287_v29 = vpop.eup %3286 }
 0x6a7   :  { %v813_v30 = vsel %vm402_vm1, %v3287_v29, 0.0 }
 0x6a8   :  { %814 = vadd.xlane.f32.xlu2 %v813_v30 }
 0x713   :  { %v812_v36 = vpop.xlane.xlu1 %811 }
 0x714   :  { %3288 = vrcp.f32 %v812_v36 }
 0x71a   :  { %v3289_v38 = vpop.eup %3288 }
 0x71b   :  { %v815_v37 = vpop.xlane.xlu2 %814  ;;  %v818_v40 = vmul.f32 %v3289_v38, %v3285_v26 }
 0x71c   :  { %3290 = vrcp.f32 %v815_v37 }
 0x722   :  { %v3291_v39 = vpop.eup %3290 }
 0x723   :  { %v819_v41 = vmul.f32 %v3291_v39, %v3287_v29 }
 0x725   :  { %v820_v42 = vpack.c.bf16 %v819_v41, %v818_v40 }
 0x727   :  { %2776 = vmatmul.msk.bf16.vlgmr.msrb.gmra.mxu1 %vm402_vm1, %v820_v42 }
 0x737   :  { %2820 = vmatmul.msk.bf16.vlgmr.msra.gmra.mxu1 %vm205_vm7, %v3656_v35  ;;  %v972_v35 = vpack.c.bf16 %v898_v51, %v896_v55 }
 0x7a4   :  { %v834_v43 = vpop.f32.mrf.mxu1 }
 0x7ac   :  { %v836_v45 = vpop.f32.mrf.mxu1 }
 0x7ad   :  { %v841_v46 = vpack.c.bf16 %v836_v45, %v834_v43 }
 0x7af   :  { %2778 = vmatmul.msk.bf16.vlgmr.msrb.gmra.mxu0 %vm377_vm15, %v841_v46 }
 0x7b0   :  { %1321 = vmatpush.bf16.msrb.mxu0 %v3174_v28 }
 0x7b4   :  { %v967_v47 = vpop.f32.mrf.mxu1 }
 0x7b5   :  { %v968_v58 = vadd.f32 %v3233_v54, %v967_v47 }
 0x7bc   :  { %v969_v57 = vpop.f32.mrf.mxu1 }
 0x7bd   :  { %v970_v60 = vadd.f32 %v3233_v54, %v969_v57 }
 0x7bf   :  { %v1021_v61 = vpack.c.bf16 %v970_v60, %v968_v58  ;;  %2821 = vmatmul.msk.bf16.vlgmr.msra.gmra.mxu0 %vm377_vm15, %v972_v35 }
 0x7c1   :  { %1032 = vmatpush.bf16.msra.mxu2 %v1021_v61 }
 0x82c   :  { %v857_v63 = vpop.f32.mrf.mxu0 }
 0x82d   :  { %v862_v1 = vadd.f32 %v857_v63, %v660_v62  ;;  %v3165_v62 = vld [vmem:[%s4293_s18] sm:$0xff] }
 0x834   :  { %v859_v2 = vpop.f32.mrf.mxu0 }
 0x835   :  { %v863_v3 = vadd.f32 %v859_v2, %v3790_v56 }
 0x83c   :  { %v989_v4 = vpop.f32.mrf.mxu0 }
 0x83d   :  { %v994_v5 = vmul.f32 0.35355338, %v989_v4 }
 0x83f   :  { %v996_v6 = vadd.f32 %v994_v5, %v3688_v59 }
 0x841   :  { %v998_v7 = vsel %vm402_vm1, %v996_v6, -inf }
 0x842   :  { %999 = vmax.xlane.f32.xlu0 %v998_v7 }
 0x844   :  { %v991_v8 = vpop.f32.mrf.mxu0 }
 0x845   :  { %v995_v9 = vmul.f32 0.35355338, %v991_v8 }
 0x847   :  { %v997_v10 = vadd.f32 %v995_v9, %v3695_v0 }
 0x849   :  { %v1001_v11 = vsel %vm402_vm1, %v997_v10, -inf }
 0x84a   :  { %1002 = vmax.xlane.f32.xlu1 %v1001_v11 }
 0x8b5   :  { %v1000_v52 = vpop.xlane.xlu0 %999 }
 0x8b6   :  { %v1004_v53 = vsub.f32 %v996_v6, %v1000_v52 }
 0x8b8   :  { %v1006_v12 = vmul.f32 1.442695, %v1004_v53 }
 0x8ba   :  { %3292 = vpow2.f32 %v1006_v12 }
 0x8bd   :  { %v1003_v13 = vpop.xlane.xlu1 %1002 }
 0x8be   :  { %v1005_v56 = vsub.f32 %v997_v10, %v1003_v13  ;;  %v3235_v13 = vld [vmem:[%s4291_s16] ss:$0 sm:$0xff] }
 0x8c0   :  { %v3293_v14 = vpop.eup %3292  ;;  %v1008_v15 = vmul.f32 1.442695, %v1005_v56 }
 0x8c1   :  { %v1010_v59 = vsel %vm402_vm1, %v3293_v14, 0.0 }
 0x8c2   :  { %3294 = vpow2.f32 %v1008_v15  ;;  %1011 = vadd.xlane.f32.xlu2 %v1010_v59  ;;  %v3236_v59 = vld [vmem:[%s4292_s17] ss:$0 sm:$0xff] }
 0x8c8   :  { %v3295_v16 = vpop.eup %3294 }
 0x8c9   :  { %v1013_v17 = vsel %vm402_vm1, %v3295_v16, 0.0 }
 0x8ca   :  { %1014 = vadd.xlane.f32.xlu0 %v1013_v17 }
 0x935   :  { %v1012_v0 = vpop.xlane.xlu2 %1011 }
 0x936   :  { %3296 = vrcp.f32 %v1012_v0 }
 0x93c   :  { %v3297_v19 = vpop.eup %3296 }
 0x93d   :  { %v1015_v18 = vpop.xlane.xlu0 %1014  ;;  %v1018_v23 = vmul.f32 %v3297_v19, %v3293_v14 }
 0x93e   :  { %3298 = vrcp.f32 %v1015_v18 }
 0x944   :  { %v3299_v20 = vpop.eup %3298 }
 0x945   :  { %v1019_v24 = vmul.f32 %v3299_v20, %v3295_v16 }
 0x947   :  { %v1020_v26 = vpack.c.bf16 %v1019_v24, %v1018_v23  ;;  %v3237_v23 = vld [vmem:[%s4294_s19] ss:$0 sm:$0xff] }
 0x949   :  { %2822 = vmatmul.msk.bf16.vlgmr.msra.gmra.mxu2 %vm402_vm1, %v1020_v26 }
 0x9cc   :  { %v1034_v29 = vpop.f32.mrf.mxu2 }
 0x9d4   :  { %v1036_v30 = vpop.f32.mrf.mxu2 }
 0x9d5   :  { %v1041_v31 = vpack.c.bf16 %v1036_v30, %v1034_v29 }
 0x9d7   :  { %2824 = vmatmul.msk.bf16.vlgmr.msra.gmra.mxu3 %vm377_vm15, %v1041_v31  ;;  %v3173_v31 = vld [vmem:[%s4295_s20 + $0x30] sm:$0xff] }
 0x9d8   :  { %1322 = vmatpush.bf16.msrb.mxu0 %v3173_v31 }
 0xa5a   :  { %v1057_v36 = vpop.f32.mrf.mxu3 }
 0xa5b   :  { %v1062_v37 = vadd.f32 %v1057_v36, %v862_v1 }
 0xa5d   :  { %v1068_v38 = vadd.f32 %v3234_v32, %v1062_v37 }
 0xa5f   :  { %v1070_v39 = vadd.f32 %v1068_v38, %v3650_v33 }
 0xa61   :  { %v1074_v40 = vsel %vm205_vm7, %v1070_v39, 0.0 }
 0xa62   :  { %1075 = vadd.xlane.f32.xlu1 %v1074_v40  ;;  %v1059_v41 = vpop.f32.mrf.mxu3 }
 0xa63   :  { %v1063_v42 = vadd.f32 %v1059_v41, %v863_v3 }
 0xa65   :  { %v1069_v43 = vadd.f32 %v3234_v32, %v1063_v42 }
 0xa67   :  { %v1071_v44 = vadd.f32 %v1069_v43, %v3652_v34  ;;  %v3166_v34 = vld [vmem:[%s4293_s18 + $0x8] sm:$0xff] }
 0xa68   :  { %1158 = vmatpush.bf16.msrb.mxu1 %v3166_v34 }
 0xa69   :  { %v1077_v45 = vsel %vm205_vm7, %v1071_v44, 0.0 }
 0xa6a   :  { %1078 = vadd.xlane.f32.xlu2 %v1077_v45 }
 0xa6c   :  { %1159 = vmatpush.bf16.msrb.mxu1 %v3165_v62 }
 0xad5   :  { %v1076_v46 = vpop.xlane.xlu1 %1075 }
 0xad6   :  { %v1080_v47 = vmul.f32 %v1076_v46, %v3612_v49 }
 0xad8   :  { %v1082_v48 = vsub.f32 %v1070_v39, %v1080_v47  ;;  %v3172_v39 = vld [vmem:[%s4295_s20 + $0x28] sm:$0xff] }
 0xad9   :  { %1323 = vmatpush.bf16.msrb.mxu0 %v3172_v39 }
 0xada   :  { %v1084_v50 = vmul.f32 %v1082_v48, %v1082_v48 }
 0xadc   :  { %v1086_v51 = vsel %vm205_vm7, %v1084_v50, 0.0  ;;  %v3170_v50 = vld [vmem:[%s4295_s20 + $0x18] sm:$0xff] }
 0xadd   :  { %1087 = vadd.xlane.f32.xlu0 %v1086_v51  ;;  %v1079_v33 = vpop.xlane.xlu2 %1078 }
 0xade   :  { %v1081_v54 = vmul.f32 %v1079_v33, %v3612_v49 }
 0xae0   :  { %v1083_v55 = vsub.f32 %v1071_v44, %v1081_v54  ;;  %v3171_v44 = vld [vmem:[%s4295_s20 + $0x20] sm:$0xff] }
 0xae1   :  { %1324 = vmatpush.bf16.msrb.mxu0 %v3171_v44 }
 0xae2   :  { %v1085_v57 = vmul.f32 %v1083_v55, %v1083_v55 }
 0xae4   :  { %v1089_v35 = vsel %vm205_vm7, %v1085_v57, 0.0 }
 0xae5   :  { %1090 = vadd.xlane.f32.xlu1 %v1089_v35  ;;  %1325 = vmatpush.bf16.msrb.mxu0 %v3170_v50  ;;  %v3169_v35 = vld [vmem:[%s4295_s20 + $0x10] sm:$0xff] }
 0xae9   :  { %1326 = vmatpush.bf16.msrb.mxu0 %v3169_v35 }
 0xb50   :  { %v1088_v58 = vpop.xlane.xlu0 %1087 }
 0xb51   :  { %v1092_v60 = vmul.f32 %v1088_v58, %v3612_v49 }
 0xb53   :  { %v1094_v61 = vadd.f32 1e-05, %v1092_v60 }
 0xb55   :  { %3300 = vrsqrt.f32 %v1094_v61  ;;  %vm1102_vm3 = vweird.f32 %v1094_v61 }
 0xb58   :  { %v1091_v63 = vpop.xlane.xlu1 %1090 }
 0xb59   :  { %v1093_v1 = vmul.f32 %v1091_v63, %v3612_v49 }
 0xb5b   :  { %v3301_v2 = vpop.eup %3300  ;;  %v1095_v3 = vadd.f32 1e-05, %v1093_v1  ;;  %v3168_v1 = vld [vmem:[%s4295_s20 + $0x8] sm:$0xff] }
 0xb5c   :  { %v1097_v4 = vmul.f32 %v3301_v2, %v1094_v61  ;;  %vm1103_vm2 = vweird.f32 %v3301_v2  ;;  %1327 = vmatpush.bf16.msrb.mxu0 %v3168_v1  ;;  %v3238_v1 = vld [vmem:[%s4296_s21] ss:$0 sm:$0xff] }
 0xb5d   :  { %3302 = vrsqrt.f32 %v1095_v3  ;;  %vm1104_vm4 = vmor %vm1102_vm3, %vm1103_vm2  ;;  %vm1112_vm6 = vweird.f32 %v1095_v3 }
 0xb5e   :  { %v1098_v5 = vmul.f32 %v3301_v2, %v1097_v4 }
 0xb60   :  { %v1099_v6 = vmul.f32 0.5, %v1098_v5 }
 0xb62   :  { %v1100_v7 = vsub.f32 1.5, %v1099_v6 }
 0xb63   :  { %v3303_v8 = vpop.eup %3302 }
 0xb64   :  { %v1101_v9 = vmul.f32 %v3301_v2, %v1100_v7  ;;  %v1107_v10 = vmul.f32 %v3303_v8, %v1095_v3  ;;  %vm1113_vm5 = vweird.f32 %v3303_v8 }
 0xb65   :  { %vm1114_vm8 = vmor %vm1112_vm6, %vm1113_vm5 }
 0xb66   :  { %v1108_v11 = vmul.f32 %v3303_v8, %v1107_v10  ;;  %v1105_v52 = vsel %vm1104_vm4, %v3301_v2, %v1101_v9 }
 0xb67   :  { %v1116_v56 = vmul.f32 %v1105_v52, %v1082_v48 }
 0xb68   :  { %v1109_v53 = vmul.f32 0.5, %v1108_v11 }
 0xb69   :  { %v1121_v16 = vmul.f32 %v3235_v13, %v1116_v56 }
 0xb6a   :  { %v1110_v12 = vsub.f32 1.5, %v1109_v53 }
 0xb6b   :  { %v3866_v18 = vadd.f32 %v3236_v59, %v1121_v16 }
 0xb6c   :  { %v1111_v14 = vmul.f32 %v3303_v8, %v1110_v12 }
 0xb6e   :  { %v1115_v15 = vsel %vm1114_vm8, %v3303_v8, %v1111_v14  ;;  %v3167_v8 = vld [vmem:[%s4295_s20] sm:$0xff] }
 0xb6f   :  { %v1117_v17 = vmul.f32 %v1115_v15, %v1083_v55  ;;  %1328 = vmatpush.bf16.msrb.mxu0 %v3167_v8 }
 0xb71   :  { %v1122_v0 = vmul.f32 %v3235_v13, %v1117_v17 }
 0xb73   :  { %v3868_v19 = vadd.f32 %v3236_v59, %v1122_v0 }
 0xb75   :  { %v1128_v20 = vpack.c.bf16 %v3868_v19, %v3866_v18 }
 0xb77   :  { %2833 = vmatmul.msk.bf16.vlgmr.msrb.gmra.mxu1 %vm205_vm7, %v1128_v20 }
 0xbf4   :  { %v1161_v24 = vpop.f32.mrf.mxu1 }
 0xbf5   :  { %v3876_v26 = vadd.f32 %v3237_v23, %v1161_v24 }
 0xbf7   :  { %v1168_v27 = vmul.f32 0.70710677, %v3876_v26 }
 0xbf9   :  { %v3882_v29 = vclamps-f32 %v1168_v27, 4.0 }
 0xbfb   :  { %v1174_v30 = vmul.f32 %v3882_v29, %v3882_v29 }
 0xbfc   :  { %v1163_v32 = vpop.f32.mrf.mxu1 }
 0xbfd   :  { %v1194_v36 = vmul.f32 -1.1791603e-07, %v1174_v30  ;;  %v3889_v37 = vadd.f32 %v3237_v23, %v1163_v32  ;;  %v1176_v51 = vmul.f32 0.00022905065, %v1174_v30 }
 0xbff   :  { %v1196_v38 = vadd.f32 2.3547966e-05, %v1194_v36  ;;  %v1169_v40 = vmul.f32 0.70710677, %v3889_v37  ;;  %v1178_v34 = vadd.f32 0.003408291, %v1176_v51 }
 0xc01   :  { %v1198_v41 = vmul.f32 %v1196_v38, %v1174_v30  ;;  %v3895_v42 = vclamps-f32 %v1169_v40, 4.0  ;;  %v1180_v2 = vmul.f32 %v1178_v34, %v1174_v30 }
 0xc03   :  { %v1200_v43 = vadd.f32 0.0010179626, %v1198_v41  ;;  %v1175_v45 = vmul.f32 %v3895_v42, %v3895_v42  ;;  %v1182_v9 = vadd.f32 0.050955694, %v1180_v2 }
 0xc05   :  { %v1202_v46 = vmul.f32 %v1200_v43, %v1174_v30  ;;  %v1195_v47 = vmul.f32 -1.1791603e-07, %v1175_v45  ;;  %v1177_v61 = vmul.f32 0.00022905065, %v1175_v45  ;;  %v1184_v53 = vmul.f32 %v1182_v9, %v1174_v30 }
 0xc07   :  { %v1204_v48 = vadd.f32 0.01407047, %v1202_v46  ;;  %v1197_v33 = vadd.f32 2.3547966e-05, %v1195_v47  ;;  %v1179_v5 = vadd.f32 0.003408291, %v1177_v61 }
 0xc08   :  { %v1186_v15 = vadd.f32 0.18520832, %v1184_v53 }
 0xc09   :  { %v1206_v54 = vmul.f32 %v1204_v48, %v1174_v30  ;;  %v1199_v55 = vmul.f32 %v1197_v33, %v1175_v45  ;;  %v1181_v11 = vmul.f32 %v1179_v5, %v1175_v45 }
 0xc0a   :  { %v1188_v20 = vmul.f32 %v1186_v15, %v1174_v30 }
 0xc0b   :  { %v1208_v57 = vadd.f32 0.11098505, %v1206_v54  ;;  %v1201_v58 = vadd.f32 0.0010179626, %v1199_v55  ;;  %v1183_v13 = vadd.f32 0.050955694, %v1181_v11 }
 0xc0c   :  { %v1190_v36 = vadd.f32 1.1283791, %v1188_v20  ;;  %v3177_v20 = vld [vmem:[%s4333_s29 + $0x40] sm:$0xff] }
 0xc0d   :  { %v1210_v60 = vmul.f32 %v1208_v57, %v1174_v30  ;;  %v1203_v62 = vmul.f32 %v1201_v58, %v1175_v45  ;;  %v1185_v17 = vmul.f32 %v1183_v13, %v1175_v45  ;;  %v1167_v58 = vmul.f32 0.5, %v3889_v37 }
 0xc0e   :  { %v1192_v44 = vmul.f32 %v3882_v29, %v1190_v36  ;;  %v1166_v29 = vmul.f32 0.5, %v3876_v26 }
 0xc0f   :  { %v1212_v63 = vadd.f32 0.49746925, %v1210_v60  ;;  %v1205_v3 = vadd.f32 0.01407047, %v1203_v62  ;;  %v1187_v24 = vadd.f32 0.18520832, %v1185_v17 }
 0xc11   :  { %v1214_v4 = vmul.f32 %v1212_v63, %v1174_v30  ;;  %v1207_v6 = vmul.f32 %v1205_v3, %v1175_v45  ;;  %v1189_v39 = vmul.f32 %v1187_v24, %v1175_v45  ;;  %v3183_v24 = vld [vmem:[%s4333_s29 + $0x50] sm:$0xff] }
 0xc13   :  { %v1216_v7 = vadd.f32 1.0, %v1214_v4  ;;  %v1209_v10 = vadd.f32 0.11098505, %v1207_v6  ;;  %v1191_v47 = vadd.f32 1.1283791, %v1189_v39 }
 0xc15   :  { %3304 = vrcp.f32 %v1216_v7  ;;  %v1211_v52 = vmul.f32 %v1209_v10, %v1175_v45  ;;  %v1229_v28 = vand.u32 2147483648, %v1216_v7  ;;  %vm1223_vm10 = vweird.f32 %v1216_v7 }
 0xc16   :  { %v1227_v31 = vand.u32 2147483647, %v1216_v7  ;;  %v1193_v55 = vmul.f32 %v3895_v42, %v1191_v47 }
 0xc17   :  { %v1213_v12 = vadd.f32 0.49746925, %v1211_v52  ;;  %v1230_v41 = vor.u32 1.1754944e-38, %v1229_v28  ;;  %v3182_v28 = vld [vmem:[%s4332_s6 + $0x58] sm:$0xff] }
 0xc18   :  { %vm1228_vm12 = vcmp.eq.f32.partialorder %v1227_v31, 8.507059e+37 }
 0xc19   :  { %v1215_v56 = vmul.f32 %v1213_v12, %v1175_v45 }
 0xc1b   :  { %v3305_v14 = vpop.eup %3304  ;;  %v1217_v16 = vadd.f32 1.0, %v1215_v56  ;;  %v3178_v56 = vld [vmem:[%s4333_s29 + $0x48] sm:$0xff] }
 0xc1c   :  { %v1219_v59 = vmul.f32 %v3305_v14, %v1216_v7  ;;  %vm1224_vm9 = vweird.f32 %v3305_v14  ;;  %1461 = vmatpush.bf16.msrb.mxu3 %v3178_v56  ;;  %v3243_v56 = vld [vmem:[%s4338_s4 + $0x4] ss:$0 sm:$0xff] }
 0xc1d   :  { %3306 = vrcp.f32 %v1217_v16  ;;  %vm1225_vm11 = vmor %vm1223_vm10, %vm1224_vm9  ;;  %v1244_v30 = vand.u32 2147483648, %v1217_v16  ;;  %v1242_v50 = vand.u32 2147483647, %v1217_v16  ;;  %vm1238_vm14 = vweird.f32 %v1217_v16 }
 0xc1e   :  { %v1220_v0 = vsub.f32 1.0, %v1219_v59  ;;  %v3184_v59 = vld [vmem:[%s4333_s29 + $0x58] sm:$0xff] }
 0xc1f   :  { %v1245_v54 = vor.u32 1.1754944e-38, %v1244_v30  ;;  %vm1243_vm3 = vcmp.eq.f32.partialorder %v1242_v50, 8.507059e+37  ;;  %1639 = vmatpush.bf16.msra.mxu0 %v3184_v59  ;;  %v3185_v59 = vld [vmem:[%s4334_s12 + $0x50] sm:$0xff] }
 0xc20   :  { %v1221_v23 = vmul.f32 %v3305_v14, %v1220_v0  ;;  %v3175_v0 = vld [vmem:[%s4332_s6 + $0x40] sm:$0xff]  ;;  %1462 = vmatpush.bf16.msrb.mxu3 %v3177_v20 }
 0xc22   :  { %v1222_v27 = vadd.f32 %v3305_v14, %v1221_v23  ;;  %v3179_v23 = vld [vmem:[%s4334_s12 + $0x40] sm:$0xff] }
 0xc23   :  { %v3307_v32 = vpop.eup %3306  ;;  %1640 = vmatpush.bf16.msra.mxu0 %v3183_v24 }
 0xc24   :  { %v1226_v38 = vsel %vm1225_vm11, %v3305_v14, %v1222_v27  ;;  %v1234_v40 = vmul.f32 %v3307_v32, %v1217_v16  ;;  %vm1239_vm13 = vweird.f32 %v3307_v32  ;;  %v3180_v14 = vld [vmem:[%s4334_s12 + $0x48] sm:$0xff] }
 0xc25   :  { %v1231_v46 = vsel %vm1228_vm12, %v1230_v41, %v1226_v38  ;;  %vm1240_vm2 = vmor %vm1238_vm14, %vm1239_vm13  ;;  %1497 = vmatpush.bf16.msra.mxu1 %v3180_v14 }
 0xc26   :  { %v1235_v43 = vsub.f32 1.0, %v1234_v40  ;;  %v1232_v51 = vmul.f32 %v1231_v46, %v1192_v44 }
 0xc28   :  { %v1236_v48 = vmul.f32 %v3307_v32, %v1235_v43  ;;  %v1248_v35 = vadd.f32 1.0, %v1232_v51 }
 0xc29   :  { %1498 = vmatpush.bf16.msra.mxu1 %v3179_v23  ;;  %v4011_v23 = vld [vmem:[%s4339_s30] sm:$0xff] }
 0xc2a   :  { %v1237_v33 = vadd.f32 %v3307_v32, %v1236_v48  ;;  %v1250_v61 = vmul.f32 %v1248_v35, %v1166_v29 }
 0xc2c   :  { %v1241_v45 = vsel %vm1240_vm2, %v3307_v32, %v1237_v33  ;;  %v3181_v32 = vld [vmem:[%s4332_s6 + $0x50] sm:$0xff]  ;;  %v3239_v33 = vld [vmem:[%s4297_s22] ss:$0 sm:$0xff] }
 0xc2d   :  { %v1246_v57 = vsel %vm1243_vm3, %v1245_v54, %v1241_v45  ;;  %1603 = vmatpush.bf16.msrb.mxu1 %v3182_v28 }
 0xc2e   :  { %v1247_v34 = vmul.f32 %v1246_v57, %v1193_v55  ;;  %v3240_v57 = vld [vmem:[%s4298_s23] ss:$0 sm:$0xff] }
 0xc30   :  { %v1249_v60 = vadd.f32 1.0, %v1247_v34 }
 0xc31   :  { %1604 = vmatpush.bf16.msrb.mxu1 %v3181_v32  ;;  %v4018_v32 = vld [vmem:[%s4339_s30 + $0x8] sm:$0xff] }
 0xc32   :  { %v1251_v62 = vmul.f32 %v1249_v60, %v1167_v58 }
 0xc34   :  { %v1268_v63 = vpack.c.bf16 %v1251_v62, %v1250_v61 }
 0xc36   :  { %1329 = vmatmul.bf16.vlgmr.msrb.gmra.mxu0 %v1268_v63 }
 0xcb3   :  { %v1330_v2 = vpop.f32.mrf.mxu0 }
 0xcb4   :  { %v1331_v42 = vadd.f32 %v3238_v1, %v1330_v2  ;;  %v3242_v2 = vld [vmem:[%s4337_s10 + $0x5] ss:$0 sm:$0xff] }
 0xcb6   :  { %v1335_v3 = vadd.f32 %v1331_v42, %v3866_v18 }
 0xcb8   :  { %v1339_v4 = vsel %vm205_vm7, %v1335_v3, 0.0 }
 0xcb9   :  { %1340 = vadd.xlane.f32.xlu2 %v1339_v4 }
 0xcbb   :  { %v1332_v5 = vpop.f32.mrf.mxu0 }
 0xcbc   :  { %v1333_v26 = vadd.f32 %v3238_v1, %v1332_v5  ;;  %v3241_v1 = vld [vmem:[%s4288_s13 + $0x4] ss:$0 sm:$0xff] }
 0xcbe   :  { %v1336_v37 = vadd.f32 %v1333_v26, %v3868_v19  ;;  %v3176_v19 = vld [vmem:[%s4332_s6 + $0x48] sm:$0xff] }
 0xcbf   :  { %1425 = vmatpush.bf16.msrb.mxu2 %v3176_v19 }
 0xcc0   :  { %v1342_v6 = vsel %vm205_vm7, %v1336_v37, 0.0 }
 0xcc1   :  { %1343 = vadd.xlane.f32.xlu0 %v1342_v6 }
 0xcc3   :  { %1426 = vmatpush.bf16.msrb.mxu2 %v3175_v0 }
 0xd2c   :  { %v1341_v7 = vpop.xlane.xlu2 %1340 }
 0xd2d   :  { %v1345_v8 = vmul.f32 %v1341_v7, %v3612_v49 }
 0xd2f   :  { %v1347_v9 = vsub.f32 %v1335_v3, %v1345_v8  ;;  %v3244_v8 = vld [vmem:[%s4337_s10 + $0x4] ss:$0 sm:$0xff] }
 0xd31   :  { %v1349_v10 = vmul.f32 %v1347_v9, %v1347_v9 }
 0xd33   :  { %v1351_v11 = vsel %vm205_vm7, %v1349_v10, 0.0 }
 0xd34   :  { %v1344_v52 = vpop.xlane.xlu0 %1343  ;;  %1352 = vadd.xlane.f32.xlu1 %v1351_v11 }
 0xd35   :  { %v1346_v18 = vmul.f32 %v1344_v52, %v3612_v49 }
 0xd37   :  { %v1348_v53 = vsub.f32 %v1336_v37, %v1346_v18 }
 0xd39   :  { %v1350_v12 = vmul.f32 %v1348_v53, %v1348_v53 }
 0xd3b   :  { %v1354_v13 = vsel %vm205_vm7, %v1350_v12, 0.0 }
 0xd3c   :  { %1355 = vadd.xlane.f32.xlu2 %v1354_v13  ;;  %v3186_v13 = vld [vmem:[%s4334_s12 + $0x58] sm:$0xff] }
 0xda7   :  { %v1353_v15 = vpop.xlane.xlu1 %1352 }
 0xda8   :  { %v1357_v16 = vmul.f32 %v1353_v15, %v3612_v49 }
 0xdaa   :  { %v1359_v17 = vadd.f32 1e-05, %v1357_v16 }
 0xdac   :  { %3308 = vrsqrt.f32 %v1359_v17  ;;  %vm1367_vm5 = vweird.f32 %v1359_v17 }
 0xdaf   :  { %v1356_v27 = vpop.xlane.xlu2 %1355 }
 0xdb0   :  { %v1358_v31 = vmul.f32 %v1356_v27, %v3612_v49 }
 0xdb2   :  { %v3309_v36 = vpop.eup %3308  ;;  %v1360_v38 = vadd.f32 1e-05, %v1358_v31 }
 0xdb3   :  { %v1362_v39 = vmul.f32 %v3309_v36, %v1359_v17  ;;  %vm1368_vm4 = vweird.f32 %v3309_v36 }
 0xdb4   :  { %3310 = vrsqrt.f32 %v1360_v38  ;;  %vm1369_vm6 = vmor %vm1367_vm5, %vm1368_vm4  ;;  %vm1377_vm9 = vweird.f32 %v1360_v38 }
 0xdb5   :  { %v1363_v40 = vmul.f32 %v3309_v36, %v1362_v39 }
 0xdb7   :  { %v1364_v41 = vmul.f32 0.5, %v1363_v40  ;;  %v3246_v40 = vld [vmem:[%s4288_s13 + $0x5] ss:$0 sm:$0xff] }
 0xdb9   :  { %v1365_v43 = vsub.f32 1.5, %v1364_v41 }
 0xdba   :  { %v3311_v44 = vpop.eup %3310 }
 0xdbb   :  { %v1366_v46 = vmul.f32 %v3309_v36, %v1365_v43  ;;  %v1372_v30 = vmul.f32 %v3311_v44, %v1360_v38  ;;  %vm1378_vm8 = vweird.f32 %v3311_v44 }
 0xdbc   :  { %vm1379_vm10 = vmor %vm1377_vm9, %vm1378_vm8 }
 0xdbd   :  { %v1373_v47 = vmul.f32 %v3311_v44, %v1372_v30  ;;  %v1370_v48 = vsel %vm1369_vm6, %v3309_v36, %v1366_v46 }
 0xdbe   :  { %v1381_v54 = vmul.f32 %v1370_v48, %v1347_v9 }
 0xdbf   :  { %v1374_v50 = vmul.f32 0.5, %v1373_v47 }
 0xdc0   :  { %v1386_v35 = vmul.f32 %v3239_v33, %v1381_v54 }
 0xdc1   :  { %v1375_v51 = vsub.f32 1.5, %v1374_v50 }
 0xdc2   :  { %v3967_v58 = vadd.f32 %v3240_v57, %v1386_v35 }
 0xdc3   :  { %v1376_v55 = vmul.f32 %v3311_v44, %v1375_v51 }
 0xdc5   :  { %v1380_v45 = vsel %vm1379_vm10, %v3311_v44, %v1376_v55 }
 0xdc6   :  { %v1382_v34 = vmul.f32 %v1380_v45, %v1348_v53 }
 0xdc8   :  { %v1387_v29 = vmul.f32 %v3239_v33, %v1382_v34 }
 0xdca   :  { %v3969_v60 = vadd.f32 %v3240_v57, %v1387_v29 }
 0xdcc   :  { %v3973_v61 = vpack.c.bf16 %v3969_v60, %v3967_v58 }
 0xdce   :  { %2881 = vmatmul.msk.bf16.vlgmr.msrb.gmra.mxu2 %vm205_vm7, %v3973_v61  ;;  %2895 = vmatmul.msk.bf16.vlgmr.msrb.gmra.mxu3 %vm205_vm7, %v3973_v61 }
 0xdcf   :  { %2909 = vmatmul.msk.bf16.vlgmr.msra.gmra.mxu1 %vm205_vm7, %v3973_v61  ;;  %2940 = vmatmul.msk.bf16.vlgmr.msra.gmra.mxu0 %vm205_vm7, %v3973_v61 }
 0xddf   :  { %2926 = vmatmul.msk.bf16.vlgmr.msrb.gmra.mxu1 %vm205_vm7, %v3973_v61 }
 0xe4c   :  { %v1500_v62 = vpop.f32.mrf.mxu1  ;;  %v1642_v63 = vpop.f32.mrf.mxu0 }
 0xe4d   :  { %v1501_v26 = vadd.f32 %v3241_v1, %v1500_v62  ;;  %v1643_v37 = vadd.f32 %v3242_v2, %v1642_v63 }
 0xe51   :  { %v1464_v42 = vpop.f32.mrf.mxu3  ;;  %v1428_v3 = vpop.f32.mrf.mxu2 }
 0xe52   :  { %v1465_v18 = vadd.f32 %v3244_v8, %v1464_v42  ;;  %v1429_v16 = vadd.f32 %v3243_v56, %v1428_v3  ;;  %v3188_v42 = vld [vmem:[%s4332_s6 + $0x68] sm:$0xff] }
 0xe54   :  { %v1502_v4 = vpop.f32.mrf.mxu1  ;;  %v1644_v5 = vpop.f32.mrf.mxu0 }
 0xe55   :  { %v1503_v6 = vadd.f32 %v3241_v1, %v1502_v4  ;;  %v1645_v7 = vadd.f32 %v3242_v2, %v1644_v5  ;;  %v3187_v4 = vld [vmem:[%s4332_s6 + $0x60] sm:$0xff] }
 0xe57   :  { %v1554_v9 = vpack.c.bf16 %v1503_v6, %v1501_v26  ;;  %v1684_v10 = vpack.c.bf16 %v1645_v7, %v1643_v37  ;;  %v3245_v26 = vld [vmem:[%s4338_s4 + $0x5] ss:$0 sm:$0xff] }
 0xe59   :  { %1565 = vmatpush.bf16.msra.mxu3 %v1554_v9  ;;  %v1466_v11 = vpop.f32.mrf.mxu3  ;;  %v1689_v52 = vsel %vm377_vm15, %v1684_v10, 0  ;;  %v1430_v19 = vpop.f32.mrf.mxu2 }
 0xe5a   :  { %v1467_v53 = vadd.f32 %v3244_v8, %v1466_v11  ;;  %v1431_v15 = vadd.f32 %v3243_v56, %v1430_v19  ;;  %v2912_v8 = vld [vmem:[%s4289_s14 + $0x10] sm:$0xf] }
 0xe5b   :  { %v1777_v9 = vsel %vm170_vm0, %v2912_v8, 0 }
 0xe5c   :  { %v1506_v12 = vpack.c.bf16 %v1467_v53, %v1465_v18  ;;  %v1505_v17 = vpack.c.bf16 %v1431_v15, %v1429_v16  ;;  %v1606_v2 = vpop.f32.mrf.mxu1 }
 0xe5d   :  { %1698 = vmatpush.bf16.xpose.msrb.mxu3 %v1689_v52  ;;  %v1607_v6 = vadd.f32 %v3245_v26, %v1606_v2 }
 0xe5e   :  { %v1511_v14 = vsel %vm377_vm15, %v1506_v12, 0 }
 0xe5f   :  { %1520 = vmatpush.bf16.xpose.msra.mxu2 %v1511_v14 }
 0xe64   :  { %v1608_v5 = vpop.f32.mrf.mxu1 }
 0xe65   :  { %v1609_v37 = vadd.f32 %v3245_v26, %v1608_v5  ;;  %v3247_v5 = vld [vmem:[%s4338_s4 + $0x6] ss:$0 sm:$0xff] }
 0xe66   :  { %2910 = vmatmul.msk.bf16.vlgmr.msra.gmra.mxu2 %vm377_vm15, %v1505_v17 }
 0xe67   :  { %1675 = vmatpush.bf16.msrb.mxu2 %v3186_v13  ;;  %v1683_v7 = vpack.c.bf16 %v1609_v37, %v1607_v6  ;;  %v3195_v6 = vld [vmem:[%s4333_s29 + $0x70] sm:$0xff] }
 0xe6b   :  { %1676 = vmatpush.bf16.msrb.mxu2 %v3185_v59 }
 0xe6f   :  { %1786 = vmatpush.bf16.msra.mxu2 %v1777_v9 }
 0xe76   :  { %2954 = vmatmul.msk.bf16.vlgmr.msrb.gmra.mxu2 %vm205_vm7, %v3973_v61 }
 0xee9   :  { %v1522_v0 = vpop.f32.mrf.mxu2 }
 0xeea   :  { %v1527_v20 = vmul.f32 0.35355338, %v1522_v0 }
 0xeec   :  { %v1529_v24 = vadd.f32 %v4011_v23, %v1527_v20 }
 0xeee   :  { %v1531_v27 = vsel %vm402_vm1, %v1529_v24, -inf }
 0xeef   :  { %1532 = vmax.xlane.f32.xlu0 %v1531_v27 }
 0xef1   :  { %v1524_v28 = vpop.f32.mrf.mxu2 }
 0xef2   :  { %v1528_v31 = vmul.f32 0.35355338, %v1524_v28 }
 0xef4   :  { %v1530_v36 = vadd.f32 %v4018_v32, %v1528_v31 }
 0xef6   :  { %v1534_v38 = vsel %vm402_vm1, %v1530_v36, -inf }
 0xef7   :  { %1535 = vmax.xlane.f32.xlu1 %v1534_v38  ;;  %v3190_v38 = vld [vmem:[%s4333_s29 + $0x68] sm:$0xff] }
 0xef9   :  { %v1678_v39 = vpop.f32.mrf.mxu2 }
 0xefa   :  { %v1679_v43 = vadd.f32 %v3246_v40, %v1678_v39  ;;  %v3189_v39 = vld [vmem:[%s4333_s29 + $0x60] sm:$0xff] }
 0xf01   :  { %v1680_v41 = vpop.f32.mrf.mxu2 }
 0xf02   :  { %v1681_v44 = vadd.f32 %v3246_v40, %v1680_v41 }
 0xf04   :  { %v1732_v46 = vpack.c.bf16 %v1681_v44, %v1679_v43 }
 0xf06   :  { %1743 = vmatpush.bf16.msra.mxu1 %v1732_v46 }
 0xf0a   :  { %1857 = vmatpush.bf16.msrb.mxu1 %v3190_v38  ;;  %v3251_v38 = vld [vmem:[%s4337_s10 + $0x7] ss:$0 sm:$0xff] }
 0xf0e   :  { %1858 = vmatpush.bf16.msrb.mxu1 %v3189_v39 }
 0xf62   :  { %v1533_v30 = vpop.xlane.xlu0 %1532 }
 0xf63   :  { %v1537_v47 = vsub.f32 %v1529_v24, %v1533_v30 }
 0xf65   :  { %v1539_v48 = vmul.f32 1.442695, %v1537_v47 }
 0xf67   :  { %3312 = vpow2.f32 %v1539_v48  ;;  %v2957_v48 = vld [vmem:[%s4289_s14 + $0x14] sm:$0xf] }
 0xf6a   :  { %v1536_v50 = vpop.xlane.xlu1 %1535 }
 0xf6b   :  { %v1538_v51 = vsub.f32 %v1530_v36, %v1536_v50  ;;  %v1757_v50 = vsel %vm170_vm0, %v2957_v48, 0 }
 0xf6c   :  { %1766 = vmatpush.bf16.msrb.mxu0 %v1757_v50 }
 0xf6d   :  { %v3313_v33 = vpop.eup %3312  ;;  %v1541_v54 = vmul.f32 1.442695, %v1538_v51  ;;  %v3192_v51 = vld [vmem:[%s4334_s12 + $0x68] sm:$0xff] }
 0xf6e   :  { %v1543_v55 = vsel %vm402_vm1, %v3313_v33, 0.0 }
 0xf6f   :  { %3314 = vpow2.f32 %v1541_v54  ;;  %1544 = vadd.xlane.f32.xlu2 %v1543_v55 }
 0xf70   :  { %1893 = vmatpush.bf16.msra.mxu0 %v3192_v51 }
 0xf75   :  { %v3315_v45 = vpop.eup %3314 }
 0xf76   :  { %v1546_v57 = vsel %vm402_vm1, %v3315_v45, 0.0 }
 0xf77   :  { %1547 = vadd.xlane.f32.xlu0 %v1546_v57 }
 0xfe2   :  { %v1545_v35 = vpop.xlane.xlu2 %1544 }
 0xfe3   :  { %3316 = vrcp.f32 %v1545_v35  ;;  %v3193_v35 = vld [vmem:[%s4332_s6 + $0x70] sm:$0xff] }
 0xfe9   :  { %v3317_v29 = vpop.eup %3316 }
 0xfea   :  { %v1548_v34 = vpop.xlane.xlu0 %1547  ;;  %v1551_v63 = vmul.f32 %v3317_v29, %v3313_v33  ;;  %v3191_v33 = vld [vmem:[%s4334_s12 + $0x60] sm:$0xff] }
 0xfeb   :  { %3318 = vrcp.f32 %v1548_v34  ;;  %1894 = vmatpush.bf16.msra.mxu0 %v3191_v33 }
 0xff1   :  { %v3319_v62 = vpop.eup %3318 }
 0xff2   :  { %v1552_v1 = vmul.f32 %v3319_v62, %v3315_v45  ;;  %v3194_v45 = vld [vmem:[%s4332_s6 + $0x78] sm:$0xff]  ;;  %v3248_v62 = vld [vmem:[%s4337_s10 + $0x6] ss:$0 sm:$0xff] }
 0xff4   :  { %v1553_v3 = vpack.c.bf16 %v1552_v1, %v1551_v63 }
 0xff6   :  { %2911 = vmatmul.msk.bf16.vlgmr.msra.gmra.mxu3 %vm402_vm1, %v1553_v3  ;;  %v3196_v3 = vld [vmem:[%s4333_s29 + $0x78] sm:$0xff]  ;;  %s2643_s29 = sshll.u32 %s4303_s28, 4  ;;  %s2644_s29 = int_to_ptr.hbm [resolvable:$true] %s2643_s29 }
 0xff7   :  { %1821 = vmatpush.bf16.msra.mxu3 %v3188_v42 }
 0xffb   :  { %1822 = vmatpush.bf16.msra.mxu3 %v3187_v4 }
0x1006   :  { %2955 = vmatmul.msk.bf16.vlgmr.msrb.gmra.mxu3 %vm377_vm15, %v1683_v7 }
0x1016   :  { %2973 = vmatmul.msk.bf16.vlgmr.msra.gmra.mxu3 %vm205_vm7, %v3973_v61 }
0x1079   :  { %v1567_v10 = vpop.f32.mrf.mxu3 }
0x1081   :  { %v1569_v11 = vpop.f32.mrf.mxu3 }
0x1082   :  { %v1574_v52 = vpack.c.bf16 %v1569_v11, %v1567_v10 }
0x1084   :  { %2959 = vmatmul.msk.bf16.vlgmr.msra.gmra.mxu2 %vm377_vm15, %v1574_v52 }
0x1089   :  { %v1700_v18 = vpop.f32.mrf.mxu3 }
0x108a   :  { %v1705_v53 = vmul.f32 0.35355338, %v1700_v18 }
0x108c   :  { %v1707_v12 = vadd.f32 %v4011_v23, %v1705_v53 }
0x108e   :  { %v1709_v13 = vsel %vm402_vm1, %v1707_v12, -inf }
0x108f   :  { %1710 = vmax.xlane.f32.xlu1 %v1709_v13 }
0x1091   :  { %v1702_v19 = vpop.f32.mrf.mxu3 }
0x1092   :  { %v1706_v56 = vmul.f32 0.35355338, %v1702_v19 }
0x1094   :  { %v1708_v14 = vadd.f32 %v4018_v32, %v1706_v56 }
0x1096   :  { %v1712_v15 = vsel %vm402_vm1, %v1708_v14, -inf }
0x1097   :  { %1713 = vmax.xlane.f32.xlu2 %v1712_v15  ;;  %v3004_v15 = vld [vmem:[%s4289_s14 + $0x18] sm:$0xf] }
0x1099   :  { %v1824_v29 = vpop.f32.mrf.mxu3 }
0x109a   :  { %v1825_v7 = vadd.f32 %v3247_v5, %v1824_v29 }
0x10a1   :  { %v1826_v4 = vpop.f32.mrf.mxu3 }
0x10a2   :  { %v1827_v37 = vadd.f32 %v3247_v5, %v1826_v4 }
0x10a4   :  { %v1901_v8 = vpack.c.bf16 %v1827_v37, %v1825_v7  ;;  %v3250_v7 = vld [vmem:[%s4338_s4 + $0x7] ss:$0 sm:$0xff] }
0x1102   :  { %v1711_v59 = vpop.xlane.xlu1 %1710 }
0x1103   :  { %v1715_v16 = vsub.f32 %v1707_v12, %v1711_v59  ;;  %v3249_v12 = vld [vmem:[%s4288_s13 + $0x6] ss:$0 sm:$0xff]  ;;  %v1975_v59 = vsel %vm170_vm0, %v3004_v15, 0 }
0x1105   :  { %v1717_v17 = vmul.f32 1.442695, %v1715_v16 }
0x1107   :  { %3320 = vpow2.f32 %v1717_v17  ;;  %v4097_v9 = vpop.f32.mrf.mxu2 }
0x110a   :  { %v1714_v0 = vpop.xlane.xlu2 %1713 }
0x110b   :  { %v1716_v20 = vsub.f32 %v1708_v14, %v1714_v0 }
0x110d   :  { %v3321_v24 = vpop.eup %3320  ;;  %v1719_v27 = vmul.f32 1.442695, %v1716_v20 }
0x110e   :  { %v1721_v28 = vsel %vm402_vm1, %v3321_v24, 0.0 }
0x110f   :  { %3322 = vpow2.f32 %v1719_v27  ;;  %1722 = vadd.xlane.f32.xlu0 %v1721_v28  ;;  %v1790_v11 = vpop.f32.mrf.mxu2 }
0x1115   :  { %v3323_v31 = vpop.eup %3322 }
0x1116   :  { %v1724_v36 = vsel %vm402_vm1, %v3323_v31, 0.0 }
0x1117   :  { %1725 = vadd.xlane.f32.xlu1 %v1724_v36 }
0x1182   :  { %v1723_v40 = vpop.xlane.xlu0 %1722 }
0x1183   :  { %3324 = vrcp.f32 %v1723_v40 }
0x1189   :  { %v3325_v43 = vpop.eup %3324 }
0x118a   :  { %v1726_v41 = vpop.xlane.xlu1 %1725  ;;  %v1729_v46 = vmul.f32 %v3325_v43, %v3321_v24 }
0x118b   :  { %3326 = vrcp.f32 %v1726_v41 }
0x1191   :  { %v3327_v44 = vpop.eup %3326 }
0x1192   :  { %v1730_v30 = vmul.f32 %v3327_v44, %v3323_v31 }
0x1194   :  { %v1731_v47 = vpack.c.bf16 %v1730_v30, %v1729_v46 }
0x1196   :  { %2956 = vmatmul.msk.bf16.vlgmr.msra.gmra.mxu1 %vm402_vm1, %v1731_v47 }
0x1197   :  { %1984 = vmatpush.bf16.msra.mxu1 %v1975_v59 }
0x11a6   :  { %2987 = vmatmul.msk.bf16.vlgmr.msrb.gmra.mxu1 %vm205_vm7, %v3973_v61 }
0x1213   :  { %v1745_v54 = vpop.f32.mrf.mxu1 }
0x121b   :  { %v1747_v55 = vpop.f32.mrf.mxu1 }
0x121c   :  { %v1752_v57 = vpack.c.bf16 %v1747_v55, %v1745_v54 }
0x121e   :  { %2958 = vmatmul.msk.bf16.vlgmr.msrb.gmra.mxu0 %vm377_vm15, %v1752_v57  ;;  %v3198_v57 = vld [vmem:[%s4334_s12 + $0x78] sm:$0xff] }
0x121f   :  { %2021 = vmatpush.bf16.msrb.mxu0 %v3194_v45 }
0x1223   :  { %v1860_v34 = vpop.f32.mrf.mxu1  ;;  %2022 = vmatpush.bf16.msrb.mxu0 %v3193_v35  ;;  %v3197_v35 = vld [vmem:[%s4334_s12 + $0x70] sm:$0xff] }
0x1224   :  { %v1861_v1 = vadd.f32 %v3248_v62, %v1860_v34 }
0x122b   :  { %v1862_v63 = vpop.f32.mrf.mxu1 }
0x122c   :  { %v1863_v2 = vadd.f32 %v3248_v62, %v1862_v63 }
0x122e   :  { %v1902_v42 = vpack.c.bf16 %v1863_v2, %v1861_v1  ;;  %3001 = vmatmul.msk.bf16.vlgmr.msra.gmra.mxu0 %vm205_vm7, %v3973_v61 }
0x1230   :  { %v1907_v26 = vsel %vm377_vm15, %v1902_v42, 0 }
0x1231   :  { %1916 = vmatpush.bf16.xpose.msrb.mxu2 %v1907_v26 }
0x1238   :  { %3002 = vmatmul.msk.bf16.vlgmr.msrb.gmra.mxu2 %vm377_vm15, %v1901_v8 }
0x1239   :  { %2057 = vmatpush.bf16.msra.mxu2 %v3196_v3 }
0x123d   :  { %2058 = vmatpush.bf16.msra.mxu2 %v3195_v6 }
0x123e   :  { %3019 = vmatmul.msk.bf16.vlgmr.msrb.gmra.mxu0 %vm205_vm7, %v3973_v61 }
0x1248   :  { %3033 = vmatmul.msk.bf16.vlgmr.msra.gmra.mxu2 %vm205_vm7, %v3973_v61 }
0x129b   :  { %v4099_v10 = vpop.f32.mrf.mxu0 }
0x12a3   :  { %v1770_v52 = vpop.f32.mrf.mxu0 }
0x12a4   :  { %v4101_v18 = vadd.f32 %v1790_v11, %v1770_v52  ;;  %v3252_v11 = vld [vmem:[%s4288_s13 + $0x7] ss:$0 sm:$0xff]  ;;  %s2641_s13 = sshll.u32 %s3389_s3, 4  ;;  %s2642_s13 = int_to_ptr.vmem [resolvable:$true] %s2641_s13 }
0x12ab   :  { %v1896_v53 = vpop.f32.mrf.mxu0 }
0x12ac   :  { %v1897_v19 = vadd.f32 %v3249_v12, %v1896_v53 }
0x12b3   :  { %v1898_v13 = vpop.f32.mrf.mxu0 }
0x12b4   :  { %v1899_v56 = vadd.f32 %v3249_v12, %v1898_v13 }
0x12b6   :  { %v1950_v14 = vpack.c.bf16 %v1899_v56, %v1897_v19  ;;  %v1789_v56 = vadd.f32 %v4097_v9, %v4099_v10 }
0x12b8   :  { %1961 = vmatpush.bf16.msrb.mxu3 %v1950_v14 }
0x12bb   :  { %v1918_v16 = vpop.f32.mrf.mxu2  ;;  %v2024_v4 = vpop.f32.mrf.mxu0 }
0x12bc   :  { %v1923_v17 = vmul.f32 0.35355338, %v1918_v16  ;;  %2093 = vmatpush.bf16.msra.mxu3 %v3198_v57  ;;  %v2025_v52 = vadd.f32 %v3250_v7, %v2024_v4 }
0x12be   :  { %v1925_v0 = vadd.f32 %v4011_v23, %v1923_v17 }
0x12c0   :  { %v1927_v20 = vsel %vm402_vm1, %v1925_v0, -inf  ;;  %2094 = vmatpush.bf16.msra.mxu3 %v3197_v35  ;;  %v3253_v35 = vld [vmem:[%s4290_s15 + $0x1] ss:$0 sm:$0xff] }
0x12c1   :  { %1928 = vmax.xlane.f32.xlu2 %v1927_v20 }
0x12c3   :  { %v1920_v24 = vpop.f32.mrf.mxu2  ;;  %v2026_v6 = vpop.f32.mrf.mxu0 }
0x12c4   :  { %v1924_v27 = vmul.f32 0.35355338, %v1920_v24  ;;  %v2027_v8 = vadd.f32 %v3250_v7, %v2026_v6 }
0x12c6   :  { %v1926_v28 = vadd.f32 %v4018_v32, %v1924_v27 }
0x12c8   :  { %v1930_v31 = vsel %vm402_vm1, %v1926_v28, -inf }
0x12c9   :  { %1931 = vmax.xlane.f32.xlu0 %v1930_v31 }
0x12cb   :  { %v2060_v36 = vpop.f32.mrf.mxu2 }
0x12cc   :  { %v2061_v40 = vadd.f32 %v3251_v38, %v2060_v36 }
0x12d3   :  { %v2062_v39 = vpop.f32.mrf.mxu2 }
0x12d4   :  { %v2063_v41 = vadd.f32 %v3251_v38, %v2062_v39 }
0x12d6   :  { %v2102_v43 = vpack.c.bf16 %v2063_v41, %v2061_v40 }
0x12d8   :  { %v2107_v44 = vsel %vm377_vm15, %v2102_v43, 0 }
0x12d9   :  { %2116 = vmatpush.bf16.xpose.msrb.mxu1 %v2107_v44 }
0x1334   :  { %v1929_v46 = vpop.xlane.xlu2 %1928 }
0x1335   :  { %v1933_v30 = vsub.f32 %v1925_v0, %v1929_v46 }
0x1337   :  { %v1935_v47 = vmul.f32 1.442695, %v1933_v30 }
0x1339   :  { %3328 = vpow2.f32 %v1935_v47 }
0x133c   :  { %v1932_v48 = vpop.xlane.xlu0 %1931 }
0x133d   :  { %v1934_v50 = vsub.f32 %v1926_v28, %v1932_v48 }
0x133f   :  { %v3329_v51 = vpop.eup %3328  ;;  %v1937_v33 = vmul.f32 1.442695, %v1934_v50 }
0x1340   :  { %v1939_v54 = vsel %vm402_vm1, %v3329_v51, 0.0 }
0x1341   :  { %3330 = vpow2.f32 %v1937_v33  ;;  %1940 = vadd.xlane.f32.xlu1 %v1939_v54  ;;  %v3050_v33 = vld [vmem:[%s4289_s14 + $0x1c] sm:$0xf] }
0x1342   :  { %v2175_v54 = vsel %vm170_vm0, %v3050_v33, 0 }
0x1343   :  { %2184 = vmatpush.bf16.msrb.mxu2 %v2175_v54  ;;  %v3208_v54 = vld [vmem:[%s4295_s20 + $0x78] sm:$0xff] }
0x1347   :  { %v3331_v55 = vpop.eup %3330 }
0x1348   :  { %v1942_v45 = vsel %vm402_vm1, %v3331_v55, 0.0 }
0x1349   :  { %1943 = vadd.xlane.f32.xlu2 %v1942_v45 }
0x13b4   :  { %v1941_v34 = vpop.xlane.xlu1 %1940 }
0x13b5   :  { %3332 = vrcp.f32 %v1941_v34 }
0x13bb   :  { %v3333_v62 = vpop.eup %3332 }
0x13bc   :  { %v1944_v29 = vpop.xlane.xlu2 %1943  ;;  %v1947_v1 = vmul.f32 %v3333_v62, %v3329_v51 }
0x13bd   :  { %3334 = vrcp.f32 %v1944_v29 }
0x13c3   :  { %v3335_v63 = vpop.eup %3334 }
0x13c4   :  { %v1948_v2 = vmul.f32 %v3335_v63, %v3331_v55 }
0x13c6   :  { %v1949_v42 = vpack.c.bf16 %v1948_v2, %v1947_v1 }
0x13c8   :  { %3003 = vmatmul.msk.bf16.vlgmr.msrb.gmra.mxu3 %vm402_vm1, %v1949_v42 }
0x13d8   :  { %3047 = vmatmul.msk.bf16.vlgmr.msra.gmra.mxu3 %vm205_vm7, %v3973_v61  ;;  %v2101_v61 = vpack.c.bf16 %v2027_v8, %v2025_v52 }
0x144b   :  { %v1963_v3 = vpop.f32.mrf.mxu3 }
0x1453   :  { %v1965_v5 = vpop.f32.mrf.mxu3 }
0x1454   :  { %v1970_v26 = vpack.c.bf16 %v1965_v5, %v1963_v3 }
0x1456   :  { %3005 = vmatmul.msk.bf16.vlgmr.msra.gmra.mxu1 %vm377_vm15, %v1970_v26 }
0x1457   :  { %2457 = vmatpush.bf16.msra.mxu1 %v3208_v54 }
0x145b   :  { %v2096_v37 = vpop.f32.mrf.mxu3 }
0x145c   :  { %v2097_v12 = vadd.f32 %v3252_v11, %v2096_v37 }
0x1463   :  { %v2098_v53 = vpop.f32.mrf.mxu3 }
0x1464   :  { %v2099_v13 = vadd.f32 %v3252_v11, %v2098_v53 }
0x1466   :  { %v2150_v19 = vpack.c.bf16 %v2099_v13, %v2097_v12  ;;  %3048 = vmatmul.msk.bf16.vlgmr.msrb.gmra.mxu1 %vm377_vm15, %v2101_v61 }
0x1468   :  { %2161 = vmatpush.bf16.msra.mxu0 %v2150_v19 }
0x14d3   :  { %v1986_v14 = vpop.f32.mrf.mxu1 }
0x14d4   :  { %v1991_v15 = vadd.f32 %v1986_v14, %v1789_v56  ;;  %v3199_v56 = vld [vmem:[%s4293_s18 + $0x10] sm:$0xff] }
0x14db   :  { %v1988_v59 = vpop.f32.mrf.mxu1 }
0x14dc   :  { %v1992_v16 = vadd.f32 %v1988_v59, %v4101_v18 }
0x14e3   :  { %v2118_v17 = vpop.f32.mrf.mxu1 }
0x14e4   :  { %v2123_v0 = vmul.f32 0.35355338, %v2118_v17 }
0x14e6   :  { %v2125_v20 = vadd.f32 %v4011_v23, %v2123_v0 }
0x14e8   :  { %v2127_v24 = vsel %vm402_vm1, %v2125_v20, -inf }
0x14e9   :  { %2128 = vmax.xlane.f32.xlu0 %v2127_v24 }
0x14eb   :  { %v2120_v27 = vpop.f32.mrf.mxu1 }
0x14ec   :  { %v2124_v28 = vmul.f32 0.35355338, %v2120_v27 }
0x14ee   :  { %v2126_v31 = vadd.f32 %v4018_v32, %v2124_v28 }
0x14f0   :  { %v2130_v36 = vsel %vm402_vm1, %v2126_v31, -inf }
0x14f1   :  { %2131 = vmax.xlane.f32.xlu1 %v2130_v36 }
0x155c   :  { %v2129_v9 = vpop.xlane.xlu0 %2128 }
0x155d   :  { %v2133_v10 = vsub.f32 %v2125_v20, %v2129_v9 }
0x155f   :  { %v2135_v38 = vmul.f32 1.442695, %v2133_v10 }
0x1561   :  { %3336 = vpow2.f32 %v2135_v38 }
0x1564   :  { %v2132_v39 = vpop.xlane.xlu1 %2131 }
0x1565   :  { %v2134_v18 = vsub.f32 %v2126_v31, %v2132_v39  ;;  %v3254_v39 = vld [vmem:[%s4291_s16 + $0x1] ss:$0 sm:$0xff] }
0x1567   :  { %v3337_v40 = vpop.eup %3336  ;;  %v2137_v41 = vmul.f32 1.442695, %v2134_v18 }
0x1568   :  { %v2139_v23 = vsel %vm402_vm1, %v3337_v40, 0.0 }
0x1569   :  { %3338 = vpow2.f32 %v2137_v41  ;;  %2140 = vadd.xlane.f32.xlu2 %v2139_v23  ;;  %v3255_v23 = vld [vmem:[%s4292_s17 + $0x1] ss:$0 sm:$0xff] }
0x156f   :  { %v3339_v43 = vpop.eup %3338 }
0x1570   :  { %v2142_v44 = vsel %vm402_vm1, %v3339_v43, 0.0 }
0x1571   :  { %2143 = vadd.xlane.f32.xlu0 %v2142_v44 }
0x15dc   :  { %v2141_v32 = vpop.xlane.xlu2 %2140 }
0x15dd   :  { %3340 = vrcp.f32 %v2141_v32 }
0x15e3   :  { %v3341_v30 = vpop.eup %3340 }
0x15e4   :  { %v2144_v46 = vpop.xlane.xlu0 %2143  ;;  %v2147_v48 = vmul.f32 %v3341_v30, %v3337_v40 }
0x15e5   :  { %3342 = vrcp.f32 %v2144_v46 }
0x15eb   :  { %v3343_v47 = vpop.eup %3342 }
0x15ec   :  { %v2148_v50 = vmul.f32 %v3343_v47, %v3339_v43 }
0x15ee   :  { %v2149_v51 = vpack.c.bf16 %v2148_v50, %v2147_v48  ;;  %v3256_v48 = vld [vmem:[%s4294_s19 + $0x1] ss:$0 sm:$0xff] }
0x15f0   :  { %3049 = vmatmul.msk.bf16.vlgmr.msra.gmra.mxu0 %vm402_vm1, %v2149_v51 }
0x166d   :  { %v2163_v55 = vpop.f32.mrf.mxu0 }
0x1675   :  { %v2165_v45 = vpop.f32.mrf.mxu0 }
0x1676   :  { %v2170_v57 = vpack.c.bf16 %v2165_v45, %v2163_v55 }
0x1678   :  { %3051 = vmatmul.msk.bf16.vlgmr.msrb.gmra.mxu2 %vm377_vm15, %v2170_v57  ;;  %v3207_v57 = vld [vmem:[%s4295_s20 + $0x70] sm:$0xff] }
0x1679   :  { %2458 = vmatpush.bf16.msra.mxu1 %v3207_v57 }
0x16fb   :  { %v2186_v34 = vpop.f32.mrf.mxu2 }
0x16fc   :  { %v2191_v29 = vadd.f32 %v2186_v34, %v1991_v15 }
0x16fe   :  { %v2198_v62 = vadd.f32 %v3253_v35, %v2191_v29 }
0x1700   :  { %v2200_v63 = vadd.f32 %v2198_v62, %v3967_v58 }
0x1702   :  { %v2206_v1 = vsel %vm205_vm7, %v2200_v63, 0.0 }
0x1703   :  { %v2188_v2 = vpop.f32.mrf.mxu2  ;;  %2207 = vadd.xlane.f32.xlu1 %v2206_v1 }
0x1704   :  { %v2192_v42 = vadd.f32 %v2188_v2, %v1992_v16 }
0x1706   :  { %v2199_v3 = vadd.f32 %v3253_v35, %v2192_v42 }
0x1708   :  { %v2201_v4 = vadd.f32 %v2199_v3, %v3969_v60  ;;  %v3200_v60 = vld [vmem:[%s4293_s18 + $0x18] sm:$0xff] }
0x1709   :  { %2292 = vmatpush.bf16.msrb.mxu3 %v3200_v60 }
0x170a   :  { %v2209_v5 = vsel %vm205_vm7, %v2201_v4, 0.0 }
0x170b   :  { %2210 = vadd.xlane.f32.xlu2 %v2209_v5 }
0x170d   :  { %2293 = vmatpush.bf16.msrb.mxu3 %v3199_v56 }
0x1776   :  { %v2208_v26 = vpop.xlane.xlu1 %2207 }
0x1777   :  { %v2212_v37 = vmul.f32 %v2208_v26, %v3612_v49 }
0x1779   :  { %v2214_v6 = vsub.f32 %v2200_v63, %v2212_v37  ;;  %v3206_v63 = vld [vmem:[%s4295_s20 + $0x68] sm:$0xff] }
0x177a   :  { %2459 = vmatpush.bf16.msra.mxu1 %v3206_v63 }
0x177b   :  { %v2216_v7 = vmul.f32 %v2214_v6, %v2214_v6 }
0x177d   :  { %v2218_v8 = vsel %vm205_vm7, %v2216_v7, 0.0  ;;  %v3204_v7 = vld [vmem:[%s4295_s20 + $0x58] sm:$0xff] }
0x177e   :  { %v2211_v11 = vpop.xlane.xlu2 %2210  ;;  %2219 = vadd.xlane.f32.xlu0 %v2218_v8 }
0x177f   :  { %v2213_v58 = vmul.f32 %v2211_v11, %v3612_v49 }
0x1781   :  { %v2215_v52 = vsub.f32 %v2201_v4, %v2213_v58  ;;  %v3205_v4 = vld [vmem:[%s4295_s20 + $0x60] sm:$0xff] }
0x1782   :  { %2460 = vmatpush.bf16.msra.mxu1 %v3205_v4 }
0x1783   :  { %v2217_v53 = vmul.f32 %v2215_v52, %v2215_v52 }
0x1785   :  { %v2221_v61 = vsel %vm205_vm7, %v2217_v53, 0.0 }
0x1786   :  { %2222 = vadd.xlane.f32.xlu1 %v2221_v61  ;;  %2461 = vmatpush.bf16.msra.mxu1 %v3204_v7  ;;  %v3203_v61 = vld [vmem:[%s4295_s20 + $0x50] sm:$0xff] }
0x178a   :  { %2462 = vmatpush.bf16.msra.mxu1 %v3203_v61 }
0x17f1   :  { %v2220_v12 = vpop.xlane.xlu0 %2219 }
0x17f2   :  { %v2224_v13 = vmul.f32 %v2220_v12, %v3612_v49 }
0x17f4   :  { %v2226_v19 = vadd.f32 1e-05, %v2224_v13 }
0x17f6   :  { %3344 = vrsqrt.f32 %v2226_v19  ;;  %vm2234_vm15 = vweird.f32 %v2226_v19 }
0x17f9   :  { %v2223_v14 = vpop.xlane.xlu1 %2222 }
0x17fa   :  { %v2225_v15 = vmul.f32 %v2223_v14, %v3612_v49 }
0x17fc   :  { %v3345_v59 = vpop.eup %3344  ;;  %v2227_v16 = vadd.f32 1e-05, %v2225_v15  ;;  %v3202_v15 = vld [vmem:[%s4295_s20 + $0x48] sm:$0xff] }
0x17fd   :  { %v2229_v17 = vmul.f32 %v3345_v59, %v2226_v19  ;;  %vm2235_vm0 = vweird.f32 %v3345_v59  ;;  %2463 = vmatpush.bf16.msra.mxu1 %v3202_v15  ;;  %v3257_v15 = vld [vmem:[%s4296_s21 + $0x1] ss:$0 sm:$0xff] }
0x17fe   :  { %3346 = vrsqrt.f32 %v2227_v16  ;;  %vm2236_vm11 = vmor %vm2234_vm15, %vm2235_vm0  ;;  %vm2244_vm13 = vweird.f32 %v2227_v16 }
0x17ff   :  { %v2230_v0 = vmul.f32 %v3345_v59, %v2229_v17 }
0x1801   :  { %v2231_v20 = vmul.f32 0.5, %v2230_v0 }
0x1803   :  { %v2232_v24 = vsub.f32 1.5, %v2231_v20 }
0x1804   :  { %v3347_v27 = vpop.eup %3346 }
0x1805   :  { %v2233_v28 = vmul.f32 %v3345_v59, %v2232_v24  ;;  %v2239_v31 = vmul.f32 %v3347_v27, %v2227_v16  ;;  %vm2245_vm12 = vweird.f32 %v3347_v27 }
0x1806   :  { %vm2246_vm14 = vmor %vm2244_vm13, %vm2245_vm12 }
0x1807   :  { %v2240_v36 = vmul.f32 %v3347_v27, %v2239_v31  ;;  %v2237_v9 = vsel %vm2236_vm11, %v3345_v59, %v2233_v28 }
0x1808   :  { %v2248_v18 = vmul.f32 %v2237_v9, %v2214_v6 }
0x1809   :  { %v2241_v10 = vmul.f32 0.5, %v2240_v36 }
0x180a   :  { %v2253_v43 = vmul.f32 %v3254_v39, %v2248_v18 }
0x180b   :  { %v2242_v38 = vsub.f32 1.5, %v2241_v10 }
0x180c   :  { %v4177_v46 = vadd.f32 %v3255_v23, %v2253_v43 }
0x180d   :  { %v2243_v40 = vmul.f32 %v3347_v27, %v2242_v38 }
0x180f   :  { %v2247_v41 = vsel %vm2246_vm14, %v3347_v27, %v2243_v40  ;;  %v3201_v27 = vld [vmem:[%s4295_s20 + $0x40] sm:$0xff] }
0x1810   :  { %v2249_v44 = vmul.f32 %v2247_v41, %v2215_v52  ;;  %2464 = vmatpush.bf16.msra.mxu1 %v3201_v27 }
0x1812   :  { %v2254_v32 = vmul.f32 %v3254_v39, %v2249_v44 }
0x1814   :  { %v4179_v30 = vadd.f32 %v3255_v23, %v2254_v32 }
0x1816   :  { %v2260_v47 = vpack.c.bf16 %v4179_v30, %v4177_v46 }
0x1818   :  { %3068 = vmatmul.msk.bf16.vlgmr.msrb.gmra.mxu3 %vm205_vm7, %v2260_v47 }
0x189b   :  { %v2295_v50 = vpop.f32.mrf.mxu3 }
0x189c   :  { %v4187_v51 = vadd.f32 %v3256_v48, %v2295_v50 }
0x189e   :  { %v2302_v33 = vmul.f32 0.70710677, %v4187_v51 }
0x18a0   :  { %v4193_v55 = vclamps-f32 %v2302_v33, 4.0 }
0x18a2   :  { %v2308_v45 = vmul.f32 %v4193_v55, %v4193_v55 }
0x18a3   :  { %v2297_v35 = vpop.f32.mrf.mxu3 }
0x18a4   :  { %v2328_v34 = vmul.f32 -1.1791603e-07, %v2308_v45  ;;  %v4200_v29 = vadd.f32 %v3256_v48, %v2297_v35  ;;  %v2310_v8 = vmul.f32 0.00022905065, %v2308_v45 }
0x18a6   :  { %v2330_v62 = vadd.f32 2.3547966e-05, %v2328_v34  ;;  %v2303_v1 = vmul.f32 0.70710677, %v4200_v29  ;;  %v2312_v60 = vadd.f32 0.003408291, %v2310_v8 }
0x18a8   :  { %v2332_v2 = vmul.f32 %v2330_v62, %v2308_v45  ;;  %v4206_v42 = vclamps-f32 %v2303_v1, 4.0  ;;  %v2314_v59 = vmul.f32 %v2312_v60, %v2308_v45 }
0x18aa   :  { %v2334_v3 = vadd.f32 0.0010179626, %v2332_v2  ;;  %v2309_v5 = vmul.f32 %v4206_v42, %v4206_v42  ;;  %v2316_v28 = vadd.f32 0.050955694, %v2314_v59 }
0x18ac   :  { %v2336_v26 = vmul.f32 %v2334_v3, %v2308_v45  ;;  %v2329_v37 = vmul.f32 -1.1791603e-07, %v2309_v5  ;;  %v2311_v19 = vmul.f32 0.00022905065, %v2309_v5  ;;  %v2318_v10 = vmul.f32 %v2316_v28, %v2308_v45 }
0x18ae   :  { %v2338_v6 = vadd.f32 0.01407047, %v2336_v26  ;;  %v2331_v11 = vadd.f32 2.3547966e-05, %v2329_v37  ;;  %v2313_v0 = vadd.f32 0.003408291, %v2311_v19 }
0x18af   :  { %v2320_v41 = vadd.f32 0.18520832, %v2318_v10 }
0x18b0   :  { %v2340_v58 = vmul.f32 %v2338_v6, %v2308_v45  ;;  %v2333_v52 = vmul.f32 %v2331_v11, %v2309_v5  ;;  %v2315_v36 = vmul.f32 %v2313_v0, %v2309_v5 }
0x18b1   :  { %v2322_v47 = vmul.f32 %v2320_v41, %v2308_v45 }
0x18b2   :  { %v2342_v53 = vadd.f32 0.11098505, %v2340_v58  ;;  %v2335_v12 = vadd.f32 0.0010179626, %v2333_v52  ;;  %v2317_v39 = vadd.f32 0.050955694, %v2315_v36 }
0x18b3   :  { %v2324_v34 = vadd.f32 1.1283791, %v2322_v47 }
0x18b4   :  { %v2344_v13 = vmul.f32 %v2342_v53, %v2308_v45  ;;  %v2337_v56 = vmul.f32 %v2335_v12, %v2309_v5  ;;  %v2319_v44 = vmul.f32 %v2317_v39, %v2309_v5  ;;  %v2301_v12 = vmul.f32 0.5, %v4200_v29 }
0x18b5   :  { %v2326_v4 = vmul.f32 %v4193_v55, %v2324_v34  ;;  %v2300_v55 = vmul.f32 0.5, %v4187_v51 }
0x18b6   :  { %v2346_v14 = vadd.f32 0.49746925, %v2344_v13  ;;  %v2339_v16 = vadd.f32 0.01407047, %v2337_v56  ;;  %v2321_v50 = vadd.f32 0.18520832, %v2319_v44 }
0x18b8   :  { %v2348_v17 = vmul.f32 %v2346_v14, %v2308_v45  ;;  %v2341_v20 = vmul.f32 %v2339_v16, %v2309_v5  ;;  %v2323_v63 = vmul.f32 %v2321_v50, %v2309_v5 }
0x18ba   :  { %v2350_v24 = vadd.f32 1.0, %v2348_v17  ;;  %v2343_v31 = vadd.f32 0.11098505, %v2341_v20  ;;  %v2325_v37 = vadd.f32 1.1283791, %v2323_v63 }
0x18bc   :  { %3348 = vrcp.f32 %v2350_v24  ;;  %v2345_v9 = vmul.f32 %v2343_v31, %v2309_v5  ;;  %v2363_v54 = vand.u32 2147483648, %v2350_v24  ;;  %vm2357_vm3 = vweird.f32 %v2350_v24 }
0x18bd   :  { %v2361_v57 = vand.u32 2147483647, %v2350_v24  ;;  %v2327_v52 = vmul.f32 %v4206_v42, %v2325_v37 }
0x18be   :  { %v2347_v38 = vadd.f32 0.49746925, %v2345_v9  ;;  %v2364_v2 = vor.u32 1.1754944e-38, %v2363_v54 }
0x18bf   :  { %vm2362_vm5 = vcmp.eq.f32.partialorder %v2361_v57, 8.507059e+37 }
0x18c0   :  { %v2349_v18 = vmul.f32 %v2347_v38, %v2309_v5 }
0x18c2   :  { %v3349_v40 = vpop.eup %3348  ;;  %v2351_v43 = vadd.f32 1.0, %v2349_v18 }
0x18c3   :  { %v2353_v23 = vmul.f32 %v3349_v40, %v2350_v24  ;;  %vm2358_vm2 = vweird.f32 %v3349_v40 }
0x18c4   :  { %3350 = vrcp.f32 %v2351_v43  ;;  %vm2359_vm4 = vmor %vm2357_vm3, %vm2358_vm2  ;;  %v2378_v45 = vand.u32 2147483648, %v2351_v43  ;;  %v2376_v7 = vand.u32 2147483647, %v2351_v43  ;;  %vm2372_vm8 = vweird.f32 %v2351_v43 }
0x18c5   :  { %v2354_v32 = vsub.f32 1.0, %v2353_v23  ;;  %v3210_v23 = vld [vmem:[%s4299_s24 + $0x8] sm:$0xff] }
0x18c6   :  { %v2379_v58 = vor.u32 1.1754944e-38, %v2378_v45  ;;  %vm2377_vm10 = vcmp.eq.f32.partialorder %v2376_v7, 8.507059e+37  ;;  %2589 = vmatpush.bf16.msra.mxu2 %v3210_v23  ;;  %v3259_v7 = vld [vmem:[%s4298_s23 + $0x1] ss:$0 sm:$0xff] }
0x18c7   :  { %v2355_v48 = vmul.f32 %v3349_v40, %v2354_v32 }
0x18c9   :  { %v2356_v33 = vadd.f32 %v3349_v40, %v2355_v48 }
0x18ca   :  { %v3351_v35 = vpop.eup %3350 }
0x18cb   :  { %v2360_v62 = vsel %vm2359_vm4, %v3349_v40, %v2356_v33  ;;  %v2368_v1 = vmul.f32 %v3351_v35, %v2351_v43  ;;  %vm2373_vm6 = vweird.f32 %v3351_v35 }
0x18cc   :  { %v2365_v26 = vsel %vm2362_vm5, %v2364_v2, %v2360_v62  ;;  %vm2374_vm9 = vmor %vm2372_vm8, %vm2373_vm6 }
0x18cd   :  { %v2369_v3 = vsub.f32 1.0, %v2368_v1  ;;  %v2366_v8 = vmul.f32 %v2365_v26, %v2326_v4 }
0x18cf   :  { %v2370_v6 = vmul.f32 %v3351_v35, %v2369_v3  ;;  %v2382_v61 = vadd.f32 1.0, %v2366_v8  ;;  %v3258_v3 = vld [vmem:[%s4297_s22 + $0x1] ss:$0 sm:$0xff] }
0x18d1   :  { %v2371_v11 = vadd.f32 %v3351_v35, %v2370_v6  ;;  %v2384_v19 = vmul.f32 %v2382_v61, %v2300_v55  ;;  %v3260_v61 = vld [vmem:[%s4300_s25] ss:$0 sm:$0xff] }
0x18d3   :  { %v2375_v5 = vsel %vm2374_vm9, %v3351_v35, %v2371_v11 }
0x18d4   :  { %v2380_v53 = vsel %vm2377_vm10, %v2379_v58, %v2375_v5 }
0x18d5   :  { %v2381_v60 = vmul.f32 %v2380_v53, %v2327_v52  ;;  %v3209_v52 = vld [vmem:[%s4299_s24] sm:$0xff] }
0x18d6   :  { %2590 = vmatpush.bf16.msra.mxu2 %v3209_v52 }
0x18d7   :  { %v2383_v13 = vadd.f32 1.0, %v2381_v60 }
0x18d9   :  { %v2385_v56 = vmul.f32 %v2383_v13, %v2301_v12 }
0x18db   :  { %v2403_v14 = vpack.c.bf16 %v2385_v56, %v2384_v19  ;;  %v3261_v56 = vld [vmem:[%s4302_s27] ss:$0 sm:$0xff] }
0x18dd   :  { %2465 = vmatmul.bf16.vlgmr.msra.gmra.mxu1 %v2403_v14 }
0x195a   :  { %v2466_v59 = vpop.f32.mrf.mxu1 }
0x195b   :  { %v2467_v42 = vadd.f32 %v3257_v15, %v2466_v59 }
0x195d   :  { %v2471_v16 = vadd.f32 %v2467_v42, %v4177_v46 }
0x195f   :  { %v2477_v17 = vsel %vm205_vm7, %v2471_v16, 0.0 }
0x1960   :  { %2478 = vadd.xlane.f32.xlu0 %v2477_v17 }
0x1962   :  { %v2468_v0 = vpop.f32.mrf.mxu1 }
0x1963   :  { %v2469_v51 = vadd.f32 %v3257_v15, %v2468_v0 }
0x1965   :  { %v2472_v29 = vadd.f32 %v2469_v51, %v4179_v30 }
0x1967   :  { %v2480_v20 = vsel %vm205_vm7, %v2472_v29, 0.0 }
0x1968   :  { %2481 = vadd.xlane.f32.xlu2 %v2480_v20 }
0x19d3   :  { %v2479_v24 = vpop.xlane.xlu0 %2478 }
0x19d4   :  { %v2483_v27 = vmul.f32 %v2479_v24, %v3612_v49 }
0x19d6   :  { %v2485_v28 = vsub.f32 %v2471_v16, %v2483_v27 }
0x19d8   :  { %v2487_v31 = vmul.f32 %v2485_v28, %v2485_v28 }
0x19da   :  { %v2489_v36 = vsel %vm205_vm7, %v2487_v31, 0.0 }
0x19db   :  { %v2482_v9 = vpop.xlane.xlu2 %2481  ;;  %2490 = vadd.xlane.f32.xlu2 %v2489_v36 }
0x19dc   :  { %v2484_v46 = vmul.f32 %v2482_v9, %v3612_v49 }
0x19de   :  { %v2486_v10 = vsub.f32 %v2472_v29, %v2484_v46 }
0x19e0   :  { %v2488_v38 = vmul.f32 %v2486_v10, %v2486_v10 }
0x19e2   :  { %v2492_v39 = vsel %vm205_vm7, %v2488_v38, 0.0 }
0x19e3   :  { %2493 = vadd.xlane.f32.xlu1 %v2492_v39 }
0x1a4e   :  { %v2491_v30 = vpop.xlane.xlu2 %2490 }
0x1a4f   :  { %v2495_v18 = vmul.f32 %v2491_v30, %v3612_v49 }
0x1a51   :  { %v2497_v40 = vadd.f32 1e-05, %v2495_v18 }
0x1a53   :  { %3352 = vrsqrt.f32 %v2497_v40  ;;  %vm2505_vm15 = vweird.f32 %v2497_v40 }
0x1a56   :  { %v2494_v41 = vpop.xlane.xlu1 %2493 }
0x1a57   :  { %v2496_v43 = vmul.f32 %v2494_v41, %v3612_v49  ;;  %v2532_v49 = vshrl.u32 %v95_v21, 7 }
0x1a59   :  { %v3353_v44 = vpop.eup %3352  ;;  %v2498_v32 = vadd.f32 1e-05, %v2496_v43  ;;  %v2533_v45 = vmul.u32 8, %v2532_v49 }
0x1a5a   :  { %v2500_v47 = vmul.f32 %v3353_v44, %v2497_v40  ;;  %vm2506_vm0 = vweird.f32 %v3353_v44 }
0x1a5b   :  { %3354 = vrsqrt.f32 %v2498_v32  ;;  %vm2507_vm11 = vmor %vm2505_vm15, %vm2506_vm0  ;;  %vm2515_vm13 = vweird.f32 %v2498_v32  ;;  %vm2534_vm2 = vcmp.eq.s32.totalorder %v3597_v22, %v2533_v45  ;;  %v3212_v22 = vld [vmem:[%s4301_s26 + $0x8] sm:$0xff] }
0x1a5c   :  { %v2501_v48 = vmul.f32 %v3353_v44, %v2500_v47  ;;  %v2535_v58 = vsel %vm2534_vm2, 1.0, %v3387_v25  ;;  %2627 = vmatpush.bf16.msra.mxu3 %v3212_v22  ;;  %v3211_v25 = vld [vmem:[%s4301_s26] sm:$0xff] }
0x1a5e   :  { %v2502_v50 = vmul.f32 0.5, %v2501_v48 }
0x1a60   :  { %v2503_v33 = vsub.f32 1.5, %v2502_v50  ;;  %2628 = vmatpush.bf16.msra.mxu3 %v3211_v25 }
0x1a61   :  { %v3355_v54 = vpop.eup %3354 }
0x1a62   :  { %v2510_v57 = vmul.f32 %v3355_v54, %v2498_v32  ;;  %v2504_v35 = vmul.f32 %v3353_v44, %v2503_v33  ;;  %vm2516_vm12 = vweird.f32 %v3355_v54 }
0x1a63   :  { %vm2517_vm14 = vmor %vm2515_vm13, %vm2516_vm12 }
0x1a64   :  { %v2511_v34 = vmul.f32 %v3355_v54, %v2510_v57  ;;  %v2508_v63 = vsel %vm2507_vm11, %v3353_v44, %v2504_v35 }
0x1a65   :  { %v2519_v4 = vmul.f32 %v2508_v63, %v2485_v28 }
0x1a66   :  { %v2512_v62 = vmul.f32 0.5, %v2511_v34 }
0x1a67   :  { %v2524_v8 = vmul.f32 %v3258_v3, %v2519_v4 }
0x1a68   :  { %v2513_v1 = vsub.f32 1.5, %v2512_v62 }
0x1a69   :  { %v2529_v11 = vadd.f32 %v3259_v7, %v2524_v8 }
0x1a6a   :  { %v2514_v2 = vmul.f32 %v3355_v54, %v2513_v1 }
0x1a6c   :  { %v2518_v26 = vsel %vm2517_vm14, %v3355_v54, %v2514_v2 }
0x1a6d   :  { %v2520_v37 = vmul.f32 %v2518_v26, %v2486_v10 }
0x1a6f   :  { %v2525_v6 = vmul.f32 %v3258_v3, %v2520_v37 }
0x1a71   :  { %v2530_v21 = vadd.f32 %v3259_v7, %v2525_v6 }
0x1a73   :  { %2553 = vmatpush.msrb.mxu0 %v2530_v21 }
0x1a75   :  { %2554 = vmatpush.msrb.mxu0 %v2529_v11 }
0x1a76   :  { %3122 = vmatmul.msk.f32.vlgmr.msrb.gmra.mxu0 %vm402_vm1, %v2535_v58  ;;  %vm2634_vm1 = vcmask 9216  }
0x1af3   :  { %v2556_v5 = vpop.f32.mrf.mxu0 }
0x1af4   :  { %v2563_v53 = vpack.c.bf16 %v2556_v5, %v2556_v5 }
0x1af6   :  { %3131 = vmatmul.msk.bf16.vlgmr.msra.gmra.mxu2 %vm205_vm7, %v2563_v53 }
0x1b79   :  { %v2592_v60 = vpop.f32.mrf.mxu2 }
0x1b7a   :  { %v2593_v55 = vadd.f32 %v3260_v61, %v2592_v60 }
0x1b7c   :  { %3356 = vtanh.f32 %v2593_v55 }
0x1b81   :  { %v2594_v12 = vpop.f32.mrf.mxu2 }
0x1b82   :  { %v3357_v13 = vpop.eup %3356 }
0x1b83   :  { %v2601_v19 = vpack.c.bf16 %v3357_v13, %v3357_v13 }
0x1b85   :  { %3140 = vmatmul.msk.bf16.vlgmr.msra.gmra.mxu3 %vm205_vm7, %v2601_v19 }
0x1c08   :  { %v2630_v14 = vpop.f32.mrf.mxu3 }
0x1c09   :  { %v2631_v15 = vadd.f32 %v3261_v56, %v2630_v14 }
0x1c0b   :  { %2635 = vst.msk [vmem:[#allocation2] sm:$0x3] %vm2634_vm1, %v2631_v15 }
0x1c0c   :  { %2646 = dma.vmem_to_hbm [thread:$0]  %s2642_s13, 32, %s2644_s29, [#allocation3]  }
0x1c10   :  { %v2632_v59 = vpop.f32.mrf.mxu3 }
0x1c11   :  { %3384 = dma.done.wait [#allocation3], 32  }
0x1c12   :  { %3385 = vsyncadd [#allocation3], 4294967264 }
0x1c13   :  { %2651 = vsyncpa [#allocation3], 1 }

</bundles_post_ra>
